<compile_context>
chip_gen: v5e
topology: v5e:2x2
jax: 0.10.0
libtpu: 0.0.40
codegen_flags: <defaults>
</compile_context>

<pallas_src>
import functools

import numpy as np
import jax
import jax.numpy as jnp
from jax.experimental import pallas as pl
from jax.experimental.pallas import tpu as pltpu


# ------------------------------ fused kernel --------------------------------

def _net_fused_kernel(x_ref, w1_ref, b1_ref, w2_ref, b2_ref,
                      fc1w_ref, fc1b_ref, fc2w_ref, fc2b_ref, o_ref):
    """One batch tile (B images) through the whole network, all stages fused."""
    GL = 128                                   # per-group lane stride (tile aligned)
    assert w1_ref.shape[1] == 8 * GL and w2_ref.shape == (GL, 2 * GL)

    # ---- conv1 + bias + ReLU for every (h, wo, c) in ONE MXU matmul ----
    # w1_ref column layout: group g = 2*h + (wo & 1); lane within group = (wo//2)*C1 + c.
    # Padding lanes have zero weight and zero bias, so they stay exactly 0 after ReLU.
    m = jnp.dot(x_ref[...], w1_ref[...], preferred_element_type=jnp.float32)
    m = jnp.maximum(m + b1_ref[...], 0.0)      # (B, 1024)

    b2 = b2_ref[...]                           # (1, 256) -- added once per matmul
    w2 = w2_ref[...]                           # (128, 256)

    def stage2_row(hp):
        # 2x2 max-pool of conv1: groups 4*hp .. 4*hp+3 cover (h in {2hp,2hp+1}) x (even/odd wo);
        # all slices are 128-lane aligned, pooled lanes are wp*C1 + c.
        g0 = 4 * hp * GL
        p = m[:, g0:g0 + GL]
        for k in range(1, 4):
            p = jnp.maximum(p, m[:, g0 + k * GL:g0 + (k + 1) * GL])
        # conv2: KW*C1 taps folded into K, both output columns folded into N
        # (cols 0:50 -> wo2=0, cols 128:178 -> wo2=1, rest zero).
        y = jnp.dot(p, w2, preferred_element_type=jnp.float32)
        return jnp.maximum(y + b2, 0.0)        # (B, 256)

    # ---- second 2x2 max-pool: over hp (two rows) and over the two wo2 columns ----
    t = jnp.maximum(stage2_row(0), stage2_row(1))      # (B, 256)
    feat = jnp.maximum(t[:, :GL], t[:, GL:])           # (B, 128); lanes 0:50 = features, rest 0

    # ---- fc1 + ReLU, fc2 + log_softmax (batch in the MXU M dimension) ----
    h = jnp.dot(feat, fc1w_ref[...], preferred_element_type=jnp.float32) + fc1b_ref[...]
    h = jnp.maximum(h, 0.0)                            # (B, 80)
    logits = jnp.dot(h, fc2w_ref[...], preferred_element_type=jnp.float32) + fc2b_ref[...]
    z = logits - jnp.max(logits, axis=-1, keepdims=True)
    o_ref[...] = z - jnp.log(jnp.sum(jnp.exp(z), axis=-1, keepdims=True))   # (B, NCLS)


# ------------------------------ params / packing -----------------------------

def init_params(key):
    """Raw weights in PyTorch layouts."""
    ks = jax.random.split(key, 8)
    return {
        "conv1_w": jax.random.normal(ks[0], (20, 1, 1, 3), jnp.float32) * 0.1,  # Conv2d(1,20,(1,3))
        "conv1_b": jax.random.normal(ks[1], (20,), jnp.float32) * 0.1,
        "conv2_w": jax.random.normal(ks[2], (50, 20, 1, 3), jnp.float32) * 0.1,  # Conv2d(20,50,(1,3))
        "conv2_b": jax.random.normal(ks[3], (50,), jnp.float32) * 0.1,
        "fc1_w": jax.random.normal(ks[4], (80, 50), jnp.float32) * 0.1,          # Linear(50,80): (out,in)
        "fc1_b": jax.random.normal(ks[5], (80,), jnp.float32) * 0.1,
        "fc2_w": jax.random.normal(ks[6], (3, 80), jnp.float32) * 0.1,           # Linear(80,3)
        "fc2_b": jax.random.normal(ks[7], (3,), jnp.float32) * 0.1,
    }


def pack_params(raw, H, W):
    """Pre-pack weights ONCE into banded / padded kernel layouts (no per-call work)."""
    GL = 128
    w1 = np.asarray(raw["conv1_w"], np.float32)[:, 0, 0, :]   # (C1, KW)
    b1 = np.asarray(raw["conv1_b"], np.float32)
    w2 = np.asarray(raw["conv2_w"], np.float32)[:, :, 0, :]   # (C2, C1, KW)
    b2 = np.asarray(raw["conv2_b"], np.float32)
    fc1_w = np.asarray(raw["fc1_w"], np.float32)               # (F1, C2)
    fc1_b = np.asarray(raw["fc1_b"], np.float32)
    fc2_w = np.asarray(raw["fc2_w"], np.float32)               # (NCLS, F1)
    fc2_b = np.asarray(raw["fc2_b"], np.float32)
    C1, KW = w1.shape
    C2, F1 = w2.shape[0], fc1_w.shape[0]

    W1o = W - (KW - 1)
    Hp, Wp = H // 2, W1o // 2
    W2o = Wp - (KW - 1)
    # TODO(synk): the original forward's x.view(-1, 4*4*50) is inconsistent with
    # nn.Linear(50, 80); as before we support inputs whose spatial dims collapse to
    # 1x1 after the two conv/pool stages (H=4, W=10) so the flatten yields 50 features.
    assert H == 4 and W1o == 8 and Hp == 2 and Wp == 4 and W2o == 2, (H, W)

    # conv1 as one banded matmul: (B, H*W) @ (H*W, 8*128).
    # Column layout: group g = 2*h + (wo & 1); lane within group = (wo//2)*C1 + c.
    w1big = np.zeros((H * W, 2 * H * GL), np.float32)
    b1big = np.zeros((1, 2 * H * GL), np.float32)
    for h in range(H):
        for parity in range(2):
            g = 2 * h + parity
            for wp in range(Wp):
                wo = 2 * wp + parity
                for c in range(C1):
                    col = g * GL + wp * C1 + c
                    b1big[0, col] = b1[c]
                    for kw in range(KW):
                        w1big[h * W + wo + kw, col] = w1[c, kw]

    # conv2: K = pooled-row lanes (wp*C1 + c, padded to 128), N = both output columns.
    w2ab = np.zeros((GL, 2 * GL), np.float32)
    b2ab = np.zeros((1, 2 * GL), np.float32)
    for wo2 in range(W2o):
        b2ab[0, wo2 * GL:wo2 * GL + C2] = b2
        for kw in range(KW):
            wp = wo2 + kw
            w2ab[wp * C1:(wp + 1) * C1, wo2 * GL:wo2 * GL + C2] = w2[:, :, kw].T

    # fc1: pad K from C2=50 up to 128 so its LHS is the (B,128) pooled feature slab.
    fc1w_pad = np.zeros((GL, F1), np.float32)
    fc1w_pad[:C2, :] = fc1_w.T

    return {
        "w1big": jnp.asarray(w1big), "b1big": jnp.asarray(b1big),
        "w2ab": jnp.asarray(w2ab), "b2ab": jnp.asarray(b2ab),
        "fc1w": jnp.asarray(fc1w_pad), "fc1b": jnp.asarray(fc1_b.reshape(1, -1)),
        "fc2w": jnp.asarray(np.ascontiguousarray(fc2_w.T)),
        "fc2b": jnp.asarray(fc2_b.reshape(1, -1)),
    }


# --------------------------------- wrapper -----------------------------------

def _round_up(n, m):
    return ((n + m - 1) // m) * m


@functools.partial(jax.jit, static_argnames=("b_tile",))
def net_forward(x_nchw, kp, b_tile=256):
    N, Cin, H, W = x_nchw.shape
    assert Cin == 1
    HW = H * W
    assert HW == kp["w1big"].shape[0], "params were packed for a different spatial size"
    F1, NCLS = kp["fc1w"].shape[1], kp["fc2w"].shape[1]

    bt = min(b_tile, _round_up(N, 8))          # batch tile (multiple of 8 sublanes)
    Np = _round_up(N, bt)
    x = x_nchw.reshape(N, HW).astype(jnp.float32)
    if Np != N:
        x = jnp.pad(x, ((0, Np - N), (0, 0)))

    n1, n2 = kp["w1big"].shape[1], kp["w2ab"].shape[1]
    flops = 2 * Np * (HW * n1 + 2 * 128 * n2 + 128 * F1 + F1 * NCLS)
    bytes_accessed = 4 * (Np * HW + Np * NCLS +
                          sum(int(np.prod(v.shape)) for v in kp.values()))
    cost = pl.CostEstimate(flops=int(flops), transcendentals=int(Np * (NCLS + 1)),
                           bytes_accessed=int(bytes_accessed))

    out = pl.pallas_call(
        _net_fused_kernel,
        grid=(Np // bt,),
        in_specs=[
            pl.BlockSpec((bt, HW), lambda n: (n, 0)),                 # batched input tile
            pl.BlockSpec(kp["w1big"].shape, lambda n: (0, 0)),        # conv1 banded weight
            pl.BlockSpec(kp["b1big"].shape, lambda n: (0, 0)),
            pl.BlockSpec(kp["w2ab"].shape, lambda n: (0, 0)),         # conv2 packed weight
            pl.BlockSpec(kp["b2ab"].shape, lambda n: (0, 0)),
            pl.BlockSpec(kp["fc1w"].shape, lambda n: (0, 0)),
            pl.BlockSpec(kp["fc1b"].shape, lambda n: (0, 0)),
            pl.BlockSpec(kp["fc2w"].shape, lambda n: (0, 0)),
            pl.BlockSpec(kp["fc2b"].shape, lambda n: (0, 0)),
        ],
        out_specs=pl.BlockSpec((bt, NCLS), lambda n: (n, 0)),         # sublane-dense writeback
        out_shape=jax.ShapeDtypeStruct((Np, NCLS), jnp.float32),
        compiler_params=pltpu.CompilerParams(
            dimension_semantics=("parallel",)),                       # 2 TCs on v7x get real work
        cost_estimate=cost,
    )(x, kp["w1big"], kp["b1big"], kp["w2ab"], kp["b2ab"],
      kp["fc1w"], kp["fc1b"], kp["fc2w"], kp["fc2b"])
    return out[:N]


# --------------------------- pure-JAX reference ------------------------------

def net_forward_ref(x_nchw, raw):
    """Plain-JAX reference from the raw PyTorch-layout weights (checks the packing too)."""
    hi = jax.lax.Precision.HIGHEST
    x = x_nchw.astype(jnp.float32)
    N, _, H, W = x.shape
    w1, b1 = raw["conv1_w"], raw["conv1_b"]
    w2, b2 = raw["conv2_w"], raw["conv2_b"]
    C1, _, _, KW = w1.shape
    C2 = w2.shape[0]
    W1o = W - KW + 1
    y1 = b1[None, :, None, None] + sum(
        x[:, 0:1, :, kw:kw + W1o] * w1[None, :, 0, 0, kw][:, :, None, None]
        for kw in range(KW))
    y1 = jnp.maximum(y1, 0.0)                                       # (N, C1, H, W1)
    Hp, Wp = H // 2, W1o // 2
    p1 = y1[:, :, :2 * Hp, :2 * Wp].reshape(N, C1, Hp, 2, Wp, 2).max(axis=(3, 5))
    W2o = Wp - KW + 1
    y2 = b2[None, :, None, None] + sum(
        jnp.einsum("nchw,dc->ndhw", p1[:, :, :, kw:kw + W2o], w2[:, :, 0, kw], precision=hi)
        for kw in range(KW))
    y2 = jnp.maximum(y2, 0.0)                                       # (N, C2, Hp, W2o)
    Hq, Wq = Hp // 2, W2o // 2
    p2 = y2[:, :, :2 * Hq, :2 * Wq].reshape(N, C2, Hq, 2, Wq, 2).max(axis=(3, 5))
    feat = p2.reshape(N, -1)                                        # (N, 50)
    h = jnp.maximum(jnp.dot(feat, raw["fc1_w"].T, precision=hi) + raw["fc1_b"], 0.0)
    logits = jnp.dot(h, raw["fc2_w"].T, precision=hi) + raw["fc2_b"]
    return jax.nn.log_softmax(logits, axis=-1)


if __name__ == "__main__":
    key = jax.random.PRNGKey(0)
    pkey, xkey = jax.random.split(key)
    raw = init_params(pkey)
    kp = pack_params(raw, H=4, W=10)

    # Batch of 512 images (two 256-image grid blocks) of shape (1, 4, 10): spatial dims
    # collapse to 1x1 after the two conv/pool stages, giving the 50 features fc1 expects.
    x = jax.random.normal(xkey, (512, 1, 4, 10), jnp.float32)

    out = jax.block_until_ready(net_forward(x, kp))
    ref = jax.block_until_ready(net_forward_ref(x, raw))

    assert out.shape == (512, 3), out.shape
    # log_softmax sanity: each row's probabilities sum to ~1
    assert jnp.allclose(jnp.sum(jnp.exp(out), axis=1), 1.0, atol=1e-4)
    # match the pure-JAX reference
    assert jnp.allclose(out, ref, atol=2e-3, rtol=2e-3), float(jnp.max(jnp.abs(out - ref)))
    print("KERNEL_OK")
</pallas_src>

<mosaic_0001>
module attributes {stable_mosaic.version = 11 : i64} {
  func.func @_net_fused_kernel(%arg0: i32, %arg1: memref<256x40xf32, #tpu.memory_space<vmem>>, %arg2: memref<40x1024xf32, #tpu.memory_space<vmem>>, %arg3: memref<1x1024xf32, #tpu.memory_space<vmem>>, %arg4: memref<128x256xf32, #tpu.memory_space<vmem>>, %arg5: memref<1x256xf32, #tpu.memory_space<vmem>>, %arg6: memref<128x80xf32, #tpu.memory_space<vmem>>, %arg7: memref<1x80xf32, #tpu.memory_space<vmem>>, %arg8: memref<80x3xf32, #tpu.memory_space<vmem>>, %arg9: memref<1x3xf32, #tpu.memory_space<vmem>>, %arg10: memref<256x3xf32, #tpu.memory_space<vmem>>) attributes {dimension_semantics = [#tpu.dimension_semantics<parallel>], iteration_bounds = array<i64: 2>, scalar_prefetch = 0 : i64, scratch_operands = 0 : i64, tpu.core_type = #tpu.core_type<tc>, window_params = [{transform_indices = @transform_0, window_bounds = array<i64: 256, 40>}, {pipeline_mode = #tpu.pipeline_mode<synchronous>, transform_indices = @transform_1, window_bounds = array<i64: 40, 1024>}, {pipeline_mode = #tpu.pipeline_mode<synchronous>, transform_indices = @transform_2, window_bounds = array<i64: 1, 1024>}, {pipeline_mode = #tpu.pipeline_mode<synchronous>, transform_indices = @transform_3, window_bounds = array<i64: 128, 256>}, {pipeline_mode = #tpu.pipeline_mode<synchronous>, transform_indices = @transform_4, window_bounds = array<i64: 1, 256>}, {pipeline_mode = #tpu.pipeline_mode<synchronous>, transform_indices = @transform_5, window_bounds = array<i64: 128, 80>}, {pipeline_mode = #tpu.pipeline_mode<synchronous>, transform_indices = @transform_6, window_bounds = array<i64: 1, 80>}, {pipeline_mode = #tpu.pipeline_mode<synchronous>, transform_indices = @transform_7, window_bounds = array<i64: 80, 3>}, {pipeline_mode = #tpu.pipeline_mode<synchronous>, transform_indices = @transform_8, window_bounds = array<i64: 1, 3>}, {transform_indices = @transform_9, window_bounds = array<i64: 256, 3>}]} {
    %c0 = arith.constant 0 : index
    %c0_0 = arith.constant 0 : index
    %0 = vector.load %arg1[%c0, %c0_0] : memref<256x40xf32, #tpu.memory_space<vmem>>, vector<256x40xf32>
    %c0_1 = arith.constant 0 : index
    %c0_2 = arith.constant 0 : index
    %1 = vector.load %arg2[%c0_1, %c0_2] : memref<40x1024xf32, #tpu.memory_space<vmem>>, vector<40x1024xf32>
    %cst = arith.constant dense<0.000000e+00> : vector<256x1024xf32>
    %2 = tpu.matmul %0, %1, %cst {dimension_numbers = #tpu.dot_dimension_numbers<[1], [0], [0], [1], [0, 0, 1, 1], [], []>} : vector<256x40xf32>, vector<40x1024xf32>, vector<256x1024xf32> -> vector<256x1024xf32>
    %c0_3 = arith.constant 0 : index
    %c0_4 = arith.constant 0 : index
    %3 = vector.load %arg3[%c0_3, %c0_4] : memref<1x1024xf32, #tpu.memory_space<vmem>>, vector<1x1024xf32>
    %4 = vector.broadcast %3 : vector<1x1024xf32> to vector<256x1024xf32>
    %5 = arith.addf %2, %4 : vector<256x1024xf32>
    %cst_5 = arith.constant 0.000000e+00 : f32
    %6 = vector.broadcast %cst_5 : f32 to vector<256x1024xf32>
    %7 = arith.maximumf %5, %6 : vector<256x1024xf32>
    %c0_6 = arith.constant 0 : index
    %c0_7 = arith.constant 0 : index
    %8 = vector.load %arg5[%c0_6, %c0_7] : memref<1x256xf32, #tpu.memory_space<vmem>>, vector<1x256xf32>
    %c0_8 = arith.constant 0 : index
    %c0_9 = arith.constant 0 : index
    %9 = vector.load %arg4[%c0_8, %c0_9] : memref<128x256xf32, #tpu.memory_space<vmem>>, vector<128x256xf32>
    %10 = vector.extract_strided_slice %7 {offsets = [0, 0], sizes = [256, 128], strides = [1, 1]} : vector<256x1024xf32> to vector<256x128xf32>
    %11 = vector.extract_strided_slice %7 {offsets = [0, 128], sizes = [256, 128], strides = [1, 1]} : vector<256x1024xf32> to vector<256x128xf32>
    %12 = arith.maximumf %10, %11 : vector<256x128xf32>
    %13 = vector.extract_strided_slice %7 {offsets = [0, 256], sizes = [256, 128], strides = [1, 1]} : vector<256x1024xf32> to vector<256x128xf32>
    %14 = arith.maximumf %12, %13 : vector<256x128xf32>
    %15 = vector.extract_strided_slice %7 {offsets = [0, 384], sizes = [256, 128], strides = [1, 1]} : vector<256x1024xf32> to vector<256x128xf32>
    %16 = arith.maximumf %14, %15 : vector<256x128xf32>
    %cst_10 = arith.constant dense<0.000000e+00> : vector<256x256xf32>
    %17 = tpu.matmul %16, %9, %cst_10 {dimension_numbers = #tpu.dot_dimension_numbers<[1], [0], [0], [1], [0, 0, 1, 1], [], []>} : vector<256x128xf32>, vector<128x256xf32>, vector<256x256xf32> -> vector<256x256xf32>
    %18 = vector.broadcast %8 : vector<1x256xf32> to vector<256x256xf32>
    %19 = arith.addf %17, %18 : vector<256x256xf32>
    %cst_11 = arith.constant 0.000000e+00 : f32
    %20 = vector.broadcast %cst_11 : f32 to vector<256x256xf32>
    %21 = arith.maximumf %19, %20 : vector<256x256xf32>
    %22 = vector.extract_strided_slice %7 {offsets = [0, 512], sizes = [256, 128], strides = [1, 1]} : vector<256x1024xf32> to vector<256x128xf32>
    %23 = vector.extract_strided_slice %7 {offsets = [0, 640], sizes = [256, 128], strides = [1, 1]} : vector<256x1024xf32> to vector<256x128xf32>
    %24 = arith.maximumf %22, %23 : vector<256x128xf32>
    %25 = vector.extract_strided_slice %7 {offsets = [0, 768], sizes = [256, 128], strides = [1, 1]} : vector<256x1024xf32> to vector<256x128xf32>
    %26 = arith.maximumf %24, %25 : vector<256x128xf32>
    %27 = vector.extract_strided_slice %7 {offsets = [0, 896], sizes = [256, 128], strides = [1, 1]} : vector<256x1024xf32> to vector<256x128xf32>
    %28 = arith.maximumf %26, %27 : vector<256x128xf32>
    %cst_12 = arith.constant dense<0.000000e+00> : vector<256x256xf32>
    %29 = tpu.matmul %28, %9, %cst_12 {dimension_numbers = #tpu.dot_dimension_numbers<[1], [0], [0], [1], [0, 0, 1, 1], [], []>} : vector<256x128xf32>, vector<128x256xf32>, vector<256x256xf32> -> vector<256x256xf32>
    %30 = vector.broadcast %8 : vector<1x256xf32> to vector<256x256xf32>
    %31 = arith.addf %29, %30 : vector<256x256xf32>
    %cst_13 = arith.constant 0.000000e+00 : f32
    %32 = vector.broadcast %cst_13 : f32 to vector<256x256xf32>
    %33 = arith.maximumf %31, %32 : vector<256x256xf32>
    %34 = arith.maximumf %21, %33 : vector<256x256xf32>
    %35 = vector.extract_strided_slice %34 {offsets = [0, 0], sizes = [256, 128], strides = [1, 1]} : vector<256x256xf32> to vector<256x128xf32>
    %36 = vector.extract_strided_slice %34 {offsets = [0, 128], sizes = [256, 128], strides = [1, 1]} : vector<256x256xf32> to vector<256x128xf32>
    %37 = arith.maximumf %35, %36 : vector<256x128xf32>
    %c0_14 = arith.constant 0 : index
    %c0_15 = arith.constant 0 : index
    %38 = vector.load %arg6[%c0_14, %c0_15] : memref<128x80xf32, #tpu.memory_space<vmem>>, vector<128x80xf32>
    %cst_16 = arith.constant dense<0.000000e+00> : vector<256x80xf32>
    %39 = tpu.matmul %37, %38, %cst_16 {dimension_numbers = #tpu.dot_dimension_numbers<[1], [0], [0], [1], [0, 0, 1, 1], [], []>} : vector<256x128xf32>, vector<128x80xf32>, vector<256x80xf32> -> vector<256x80xf32>
    %c0_17 = arith.constant 0 : index
    %c0_18 = arith.constant 0 : index
    %40 = vector.load %arg7[%c0_17, %c0_18] : memref<1x80xf32, #tpu.memory_space<vmem>>, vector<1x80xf32>
    %41 = vector.broadcast %40 : vector<1x80xf32> to vector<256x80xf32>
    %42 = arith.addf %39, %41 : vector<256x80xf32>
    %cst_19 = arith.constant 0.000000e+00 : f32
    %43 = vector.broadcast %cst_19 : f32 to vector<256x80xf32>
    %44 = arith.maximumf %42, %43 : vector<256x80xf32>
    %c0_20 = arith.constant 0 : index
    %c0_21 = arith.constant 0 : index
    %45 = vector.load %arg8[%c0_20, %c0_21] : memref<80x3xf32, #tpu.memory_space<vmem>>, vector<80x3xf32>
    %cst_22 = arith.constant dense<0.000000e+00> : vector<256x3xf32>
    %46 = tpu.matmul %44, %45, %cst_22 {dimension_numbers = #tpu.dot_dimension_numbers<[1], [0], [0], [1], [0, 0, 1, 1], [], []>} : vector<256x80xf32>, vector<80x3xf32>, vector<256x3xf32> -> vector<256x3xf32>
    %c0_23 = arith.constant 0 : index
    %c0_24 = arith.constant 0 : index
    %47 = vector.load %arg9[%c0_23, %c0_24] : memref<1x3xf32, #tpu.memory_space<vmem>>, vector<1x3xf32>
    %48 = vector.broadcast %47 : vector<1x3xf32> to vector<256x3xf32>
    %49 = arith.addf %46, %48 : vector<256x3xf32>
    %cst_25 = arith.constant dense<0xFF800000> : vector<256xf32>
    %50 = vector.multi_reduction <maximumf>, %49, %cst_25 [1] : vector<256x3xf32> to vector<256xf32>
    %51 = vector.shape_cast %50 : vector<256xf32> to vector<256x1xf32>
    %52 = vector.broadcast %51 : vector<256x1xf32> to vector<256x3xf32>
    %53 = arith.subf %49, %52 : vector<256x3xf32>
    %54 = math.exp %53 : vector<256x3xf32>
    %cst_26 = arith.constant dense<0.000000e+00> : vector<256xf32>
    %55 = vector.multi_reduction <add>, %54, %cst_26 [1] : vector<256x3xf32> to vector<256xf32>
    %56 = vector.shape_cast %55 : vector<256xf32> to vector<256x1xf32>
    %57 = math.log %56 : vector<256x1xf32>
    %58 = vector.broadcast %57 : vector<256x1xf32> to vector<256x3xf32>
    %59 = arith.subf %53, %58 : vector<256x3xf32>
    %c0_27 = arith.constant 0 : index
    %c0_28 = arith.constant 0 : index
    %60 = vector.load %arg10[%c0_27, %c0_28] : memref<256x3xf32, #tpu.memory_space<vmem>>, vector<256x3xf32>
    tpu.vector_store %arg10[%c0_27, %c0_28], %59 {strides = array<i32>} : memref<256x3xf32, #tpu.memory_space<vmem>>, vector<256x3xf32>,
    return
  }
  func.func @transform_0(%arg0: i32) -> (i32, i32) {
    %c0_i32 = arith.constant 0 : i32
    %c0_i32_0 = arith.constant 0 : i32
    return %arg0, %c0_i32 : i32, i32
  }
  func.func @transform_1(%arg0: i32) -> (i32, i32) {
    %c0_i32 = arith.constant 0 : i32
    %c0_i32_0 = arith.constant 0 : i32
    %c0_i32_1 = arith.constant 0 : i32
    return %c0_i32, %c0_i32_0 : i32, i32
  }
  func.func @transform_2(%arg0: i32) -> (i32, i32) {
    %c0_i32 = arith.constant 0 : i32
    %c0_i32_0 = arith.constant 0 : i32
    %c0_i32_1 = arith.constant 0 : i32
    return %c0_i32, %c0_i32_0 : i32, i32
  }
  func.func @transform_3(%arg0: i32) -> (i32, i32) {
    %c0_i32 = arith.constant 0 : i32
    %c0_i32_0 = arith.constant 0 : i32
    %c0_i32_1 = arith.constant 0 : i32
    return %c0_i32, %c0_i32_0 : i32, i32
  }
  func.func @transform_4(%arg0: i32) -> (i32, i32) {
    %c0_i32 = arith.constant 0 : i32
    %c0_i32_0 = arith.constant 0 : i32
    %c0_i32_1 = arith.constant 0 : i32
    return %c0_i32, %c0_i32_0 : i32, i32
  }
  func.func @transform_5(%arg0: i32) -> (i32, i32) {
    %c0_i32 = arith.constant 0 : i32
    %c0_i32_0 = arith.constant 0 : i32
    %c0_i32_1 = arith.constant 0 : i32
    return %c0_i32, %c0_i32_0 : i32, i32
  }
  func.func @transform_6(%arg0: i32) -> (i32, i32) {
    %c0_i32 = arith.constant 0 : i32
    %c0_i32_0 = arith.constant 0 : i32
    %c0_i32_1 = arith.constant 0 : i32
    return %c0_i32, %c0_i32_0 : i32, i32
  }
  func.func @transform_7(%arg0: i32) -> (i32, i32) {
    %c0_i32 = arith.constant 0 : i32
    %c0_i32_0 = arith.constant 0 : i32
    %c0_i32_1 = arith.constant 0 : i32
    return %c0_i32, %c0_i32_0 : i32, i32
  }
  func.func @transform_8(%arg0: i32) -> (i32, i32) {
    %c0_i32 = arith.constant 0 : i32
    %c0_i32_0 = arith.constant 0 : i32
    %c0_i32_1 = arith.constant 0 : i32
    return %c0_i32, %c0_i32_0 : i32, i32
  }
  func.func @transform_9(%arg0: i32) -> (i32, i32) {
    %c0_i32 = arith.constant 0 : i32
    %c0_i32_0 = arith.constant 0 : i32
    return %arg0, %c0_i32 : i32, i32
  }
}

</mosaic_0001>

<bundles_post_ra>
// kernel: net_forward.1
= control target key start
LH: loop header
LB: loop body
LE: loop exit
PB: predicated region body
PF: predicated region fallthrough
CT: control target
= control target key end

     0   :  { %s3995_s30 = smov 0   ;;  %s6518_s0 = inlined_call_operand.vmem [shape: f32[512,40], index: 0, kind: input, shape index: {}]   ;;  %s6519_s1 = inlined_call_operand.vmem [shape: f32[40,1024], index: 1, kind: input, shape index: {}]   ;;  %s6520_s2 = inlined_call_operand.vmem [shape: f32[1,1024], index: 2, kind: input, shape index: {}]   ;;  %s6521_s3 = inlined_call_operand.vmem [shape: f32[128,256], index: 3, kind: input, shape index: {}]   ;;  %s6522_s4 = inlined_call_operand.vmem [shape: f32[1,256], index: 4, kind: input, shape index: {}]   ;;  %s6523_s5 = inlined_call_operand.vmem [shape: f32[128,80], index: 5, kind: input, shape index: {}]   ;;  %s6524_s6 = inlined_call_operand.vmem [shape: f32[1,80], index: 6, kind: input, shape index: {}]   ;;  %s6525_s7 = inlined_call_operand.vmem [shape: f32[80,3], index: 7, kind: input, shape index: {}]   ;;  %s6526_s8 = inlined_call_operand.vmem [shape: f32[1,3], index: 8, kind: input, shape index: {}]   ;;  %s6527_s9 = inlined_call_operand.vmem [shape: f32[512,3], index: 9, kind: output, shape index: {}]  }
   0x1 LB: > { %s3451_s10 = sadd.s32 4294967295, %s3943_s30   ;;  %p3455_p0 = scmp.ge.s32.totalorder %s3943_s30, 1  ;;  %s3943_s30 = sphi %s3995_s30, %s19_s30  }
   0x2   : > { %p288_p1 = scmp.lt.s32.totalorder %s3943_s30, 3 }
   0x4   : > { %p289_p2 = pnand %p3455_p0, %p288_p1 }
   0x6   : > { %292 = sbr.rel (%p289_p2) target bundleno = 1566 (0x61e), region = 56 }
   0xb   : > { %v400_v0 = vld [vmem:[%s6519_s1 + $0x100] sm:$0xff]  ;;  %v401_v1 = vld [vmem:[%s6519_s1 + $0x108] sm:$0xff]  ;;  %s3456_s17 = sshll.u32 %s3451_s10, 5  ;;  %vm426_vm0 = vcmask 326656   ;;  %v402_v12 = vld [vmem:[%s6519_s1 + $0x110] sm:$0xff]  ;;  %vm2768_vm1 = vcmask 654336  }
   0xc   : > { %v392_v2 = vld [vmem:[%s6519_s1 + $0xc0] sm:$0xff]  ;;  %534 = vmatpush.msra.mxu0 %v400_v0  ;;  %3750 = vmatpush.msra.mxu2 %v400_v0  ;;  %v393_v3 = vld [vmem:[%s6519_s1 + $0xc8] sm:$0xff]  ;;  %p325_p3 = scmp.lt.s32.totalorder %s3456_s17, 63  ;;  %v403_v13 = vld [vmem:[%s6519_s1 + $0x118] sm:$0xff]  ;;  %vm2978_vm2 = vcmask 23552  }
   0xd   : > { %647 = vmatpush.msra.mxu1 %v401_v1  ;;  %3755 = vmatpush.msra.mxu3 %v401_v1  ;;  %v384_v4 = vld [vmem:[%s6519_s1 + $0x80] sm:$0xff]  ;;  %v385_v5 = vld [vmem:[%s6519_s1 + $0x88] sm:$0xff]  ;;  %v394_v14 = vld [vmem:[%s6519_s1 + $0xd0] sm:$0xff] }
   0xe   : > { %535 = vmatpush.msra.mxu0 %v392_v2  ;;  %3751 = vmatpush.msra.mxu2 %v392_v2  ;;  %s6613_s17 = smov (!%p325_p3, %s3456_s17), 63  ;;  %v376_v6 = vld [vmem:[%s6519_s1 + $0x40] sm:$0xff]  ;;  %v377_v7 = vld [vmem:[%s6519_s1 + $0x48] sm:$0xff]  ;;  %v395_v15 = vld [vmem:[%s6519_s1 + $0xd8] sm:$0xff] }
   0xf   : > { %648 = vmatpush.msra.mxu1 %v393_v3  ;;  %3756 = vmatpush.msra.mxu3 %v393_v3  ;;  %s3457_s28 = sshll.u32 %s6613_s17, 3  ;;  %v368_v8 = vld [vmem:[%s6519_s1] sm:$0xff]  ;;  %v369_v9 = vld [vmem:[%s6519_s1 + $0x8] sm:$0xff]  ;;  %v386_v20 = vld [vmem:[%s6519_s1 + $0x90] sm:$0xff] }
  0x10   : > { %536 = vmatpush.msra.mxu0 %v384_v4  ;;  %3752 = vmatpush.msra.mxu2 %v384_v4  ;;  %s4038_s13 = scalar_lea.vmem %s6518_s0, %s3457_s28  ;;  %v387_v21 = vld [vmem:[%s6519_s1 + $0x98] sm:$0xff]  ;;  %v378_v28 = vld [vmem:[%s6519_s1 + $0x50] sm:$0xff]  ;;  %v404_v42 = vld [vmem:[%s6519_s1 + $0x120] sm:$0xff]  ;;  %s6339_s14 = scalar_lea.vmem %s6527_s9, %s3457_s28 }
  0x11   : > { %649 = vmatpush.msra.mxu1 %v385_v5  ;;  %3757 = vmatpush.msra.mxu3 %v385_v5  ;;  %v4044_v10 = vld [vmem:[%s4038_s13] sm:$0xff]  ;;  %v4070_v16 = vld [vmem:[%s4038_s13 + $0x8] sm:$0xff]  ;;  %v4084_v18 = vld [vmem:[%s4038_s13 + $0x10] sm:$0xff] }
  0x12   : > { %537 = vmatpush.msra.mxu0 %v376_v6  ;;  %3753 = vmatpush.msra.mxu2 %v376_v6  ;;  %v4047_v11 = vld [vmem:[%s4038_s13 + $0x80] sm:$0xff]  ;;  %v4073_v17 = vld [vmem:[%s4038_s13 + $0x88] sm:$0xff]  ;;  %v4087_v19 = vld [vmem:[%s4038_s13 + $0x90] sm:$0xff] }
  0x13   : > { %650 = vmatpush.msra.mxu1 %v377_v7  ;;  %3758 = vmatpush.msra.mxu3 %v377_v7  ;;  %v4104_v22 = vld [vmem:[%s4038_s13 + $0x18] sm:$0xff]  ;;  %v4118_v24 = vld [vmem:[%s4038_s13 + $0x20] sm:$0xff]  ;;  %v4132_v26 = vld [vmem:[%s4038_s13 + $0x28] sm:$0xff] }
  0x14   : > { %538 = vmatpush.msra.mxu0 %v368_v8  ;;  %3754 = vmatpush.msra.mxu2 %v368_v8  ;;  %v4107_v23 = vld [vmem:[%s4038_s13 + $0x98] sm:$0xff]  ;;  %v4121_v25 = vld [vmem:[%s4038_s13 + $0xa0] sm:$0xff]  ;;  %v4135_v27 = vld [vmem:[%s4038_s13 + $0xa8] sm:$0xff] }
  0x15   : > { %651 = vmatpush.msra.mxu1 %v369_v9  ;;  %3759 = vmatpush.msra.mxu3 %v369_v9  ;;  %v379_v29 = vld [vmem:[%s6519_s1 + $0x58] sm:$0xff]  ;;  %v4152_v30 = vld [vmem:[%s4038_s13 + $0x30] sm:$0xff]  ;;  %v4180_v34 = vld [vmem:[%s4038_s13 + $0x40] sm:$0xff] }
  0x16   : > { %3460 = vmatmul.msk.f32.vlgmr.msra.gmra.mxu0 %vm426_vm0, %v4044_v10  ;;  %3476 = vmatmul.msk.f32.vlgmr.msra.gmra.mxu2 %vm426_vm0, %v4047_v11  ;;  %v4155_v31 = vld [vmem:[%s4038_s13 + $0xb0] sm:$0xff]  ;;  %v4166_v32 = vld [vmem:[%s4038_s13 + $0x38] sm:$0xff]  ;;  %v4183_v35 = vld [vmem:[%s4038_s13 + $0xc0] sm:$0xff] }
  0x17   : > { %3492 = vmatmul.msk.f32.vlgmr.msra.gmra.mxu1 %vm426_vm0, %v4044_v10  ;;  %3508 = vmatmul.msk.f32.vlgmr.msra.gmra.mxu3 %vm426_vm0, %v4047_v11  ;;  %v4169_v33 = vld [vmem:[%s4038_s13 + $0xb8] sm:$0xff]  ;;  %v370_v36 = vld [vmem:[%s6519_s1 + $0x10] sm:$0xff]  ;;  %v4200_v38 = vld [vmem:[%s4038_s13 + $0x48] sm:$0xff] }
  0x18   : > { %760 = vmatpush.msrb.mxu2 %v402_v12  ;;  %873 = vmatpush.msrb.mxu3 %v403_v13  ;;  %v371_v37 = vld [vmem:[%s6519_s1 + $0x18] sm:$0xff]  ;;  %v4203_v39 = vld [vmem:[%s4038_s13 + $0xc8] sm:$0xff]  ;;  %v4214_v40 = vld [vmem:[%s4038_s13 + $0x50] sm:$0xff] }
  0x19   : > { %v362_v41 = vld [vmem:[%s4038_s13 + $0xd0] sm:$0xff]  ;;  %v405_v43 = vld [vmem:[%s6519_s1 + $0x128] sm:$0xff]  ;;  %986 = vmatpush.msrb.mxu0 %v404_v42  ;;  %v4230_v44 = vld [vmem:[%s4038_s13 + $0x58] sm:$0xff] }
  0x1a   : > { %761 = vmatpush.msrb.mxu2 %v394_v14  ;;  %874 = vmatpush.msrb.mxu3 %v395_v15  ;;  %v363_v45 = vld [vmem:[%s4038_s13 + $0xd8] sm:$0xff]  ;;  %v396_v46 = vld [vmem:[%s6519_s1 + $0xe0] sm:$0xff]  ;;  %v397_v47 = vld [vmem:[%s6519_s1 + $0xe8] sm:$0xff] }
  0x1b   : > { %1099 = vmatpush.msrb.mxu1 %v405_v43  ;;  %v388_v48 = vld [vmem:[%s6519_s1 + $0xa0] sm:$0xff]  ;;  %987 = vmatpush.msrb.mxu0 %v396_v46  ;;  %v389_v49 = vld [vmem:[%s6519_s1 + $0xa8] sm:$0xff]  ;;  %v406_v56 = vld [vmem:[%s6519_s1 + $0x130] sm:$0xff] }
  0x1c   : > { %762 = vmatpush.msrb.mxu2 %v386_v20  ;;  %875 = vmatpush.msrb.mxu3 %v387_v21  ;;  %v4252_v50 = vld [vmem:[%s4038_s13 + $0x60] sm:$0xff]  ;;  %v381_v53 = vld [vmem:[%s6519_s1 + $0x68] sm:$0xff]  ;;  %v407_v57 = vld [vmem:[%s6519_s1 + $0x138] sm:$0xff] }
  0x1d   : > { %1100 = vmatpush.msrb.mxu1 %v397_v47  ;;  %988 = vmatpush.msrb.mxu0 %v388_v48  ;;  %v364_v51 = vld [vmem:[%s4038_s13 + $0xe0] sm:$0xff]  ;;  %v373_v55 = vld [vmem:[%s6519_s1 + $0x28] sm:$0xff]  ;;  %v4290_v60 = vld [vmem:[%s4038_s13 + $0x70] sm:$0xff] }
  0x1e   : > { %3461 = vmatmul.msk.f32.gmra.mxu0 %vm426_vm0, %v4070_v16  ;;  %3477 = vmatmul.msk.f32.gmra.mxu2 %vm426_vm0, %v4073_v17  ;;  %v380_v52 = vld [vmem:[%s6519_s1 + $0x60] sm:$0xff]  ;;  %v4280_v58 = vld [vmem:[%s4038_s13 + $0x68] sm:$0xff]  ;;  %v366_v61 = vld [vmem:[%s4038_s13 + $0xf0] sm:$0xff] }
  0x1f   : > { %3493 = vmatmul.msk.f32.gmra.mxu1 %vm426_vm0, %v4070_v16  ;;  %3509 = vmatmul.msk.f32.gmra.mxu3 %vm426_vm0, %v4073_v17  ;;  %v372_v54 = vld [vmem:[%s6519_s1 + $0x20] sm:$0xff]  ;;  %v365_v59 = vld [vmem:[%s4038_s13 + $0xe8] sm:$0xff]  ;;  %v4300_v62 = vld [vmem:[%s4038_s13 + $0x78] sm:$0xff] }
  0x20   : > { %763 = vmatpush.msrb.mxu2 %v378_v28  ;;  %876 = vmatpush.msrb.mxu3 %v379_v29  ;;  %v367_v63 = vld [vmem:[%s4038_s13 + $0xf8] sm:$0xff]  ;;  %v4312_v0 = vld [vmem:[%s6520_s2] sm:$0xff] }
  0x21   : > { %1101 = vmatpush.msrb.mxu1 %v389_v49  ;;  %989 = vmatpush.msrb.mxu0 %v380_v52  ;;  %v4319_v3 = vperm.slane %v4312_v0, 0  ;;  %v4326_v4 = vperm.slane %v4312_v0, 1 }
  0x22   : > { %764 = vmatpush.msrb.mxu2 %v370_v36  ;;  %877 = vmatpush.msrb.mxu3 %v371_v37 }
  0x23   : > { %1102 = vmatpush.msrb.mxu1 %v381_v53  ;;  %990 = vmatpush.msrb.mxu0 %v372_v54  ;;  %v399_v53 = vld [vmem:[%s6519_s1 + $0xf8] sm:$0xff] }
  0x24   : > { %1212 = vmatpush.msra.mxu2 %v406_v56  ;;  %1325 = vmatpush.msra.mxu3 %v407_v57 }
  0x25   : > { %1103 = vmatpush.msrb.mxu1 %v373_v55 }
  0x26   : > { %3462 = vmatmul.msk.f32.gmra.mxu0 %vm426_vm0, %v4084_v18  ;;  %3478 = vmatmul.msk.f32.gmra.mxu2 %vm426_vm0, %v4087_v19 }
  0x27   : > { %3494 = vmatmul.msk.f32.gmra.mxu1 %vm426_vm0, %v4084_v18  ;;  %3510 = vmatmul.msk.f32.gmra.mxu3 %vm426_vm0, %v4087_v19 }
  0x28   : > { %1326 = vmatpush.msra.mxu3 %v399_v53 }
  0x2e   : > { %3463 = vmatmul.msk.f32.gmra.mxu0 %vm426_vm0, %v4104_v22  ;;  %3479 = vmatmul.msk.f32.gmra.mxu2 %vm426_vm0, %v4107_v23 }
  0x2f   : > { %3495 = vmatmul.msk.f32.gmra.mxu1 %vm426_vm0, %v4104_v22  ;;  %3511 = vmatmul.msk.f32.gmra.mxu3 %vm426_vm0, %v4107_v23 }
  0x36   : > { %3464 = vmatmul.msk.f32.gmra.mxu0 %vm426_vm0, %v4118_v24  ;;  %3480 = vmatmul.msk.f32.gmra.mxu2 %vm426_vm0, %v4121_v25 }
  0x37   : > { %3496 = vmatmul.msk.f32.gmra.mxu1 %vm426_vm0, %v4118_v24  ;;  %3512 = vmatmul.msk.f32.gmra.mxu3 %vm426_vm0, %v4121_v25 }
  0x3e   : > { %3465 = vmatmul.msk.f32.gmra.mxu0 %vm426_vm0, %v4132_v26  ;;  %3481 = vmatmul.msk.f32.gmra.mxu2 %vm426_vm0, %v4135_v27 }
  0x3f   : > { %3497 = vmatmul.msk.f32.gmra.mxu1 %vm426_vm0, %v4132_v26  ;;  %3513 = vmatmul.msk.f32.gmra.mxu3 %vm426_vm0, %v4135_v27 }
  0x46   : > { %3466 = vmatmul.msk.f32.gmra.mxu0 %vm426_vm0, %v4152_v30  ;;  %3482 = vmatmul.msk.f32.gmra.mxu2 %vm426_vm0, %v4155_v31 }
  0x47   : > { %3498 = vmatmul.msk.f32.gmra.mxu1 %vm426_vm0, %v4152_v30  ;;  %3514 = vmatmul.msk.f32.gmra.mxu3 %vm426_vm0, %v4155_v31 }
  0x4e   : > { %3467 = vmatmul.msk.f32.gmra.mxu0 %vm426_vm0, %v4166_v32  ;;  %3483 = vmatmul.msk.f32.gmra.mxu2 %vm426_vm0, %v4169_v33 }
  0x4f   : > { %3499 = vmatmul.msk.f32.gmra.mxu1 %vm426_vm0, %v4166_v32  ;;  %3515 = vmatmul.msk.f32.gmra.mxu3 %vm426_vm0, %v4169_v33 }
  0x56   : > { %3468 = vmatmul.msk.f32.gmra.mxu0 %vm426_vm0, %v4180_v34  ;;  %3484 = vmatmul.msk.f32.gmra.mxu2 %vm426_vm0, %v4183_v35 }
  0x57   : > { %3500 = vmatmul.msk.f32.gmra.mxu1 %vm426_vm0, %v4180_v34  ;;  %3516 = vmatmul.msk.f32.gmra.mxu3 %vm426_vm0, %v4183_v35 }
  0x5e   : > { %3469 = vmatmul.msk.f32.gmra.mxu0 %vm426_vm0, %v4200_v38  ;;  %3485 = vmatmul.msk.f32.gmra.mxu2 %vm426_vm0, %v4203_v39 }
  0x5f   : > { %3501 = vmatmul.msk.f32.gmra.mxu1 %vm426_vm0, %v4200_v38  ;;  %3517 = vmatmul.msk.f32.gmra.mxu3 %vm426_vm0, %v4203_v39 }
  0x66   : > { %3470 = vmatmul.msk.f32.gmra.mxu0 %vm426_vm0, %v4214_v40  ;;  %3486 = vmatmul.msk.f32.gmra.mxu2 %vm426_vm0, %v362_v41 }
  0x67   : > { %3502 = vmatmul.msk.f32.gmra.mxu1 %vm426_vm0, %v4214_v40  ;;  %3518 = vmatmul.msk.f32.gmra.mxu3 %vm426_vm0, %v362_v41 }
  0x6e   : > { %3471 = vmatmul.msk.f32.gmra.mxu0 %vm426_vm0, %v4230_v44  ;;  %3487 = vmatmul.msk.f32.gmra.mxu2 %vm426_vm0, %v363_v45 }
  0x6f   : > { %3503 = vmatmul.msk.f32.gmra.mxu1 %vm426_vm0, %v4230_v44  ;;  %3519 = vmatmul.msk.f32.gmra.mxu3 %vm426_vm0, %v363_v45 }
  0x76   : > { %3472 = vmatmul.msk.f32.gmra.mxu0 %vm426_vm0, %v4252_v50  ;;  %3488 = vmatmul.msk.f32.gmra.mxu2 %vm426_vm0, %v364_v51 }
  0x77   : > { %3504 = vmatmul.msk.f32.gmra.mxu1 %vm426_vm0, %v4252_v50  ;;  %3520 = vmatmul.msk.f32.gmra.mxu3 %vm426_vm0, %v364_v51 }
  0x7e   : > { %3473 = vmatmul.msk.f32.gmra.mxu0 %vm426_vm0, %v4280_v58  ;;  %3489 = vmatmul.msk.f32.gmra.mxu2 %vm426_vm0, %v365_v59 }
  0x7f   : > { %3505 = vmatmul.msk.f32.gmra.mxu1 %vm426_vm0, %v4280_v58  ;;  %3521 = vmatmul.msk.f32.gmra.mxu3 %vm426_vm0, %v365_v59 }
  0x86   : > { %3474 = vmatmul.msk.f32.gmra.mxu0 %vm426_vm0, %v4290_v60  ;;  %3490 = vmatmul.msk.f32.gmra.mxu2 %vm426_vm0, %v366_v61 }
  0x87   : > { %3506 = vmatmul.msk.f32.gmra.mxu1 %vm426_vm0, %v4290_v60  ;;  %3522 = vmatmul.msk.f32.gmra.mxu3 %vm426_vm0, %v366_v61 }
  0x8e   : > { %3475 = vmatmul.msk.f32.gmra.mxu0 %vm426_vm0, %v4300_v62  ;;  %3491 = vmatmul.msk.f32.gmra.mxu2 %vm426_vm0, %v367_v63 }
  0x8f   : > { %3507 = vmatmul.msk.f32.gmra.mxu1 %vm426_vm0, %v4300_v62  ;;  %3523 = vmatmul.msk.f32.gmra.mxu3 %vm426_vm0, %v367_v63 }
  0x93   : > { %v4314_v1 = vpop.f32.mrf.mxu0 }
  0x94   : > { %v4316_v2 = vpop.f32.mrf.mxu1 }
  0x96   : > { %3524 = vmatmul.msk.f32.vlgmr.msrb.gmra.mxu2 %vm426_vm0, %v4044_v10  ;;  %3588 = vmatmul.msk.f32.vlgmr.msrb.gmra.mxu0 %vm426_vm0, %v4044_v10 }
  0x97   : > { %3556 = vmatmul.msk.f32.vlgmr.msrb.gmra.mxu3 %vm426_vm0, %v4044_v10  ;;  %3620 = vmatmul.msk.f32.vlgmr.msrb.gmra.mxu1 %vm426_vm0, %v4044_v10 }
  0x99   : > { %v588_v5 = vpop.f32.mrf.mxu2 }
  0x9a   : > { %v589_v6 = vadd.f32 %v588_v5, %v4319_v3  ;;  %v701_v7 = vpop.f32.mrf.mxu3 }
  0x9b   : > { %v702_v8 = vadd.f32 %v701_v7, %v4326_v4  ;;  %v4334_v9 = vpop.f32.mrf.mxu0 }
  0x9c   : > { %v1555_v12 = vmax.f32 %v589_v6, 0.0  ;;  %v4336_v13 = vpop.f32.mrf.mxu1 }
  0x9d   : > { %v1556_v14 = vmax.f32 %v702_v8, 0.0 }
  0x9e   : > { %3525 = vmatmul.msk.f32.gmra.mxu2 %vm426_vm0, %v4070_v16  ;;  %3589 = vmatmul.msk.f32.gmra.mxu0 %vm426_vm0, %v4070_v16 }
  0x9f   : > { %v4342_v15 = vmax.f32 %v1555_v12, %v1556_v14  ;;  %3557 = vmatmul.msk.f32.gmra.mxu3 %vm426_vm0, %v4070_v16  ;;  %3621 = vmatmul.msk.f32.gmra.mxu1 %vm426_vm0, %v4070_v16 }
  0xa1   : > { %v591_v10 = vpop.f32.mrf.mxu2 }
  0xa2   : > { %v592_v20 = vadd.f32 %v591_v10, %v4319_v3  ;;  %v704_v21 = vpop.f32.mrf.mxu3 }
  0xa3   : > { %v705_v28 = vadd.f32 %v704_v21, %v4326_v4  ;;  %v4350_v29 = vpop.f32.mrf.mxu0 }
  0xa4   : > { %v1563_v36 = vmax.f32 %v592_v20, 0.0  ;;  %v4352_v37 = vpop.f32.mrf.mxu1 }
  0xa5   : > { %v1564_v41 = vmax.f32 %v705_v28, 0.0 }
  0xa6   : > { %3526 = vmatmul.msk.f32.gmra.mxu2 %vm426_vm0, %v4084_v18  ;;  %3590 = vmatmul.msk.f32.gmra.mxu0 %vm426_vm0, %v4084_v18 }
  0xa7   : > { %v4358_v42 = vmax.f32 %v1563_v36, %v1564_v41  ;;  %3558 = vmatmul.msk.f32.gmra.mxu3 %vm426_vm0, %v4084_v18  ;;  %3622 = vmatmul.msk.f32.gmra.mxu1 %vm426_vm0, %v4084_v18  ;;  %v398_v18 = vld [vmem:[%s6519_s1 + $0xf0] sm:$0xff] }
  0xa8   : > { %1213 = vmatpush.msra.mxu2 %v398_v18 }
  0xa9   : > { %v594_v16 = vpop.f32.mrf.mxu2 }
  0xaa   : > { %v595_v43 = vadd.f32 %v594_v16, %v4319_v3  ;;  %v707_v45 = vpop.f32.mrf.mxu3 }
  0xab   : > { %v708_v46 = vadd.f32 %v707_v45, %v4326_v4  ;;  %v4366_v47 = vpop.f32.mrf.mxu0 }
  0xac   : > { %v1571_v48 = vmax.f32 %v595_v43, 0.0  ;;  %v4368_v49 = vpop.f32.mrf.mxu1 }
  0xad   : > { %v1572_v51 = vmax.f32 %v708_v46, 0.0 }
  0xae   : > { %3527 = vmatmul.msk.f32.gmra.mxu2 %vm426_vm0, %v4104_v22  ;;  %3591 = vmatmul.msk.f32.gmra.mxu0 %vm426_vm0, %v4104_v22 }
  0xaf   : > { %v4374_v52 = vmax.f32 %v1571_v48, %v1572_v51  ;;  %3559 = vmatmul.msk.f32.gmra.mxu3 %vm426_vm0, %v4104_v22  ;;  %3623 = vmatmul.msk.f32.gmra.mxu1 %vm426_vm0, %v4104_v22 }
  0xb1   : > { %v597_v54 = vpop.f32.mrf.mxu2 }
  0xb2   : > { %v598_v55 = vadd.f32 %v597_v54, %v4319_v3  ;;  %v710_v56 = vpop.f32.mrf.mxu3 }
  0xb3   : > { %v711_v57 = vadd.f32 %v710_v56, %v4326_v4  ;;  %v4388_v59 = vpop.f32.mrf.mxu0 }
  0xb4   : > { %v1579_v61 = vmax.f32 %v598_v55, 0.0  ;;  %v4390_v22 = vpop.f32.mrf.mxu1 }
  0xb5   : > { %v1580_v63 = vmax.f32 %v711_v57, 0.0 }
  0xb6   : > { %3528 = vmatmul.msk.f32.gmra.mxu2 %vm426_vm0, %v4118_v24  ;;  %3592 = vmatmul.msk.f32.gmra.mxu0 %vm426_vm0, %v4118_v24 }
  0xb7   : > { %v4396_v5 = vmax.f32 %v1579_v61, %v1580_v63  ;;  %3560 = vmatmul.msk.f32.gmra.mxu3 %vm426_vm0, %v4118_v24  ;;  %3624 = vmatmul.msk.f32.gmra.mxu1 %vm426_vm0, %v4118_v24 }
  0xb9   : > { %v600_v6 = vpop.f32.mrf.mxu2 }
  0xba   : > { %v601_v7 = vadd.f32 %v600_v6, %v4319_v3  ;;  %v713_v8 = vpop.f32.mrf.mxu3 }
  0xbb   : > { %v714_v12 = vadd.f32 %v713_v8, %v4326_v4  ;;  %v4404_v14 = vpop.f32.mrf.mxu0 }
  0xbc   : > { %v1587_v10 = vmax.f32 %v601_v7, 0.0  ;;  %v4406_v20 = vpop.f32.mrf.mxu1 }
  0xbd   : > { %v1588_v21 = vmax.f32 %v714_v12, 0.0 }
  0xbe   : > { %3529 = vmatmul.msk.f32.gmra.mxu2 %vm426_vm0, %v4132_v26  ;;  %3593 = vmatmul.msk.f32.gmra.mxu0 %vm426_vm0, %v4132_v26 }
  0xbf   : > { %v4412_v28 = vmax.f32 %v1587_v10, %v1588_v21  ;;  %3561 = vmatmul.msk.f32.gmra.mxu3 %vm426_vm0, %v4132_v26  ;;  %3625 = vmatmul.msk.f32.gmra.mxu1 %vm426_vm0, %v4132_v26 }
  0xc1   : > { %6528 = vst [vmem:[#allocation2_spill] sm:$0xff] %v4412_v28  ;;  %v603_v24 = vpop.f32.mrf.mxu2 }
  0xc2   : > { %v604_v36 = vadd.f32 %v603_v24, %v4319_v3  ;;  %v716_v41 = vpop.f32.mrf.mxu3 }
  0xc3   : > { %v717_v16 = vadd.f32 %v716_v41, %v4326_v4  ;;  %v4420_v43 = vpop.f32.mrf.mxu0 }
  0xc4   : > { %v1595_v45 = vmax.f32 %v604_v36, 0.0  ;;  %v4422_v46 = vpop.f32.mrf.mxu1 }
  0xc5   : > { %v1596_v48 = vmax.f32 %v717_v16, 0.0 }
  0xc6   : > { %3530 = vmatmul.msk.f32.gmra.mxu2 %vm426_vm0, %v4152_v30  ;;  %3594 = vmatmul.msk.f32.gmra.mxu0 %vm426_vm0, %v4152_v30 }
  0xc7   : > { %v4428_v51 = vmax.f32 %v1595_v45, %v1596_v48  ;;  %3562 = vmatmul.msk.f32.gmra.mxu3 %vm426_vm0, %v4152_v30  ;;  %3626 = vmatmul.msk.f32.gmra.mxu1 %vm426_vm0, %v4152_v30 }
  0xc9   : > { %6529 = vst [vmem:[#allocation3_spill] sm:$0xff] %v4428_v51  ;;  %v606_v26 = vpop.f32.mrf.mxu2 }
  0xca   : > { %v607_v18 = vadd.f32 %v606_v26, %v4319_v3  ;;  %v719_v53 = vpop.f32.mrf.mxu3 }
  0xcb   : > { %v720_v54 = vadd.f32 %v719_v53, %v4326_v4  ;;  %v4436_v55 = vpop.f32.mrf.mxu0 }
  0xcc   : > { %v1603_v56 = vmax.f32 %v607_v18, 0.0  ;;  %v4438_v57 = vpop.f32.mrf.mxu1 }
  0xcd   : > { %v1604_v61 = vmax.f32 %v720_v54, 0.0 }
  0xce   : > { %3531 = vmatmul.msk.f32.gmra.mxu2 %vm426_vm0, %v4166_v32  ;;  %3595 = vmatmul.msk.f32.gmra.mxu0 %vm426_vm0, %v4166_v32 }
  0xcf   : > { %v4444_v63 = vmax.f32 %v1603_v56, %v1604_v61  ;;  %3563 = vmatmul.msk.f32.gmra.mxu3 %vm426_vm0, %v4166_v32  ;;  %3627 = vmatmul.msk.f32.gmra.mxu1 %vm426_vm0, %v4166_v32  ;;  %v390_v56 = vld [vmem:[%s6519_s1 + $0xb0] sm:$0xff]  ;;  %v391_v61 = vld [vmem:[%s6519_s1 + $0xb8] sm:$0xff] }
  0xd0   : > { %1214 = vmatpush.msra.mxu2 %v390_v56  ;;  %1327 = vmatpush.msra.mxu3 %v391_v61 }
  0xd1   : > { %6530 = vst [vmem:[#allocation4_spill] sm:$0xff] %v4444_v63  ;;  %v609_v30 = vpop.f32.mrf.mxu2 }
  0xd2   : > { %v610_v6 = vadd.f32 %v609_v30, %v4319_v3  ;;  %v722_v7 = vpop.f32.mrf.mxu3 }
  0xd3   : > { %v723_v8 = vadd.f32 %v722_v7, %v4326_v4  ;;  %v4452_v12 = vpop.f32.mrf.mxu0 }
  0xd4   : > { %v1611_v10 = vmax.f32 %v610_v6, 0.0  ;;  %v4454_v21 = vpop.f32.mrf.mxu1 }
  0xd5   : > { %v1612_v24 = vmax.f32 %v723_v8, 0.0 }
  0xd6   : > { %3532 = vmatmul.msk.f32.gmra.mxu2 %vm426_vm0, %v4180_v34  ;;  %3596 = vmatmul.msk.f32.gmra.mxu0 %vm426_vm0, %v4180_v34 }
  0xd7   : > { %v4460_v36 = vmax.f32 %v1611_v10, %v1612_v24  ;;  %3564 = vmatmul.msk.f32.gmra.mxu3 %vm426_vm0, %v4180_v34  ;;  %3628 = vmatmul.msk.f32.gmra.mxu1 %vm426_vm0, %v4180_v34 }
  0xd9   : > { %6531 = vst [vmem:[#allocation5_spill] sm:$0xff] %v4460_v36  ;;  %v612_v32 = vpop.f32.mrf.mxu2 }
  0xda   : > { %v613_v41 = vadd.f32 %v612_v32, %v4319_v3  ;;  %v725_v16 = vpop.f32.mrf.mxu3 }
  0xdb   : > { %v726_v45 = vadd.f32 %v725_v16, %v4326_v4  ;;  %v4468_v48 = vpop.f32.mrf.mxu0 }
  0xdc   : > { %v1619_v26 = vmax.f32 %v613_v41, 0.0  ;;  %v4470_v18 = vpop.f32.mrf.mxu1 }
  0xdd   : > { %v1620_v53 = vmax.f32 %v726_v45, 0.0 }
  0xde   : > { %3533 = vmatmul.msk.f32.gmra.mxu2 %vm426_vm0, %v4200_v38  ;;  %3597 = vmatmul.msk.f32.gmra.mxu0 %vm426_vm0, %v4200_v38 }
  0xdf   : > { %v4476_v54 = vmax.f32 %v1619_v26, %v1620_v53  ;;  %3565 = vmatmul.msk.f32.gmra.mxu3 %vm426_vm0, %v4200_v38  ;;  %3629 = vmatmul.msk.f32.gmra.mxu1 %vm426_vm0, %v4200_v38 }
  0xe1   : > { %6532 = vst [vmem:[#allocation6_spill] sm:$0xff] %v4476_v54  ;;  %v615_v34 = vpop.f32.mrf.mxu2 }
  0xe2   : > { %v616_v30 = vadd.f32 %v615_v34, %v4319_v3  ;;  %v728_v6 = vpop.f32.mrf.mxu3 }
  0xe3   : > { %v729_v7 = vadd.f32 %v728_v6, %v4326_v4  ;;  %v4490_v8 = vpop.f32.mrf.mxu0 }
  0xe4   : > { %v1627_v10 = vmax.f32 %v616_v30, 0.0  ;;  %v4492_v38 = vpop.f32.mrf.mxu1 }
  0xe5   : > { %v1628_v24 = vmax.f32 %v729_v7, 0.0 }
  0xe6   : > { %3534 = vmatmul.msk.f32.gmra.mxu2 %vm426_vm0, %v4214_v40  ;;  %3598 = vmatmul.msk.f32.gmra.mxu0 %vm426_vm0, %v4214_v40 }
  0xe7   : > { %v4498_v32 = vmax.f32 %v1627_v10, %v1628_v24  ;;  %3566 = vmatmul.msk.f32.gmra.mxu3 %vm426_vm0, %v4214_v40  ;;  %3630 = vmatmul.msk.f32.gmra.mxu1 %vm426_vm0, %v4214_v40 }
  0xe9   : > { %6533 = vst [vmem:[#allocation7_spill] sm:$0xff] %v4498_v32  ;;  %v618_v41 = vpop.f32.mrf.mxu2 }
  0xea   : > { %v619_v16 = vadd.f32 %v618_v41, %v4319_v3  ;;  %v731_v45 = vpop.f32.mrf.mxu3 }
  0xeb   : > { %v732_v26 = vadd.f32 %v731_v45, %v4326_v4  ;;  %v4506_v53 = vpop.f32.mrf.mxu0 }
  0xec   : > { %v1635_v34 = vmax.f32 %v619_v16, 0.0  ;;  %v4508_v56 = vpop.f32.mrf.mxu1 }
  0xed   : > { %v1636_v61 = vmax.f32 %v732_v26, 0.0 }
  0xee   : > { %3535 = vmatmul.msk.f32.gmra.mxu2 %vm426_vm0, %v4230_v44  ;;  %3599 = vmatmul.msk.f32.gmra.mxu0 %vm426_vm0, %v4230_v44 }
  0xef   : > { %v4514_v30 = vmax.f32 %v1635_v34, %v1636_v61  ;;  %3567 = vmatmul.msk.f32.gmra.mxu3 %vm426_vm0, %v4230_v44  ;;  %3631 = vmatmul.msk.f32.gmra.mxu1 %vm426_vm0, %v4230_v44 }
  0xf1   : > { %6534 = vst [vmem:[#allocation8_spill] sm:$0xff] %v4514_v30  ;;  %v621_v40 = vpop.f32.mrf.mxu2 }
  0xf2   : > { %v622_v6 = vadd.f32 %v621_v40, %v4319_v3  ;;  %v734_v7 = vpop.f32.mrf.mxu3 }
  0xf3   : > { %v735_v10 = vadd.f32 %v734_v7, %v4326_v4  ;;  %v4522_v24 = vpop.f32.mrf.mxu0 }
  0xf4   : > { %v1643_v41 = vmax.f32 %v622_v6, 0.0  ;;  %v4524_v16 = vpop.f32.mrf.mxu1 }
  0xf5   : > { %v1644_v45 = vmax.f32 %v735_v10, 0.0 }
  0xf6   : > { %3536 = vmatmul.msk.f32.gmra.mxu2 %vm426_vm0, %v4252_v50  ;;  %3600 = vmatmul.msk.f32.gmra.mxu0 %vm426_vm0, %v4252_v50 }
  0xf7   : > { %v4530_v26 = vmax.f32 %v1643_v41, %v1644_v45  ;;  %3568 = vmatmul.msk.f32.gmra.mxu3 %vm426_vm0, %v4252_v50  ;;  %3632 = vmatmul.msk.f32.gmra.mxu1 %vm426_vm0, %v4252_v50 }
  0xf9   : > { %6535 = vst [vmem:[#allocation9_spill] sm:$0xff] %v4530_v26  ;;  %v624_v44 = vpop.f32.mrf.mxu2 }
  0xfa   : > { %v625_v34 = vadd.f32 %v624_v44, %v4319_v3  ;;  %v737_v61 = vpop.f32.mrf.mxu3 }
  0xfb   : > { %v738_v40 = vadd.f32 %v737_v61, %v4326_v4  ;;  %v4538_v6 = vpop.f32.mrf.mxu0 }
  0xfc   : > { %v1651_v7 = vmax.f32 %v625_v34, 0.0  ;;  %v4540_v10 = vpop.f32.mrf.mxu1 }
  0xfd   : > { %v1652_v30 = vmax.f32 %v738_v40, 0.0 }
  0xfe   : > { %3537 = vmatmul.msk.f32.gmra.mxu2 %vm426_vm0, %v4280_v58  ;;  %3601 = vmatmul.msk.f32.gmra.mxu0 %vm426_vm0, %v4280_v58 }
  0xff   : > { %v4546_v41 = vmax.f32 %v1651_v7, %v1652_v30  ;;  %3569 = vmatmul.msk.f32.gmra.mxu3 %vm426_vm0, %v4280_v58  ;;  %3633 = vmatmul.msk.f32.gmra.mxu1 %vm426_vm0, %v4280_v58  ;;  %v4565_v58 = vld [vmem:[%s6521_s3 + $0xf0] sm:$0xff] }
 0x100   : > { %1817 = vmatpush.msra.mxu0 %v4565_v58 }
 0x101   : > { %6536 = vst [vmem:[#allocation10_spill] sm:$0xff] %v4546_v41  ;;  %v627_v50 = vpop.f32.mrf.mxu2 }
 0x102   : > { %v628_v45 = vadd.f32 %v627_v50, %v4319_v3  ;;  %v740_v44 = vpop.f32.mrf.mxu3 }
 0x103   : > { %v741_v34 = vadd.f32 %v740_v44, %v4326_v4  ;;  %v4554_v61 = vpop.f32.mrf.mxu0 }
 0x104   : > { %v1659_v40 = vmax.f32 %v628_v45, 0.0  ;;  %v4556_v26 = vpop.f32.mrf.mxu1 }
 0x105   : > { %v1660_v32 = vmax.f32 %v741_v34, 0.0 }
 0x106   : > { %3538 = vmatmul.msk.f32.gmra.mxu2 %vm426_vm0, %v4290_v60  ;;  %3602 = vmatmul.msk.f32.gmra.mxu0 %vm426_vm0, %v4290_v60 }
 0x107   : > { %v4567_v30 = vmax.f32 %v1659_v40, %v1660_v32  ;;  %3570 = vmatmul.msk.f32.gmra.mxu3 %vm426_vm0, %v4290_v60  ;;  %3634 = vmatmul.msk.f32.gmra.mxu1 %vm426_vm0, %v4290_v60 }
 0x109   : > { %6537 = vst [vmem:[#allocation11_spill] sm:$0xff] %v4567_v30  ;;  %v630_v7 = vpop.f32.mrf.mxu2 }
 0x10a   : > { %v631_v50 = vadd.f32 %v630_v7, %v4319_v3  ;;  %v743_v45 = vpop.f32.mrf.mxu3  ;;  %v382_v7 = vld [vmem:[%s6519_s1 + $0x70] sm:$0xff] }
 0x10b   : > { %v744_v44 = vadd.f32 %v743_v45, %v4326_v4  ;;  %v4576_v34 = vpop.f32.mrf.mxu0  ;;  %v541_v45 = vadd.f32 %v4314_v1, %v4319_v3  ;;  %1215 = vmatpush.msra.mxu2 %v382_v7  ;;  %v4611_v1 = vperm.slane %v4312_v0, 2  ;;  %v4625_v7 = vperm.slane %v4312_v0, 3 }
 0x10c   : > { %v1667_v41 = vmax.f32 %v631_v50, 0.0  ;;  %v4578_v54 = vpop.f32.mrf.mxu1  ;;  %v383_v50 = vld [vmem:[%s6519_s1 + $0x78] sm:$0xff] }
 0x10d   : > { %v1668_v32 = vmax.f32 %v744_v44, 0.0  ;;  %1328 = vmatpush.msra.mxu3 %v383_v50  ;;  %v1427_v51 = vmax.f32 %v541_v45, 0.0 }
 0x10e   : > { %3539 = vmatmul.msk.f32.gmra.mxu2 %vm426_vm0, %v4300_v62  ;;  %3603 = vmatmul.msk.f32.gmra.mxu0 %vm426_vm0, %v4300_v62 }
 0x10f   : > { %v4584_v60 = vmax.f32 %v1667_v41, %v1668_v32  ;;  %3571 = vmatmul.msk.f32.gmra.mxu3 %vm426_vm0, %v4300_v62  ;;  %3635 = vmatmul.msk.f32.gmra.mxu1 %vm426_vm0, %v4300_v62  ;;  %v654_v41 = vadd.f32 %v4316_v2, %v4326_v4  ;;  %v4616_v2 = vld [vmem:[%s6521_s3 + $0xe0] sm:$0xff] }
 0x110   : > { %1818 = vmatpush.msra.mxu0 %v4616_v2 }
 0x111   : > { %6538 = vst [vmem:[#allocation12_spill] sm:$0xff] %v4584_v60  ;;  %v633_v40 = vpop.f32.mrf.mxu2  ;;  %v1428_v28 = vmax.f32 %v654_v41, 0.0  ;;  %v544_v41 = vadd.f32 %v4334_v9, %v4319_v3 }
 0x112   : > { %v634_v44 = vadd.f32 %v633_v40, %v4319_v3  ;;  %v746_v32 = vpop.f32.mrf.mxu3 }
 0x113   : > { %v747_v62 = vadd.f32 %v746_v32, %v4326_v4  ;;  %v4602_v60 = vpop.f32.mrf.mxu0  ;;  %v1716_v45 = vmax.f32 %v1427_v51, %v1428_v28 }
 0x114   : > { %6539 = vst [vmem:[#allocation13_spill] sm:$0xff] %v4602_v60  ;;  %v1675_v30 = vmax.f32 %v634_v44, 0.0  ;;  %v4604_v36 = vpop.f32.mrf.mxu1 }
 0x115   : > { %6540 = vst [vmem:[#allocation14_spill] sm:$0xff] %v4604_v36  ;;  %v1676_v63 = vmax.f32 %v747_v62, 0.0 }
 0x116   : > { %3540 = vmatmul.msk.f32.gmra.mxu2 %vm426_vm0, %v4047_v11  ;;  %3604 = vmatmul.msk.f32.gmra.mxu0 %vm426_vm0, %v4047_v11 }
 0x117   : > { %v4618_v40 = vmax.f32 %v1675_v30, %v1676_v63  ;;  %3572 = vmatmul.msk.f32.gmra.mxu3 %vm426_vm0, %v4047_v11  ;;  %3636 = vmatmul.msk.f32.gmra.mxu1 %vm426_vm0, %v4047_v11  ;;  %v657_v63 = vadd.f32 %v4336_v13, %v4326_v4 }
 0x119   : > { %6541 = vst [vmem:[#allocation15_spill] sm:$0xff] %v4618_v40  ;;  %v766_v50 = vpop.f32.mrf.mxu2  ;;  %v1435_v40 = vmax.f32 %v544_v41, 0.0  ;;  %v1436_v36 = vmax.f32 %v657_v63, 0.0 }
 0x11a   : > { %v767_v30 = vadd.f32 %v766_v50, %v4611_v1  ;;  %v879_v44 = vpop.f32.mrf.mxu3  ;;  %v547_v50 = vadd.f32 %v4350_v29, %v4319_v3  ;;  %v4665_v29 = vld [vmem:[%s6521_s3 + $0xd0] sm:$0xff] }
 0x11b   : > { %v880_v32 = vadd.f32 %v879_v44, %v4625_v7  ;;  %v4634_v62 = vpop.f32.mrf.mxu0  ;;  %v1717_v51 = vmax.f32 %v1435_v40, %v1436_v36  ;;  %1819 = vmatpush.msra.mxu0 %v4665_v29 }
 0x11c   : > { %v1429_v11 = vmax.f32 %v767_v30, 0.0  ;;  %v4636_v0 = vpop.f32.mrf.mxu1 }
 0x11d   : > { %v1430_v28 = vmax.f32 %v880_v32, 0.0 }
 0x11e   : > { %v1748_v60 = vmax.f32 %v1716_v45, %v1429_v11  ;;  %3541 = vmatmul.msk.f32.gmra.mxu2 %vm426_vm0, %v4073_v17  ;;  %3605 = vmatmul.msk.f32.gmra.mxu0 %vm426_vm0, %v4073_v17  ;;  %v660_v45 = vadd.f32 %v4352_v37, %v4326_v4 }
 0x11f   : > { %3573 = vmatmul.msk.f32.gmra.mxu3 %vm426_vm0, %v4073_v17  ;;  %3637 = vmatmul.msk.f32.gmra.mxu1 %vm426_vm0, %v4073_v17  ;;  %v1443_v17 = vmax.f32 %v547_v50, 0.0  ;;  %v663_v50 = vadd.f32 %v4368_v49, %v4326_v4 }
 0x120   : > { %v4646_v9 = vmax.f32 %v1748_v60, %v1430_v28  ;;  %v1444_v60 = vmax.f32 %v660_v45, 0.0 }
 0x121   : > { %v769_v13 = vpop.f32.mrf.mxu2 }
 0x122   : > { %v770_v41 = vadd.f32 %v769_v13, %v4611_v1  ;;  %v882_v63 = vpop.f32.mrf.mxu3  ;;  %v1718_v13 = vmax.f32 %v1443_v17, %v1444_v60 }
 0x123   : > { %v883_v30 = vadd.f32 %v882_v63, %v4625_v7  ;;  %v4654_v44 = vpop.f32.mrf.mxu0 }
 0x124   : > { %v1437_v32 = vmax.f32 %v770_v41, 0.0  ;;  %v4656_v11 = vpop.f32.mrf.mxu1 }
 0x125   : > { %6542 = vst [vmem:[#allocation16_spill] sm:$0xff] %v4656_v11  ;;  %v1438_v36 = vmax.f32 %v883_v30, 0.0 }
 0x126   : > { %v1749_v28 = vmax.f32 %v1717_v51, %v1437_v32  ;;  %3542 = vmatmul.msk.f32.gmra.mxu2 %vm426_vm0, %v4087_v19  ;;  %3606 = vmatmul.msk.f32.gmra.mxu0 %vm426_vm0, %v4087_v19  ;;  %v550_v51 = vadd.f32 %v4366_v47, %v4319_v3 }
 0x127   : > { %3574 = vmatmul.msk.f32.gmra.mxu3 %vm426_vm0, %v4087_v19  ;;  %3638 = vmatmul.msk.f32.gmra.mxu1 %vm426_vm0, %v4087_v19 }
 0x128   : > { %v4672_v37 = vmax.f32 %v1749_v28, %v1438_v36  ;;  %v1451_v28 = vmax.f32 %v550_v51, 0.0  ;;  %v1452_v36 = vmax.f32 %v663_v50, 0.0 }
 0x129   : > { %v772_v40 = vpop.f32.mrf.mxu2 }
 0x12a   : > { %v773_v45 = vadd.f32 %v772_v40, %v4611_v1  ;;  %v885_v41 = vpop.f32.mrf.mxu3  ;;  %v1719_v60 = vmax.f32 %v1451_v28, %v1452_v36  ;;  %v553_v40 = vadd.f32 %v4388_v59, %v4319_v3  ;;  %v4711_v59 = vld [vmem:[%s6521_s3 + $0xc0] sm:$0xff] }
 0x12b   : > { %v886_v63 = vadd.f32 %v885_v41, %v4625_v7  ;;  %v4680_v30 = vpop.f32.mrf.mxu0  ;;  %1820 = vmatpush.msra.mxu0 %v4711_v59 }
 0x12c   : > { %v1445_v19 = vmax.f32 %v773_v45, 0.0  ;;  %v4682_v32 = vpop.f32.mrf.mxu1 }
 0x12d   : > { %v1446_v17 = vmax.f32 %v886_v63, 0.0 }
 0x12e   : > { %v1750_v11 = vmax.f32 %v1718_v13, %v1445_v19  ;;  %3543 = vmatmul.msk.f32.gmra.mxu2 %vm426_vm0, %v4107_v23  ;;  %3607 = vmatmul.msk.f32.gmra.mxu0 %vm426_vm0, %v4107_v23  ;;  %v666_v13 = vadd.f32 %v4390_v22, %v4326_v4 }
 0x12f   : > { %3575 = vmatmul.msk.f32.gmra.mxu3 %vm426_vm0, %v4107_v23  ;;  %3639 = vmatmul.msk.f32.gmra.mxu1 %vm426_vm0, %v4107_v23  ;;  %v1459_v23 = vmax.f32 %v553_v40, 0.0  ;;  %v669_v40 = vadd.f32 %v4406_v20, %v4326_v4  ;;  %v559_v20 = vadd.f32 %v4420_v43, %v4319_v3  ;;  %v1706_v43 = vld [vmem:[%s6521_s3 + $0xb0] sm:$0xff] }
 0x130   : > { %v4692_v47 = vmax.f32 %v1750_v11, %v1446_v17  ;;  %v1460_v11 = vmax.f32 %v666_v13, 0.0  ;;  %1821 = vmatpush.msra.mxu0 %v1706_v43 }
 0x131   : > { %v775_v49 = vpop.f32.mrf.mxu2 }
 0x132   : > { %v776_v51 = vadd.f32 %v775_v49, %v4611_v1  ;;  %v888_v50 = vpop.f32.mrf.mxu3  ;;  %v1720_v49 = vmax.f32 %v1459_v23, %v1460_v11  ;;  %v672_v11 = vadd.f32 %v4422_v46, %v4326_v4 }
 0x133   : > { %v889_v45 = vadd.f32 %v888_v50, %v4625_v7  ;;  %v4700_v41 = vpop.f32.mrf.mxu0 }
 0x134   : > { %v1453_v63 = vmax.f32 %v776_v51, 0.0  ;;  %v4702_v19 = vpop.f32.mrf.mxu1 }
 0x135   : > { %6543 = vst [vmem:[#allocation17_spill] sm:$0xff] %v4702_v19  ;;  %v1454_v28 = vmax.f32 %v889_v45, 0.0 }
 0x136   : > { %v1751_v17 = vmax.f32 %v1719_v60, %v1453_v63  ;;  %3544 = vmatmul.msk.f32.gmra.mxu2 %vm426_vm0, %v4121_v25  ;;  %3608 = vmatmul.msk.f32.gmra.mxu0 %vm426_vm0, %v4121_v25  ;;  %v556_v60 = vadd.f32 %v4404_v14, %v4319_v3 }
 0x137   : > { %3576 = vmatmul.msk.f32.gmra.mxu3 %vm426_vm0, %v4121_v25  ;;  %3640 = vmatmul.msk.f32.gmra.mxu1 %vm426_vm0, %v4121_v25 }
 0x138   : > { %v4718_v22 = vmax.f32 %v1751_v17, %v1454_v28  ;;  %v1467_v17 = vmax.f32 %v556_v60, 0.0  ;;  %v1468_v28 = vmax.f32 %v669_v40, 0.0 }
 0x139   : > { %v778_v36 = vpop.f32.mrf.mxu2 }
 0x13a   : > { %v779_v13 = vadd.f32 %v778_v36, %v4611_v1  ;;  %v891_v51 = vpop.f32.mrf.mxu3 }
 0x13b   : > { %v892_v50 = vadd.f32 %v891_v51, %v4625_v7  ;;  %v4726_v45 = vpop.f32.mrf.mxu0 }
 0x13c   : > { %v1461_v25 = vmax.f32 %v779_v13, 0.0  ;;  %v4728_v63 = vpop.f32.mrf.mxu1 }
 0x13d   : > { %6544 = vst [vmem:[#allocation18_spill] sm:$0xff] %v4728_v63  ;;  %v1462_v23 = vmax.f32 %v892_v50, 0.0 }
 0x13e   : > { %v1752_v19 = vmax.f32 %v1720_v49, %v1461_v25  ;;  %3545 = vmatmul.msk.f32.gmra.mxu2 %vm426_vm0, %v4135_v27  ;;  %3609 = vmatmul.msk.f32.gmra.mxu0 %vm426_vm0, %v4135_v27  ;;  %v1721_v49 = vmax.f32 %v1467_v17, %v1468_v28  ;;  %v1475_v25 = vmax.f32 %v559_v20, 0.0  ;;  %v374_v20 = vld [vmem:[%s6519_s1 + $0x30] sm:$0xff] }
 0x13f   : > { %3577 = vmatmul.msk.f32.gmra.mxu3 %vm426_vm0, %v4135_v27  ;;  %3641 = vmatmul.msk.f32.gmra.mxu1 %vm426_vm0, %v4135_v27  ;;  %v1476_v27 = vmax.f32 %v672_v11, 0.0  ;;  %v375_v11 = vld [vmem:[%s6519_s1 + $0x38] sm:$0xff] }
 0x140   : > { %v4738_v14 = vmax.f32 %v1752_v19, %v1462_v23  ;;  %1216 = vmatpush.msra.mxu2 %v374_v20  ;;  %1329 = vmatpush.msra.mxu3 %v375_v11 }
 0x141   : > { %v781_v36 = vpop.f32.mrf.mxu2  ;;  %v1722_v17 = vmax.f32 %v1475_v25, %v1476_v27 }
 0x142   : > { %v782_v60 = vadd.f32 %v781_v36, %v4611_v1  ;;  %v894_v40 = vpop.f32.mrf.mxu3  ;;  %v562_v36 = vadd.f32 %v4436_v55, %v4319_v3  ;;  %2203 = vmatpush.msrb.mxu2 %v4565_v58 }
 0x143   : > { %v895_v13 = vadd.f32 %v894_v40, %v4625_v7  ;;  %v4746_v50 = vpop.f32.mrf.mxu0 }
 0x144   : > { %v1469_v51 = vmax.f32 %v782_v60, 0.0  ;;  %v4748_v19 = vpop.f32.mrf.mxu1  ;;  %2204 = vmatpush.msrb.mxu2 %v4616_v2 }
 0x145   : > { %v1470_v63 = vmax.f32 %v895_v13, 0.0  ;;  %v1483_v13 = vmax.f32 %v562_v36, 0.0 }
 0x146   : > { %v1753_v23 = vmax.f32 %v1721_v49, %v1469_v51  ;;  %3546 = vmatmul.msk.f32.gmra.mxu2 %vm426_vm0, %v4155_v31  ;;  %3610 = vmatmul.msk.f32.gmra.mxu0 %vm426_vm0, %v4155_v31  ;;  %v675_v49 = vadd.f32 %v4438_v57, %v4326_v4 }
 0x147   : > { %3578 = vmatmul.msk.f32.gmra.mxu3 %vm426_vm0, %v4155_v31  ;;  %3642 = vmatmul.msk.f32.gmra.mxu1 %vm426_vm0, %v4155_v31 }
 0x148   : > { %v4761_v46 = vmax.f32 %v1753_v23, %v1470_v63  ;;  %v1484_v51 = vmax.f32 %v675_v49, 0.0  ;;  %2205 = vmatpush.msrb.mxu2 %v4665_v29 }
 0x149   : > { %v784_v28 = vpop.f32.mrf.mxu2 }
 0x14a   : > { %v785_v31 = vadd.f32 %v784_v28, %v4611_v1  ;;  %v897_v63 = vpop.f32.mrf.mxu3  ;;  %v1723_v23 = vmax.f32 %v1483_v13, %v1484_v51  ;;  %v678_v28 = vadd.f32 %v4454_v21, %v4326_v4  ;;  %2206 = vmatpush.msrb.mxu2 %v4711_v59  ;;  %v1715_v21 = vld [vmem:[%s6521_s3 + $0xf8] sm:$0xff]  ;;  %v1713_v13 = vld [vmem:[%s6521_s3 + $0xe8] sm:$0xff]  ;;  %v568_v51 = vadd.f32 %v4468_v48, %v4319_v3 }
 0x14b   : > { %v898_v60 = vadd.f32 %v897_v63, %v4625_v7  ;;  %v4777_v55 = vpop.f32.mrf.mxu0  ;;  %1930 = vmatpush.msra.mxu1 %v1715_v21  ;;  %2316 = vmatpush.msrb.mxu3 %v1715_v21  ;;  %v1709_v48 = vld [vmem:[%s6521_s3 + $0xc8] sm:$0xff] }
 0x14c   : > { %v1477_v40 = vmax.f32 %v785_v31, 0.0  ;;  %v4783_v57 = vpop.f32.mrf.mxu1  ;;  %2207 = vmatpush.msrb.mxu2 %v1706_v43  ;;  %v1492_v49 = vmax.f32 %v678_v28, 0.0 }
 0x14d   : > { %v1478_v27 = vmax.f32 %v898_v60, 0.0  ;;  %1931 = vmatpush.msra.mxu1 %v1713_v13  ;;  %2317 = vmatpush.msrb.mxu3 %v1713_v13 }
 0x14e   : > { %v1754_v25 = vmax.f32 %v1722_v17, %v1477_v40  ;;  %3547 = vmatmul.msk.f32.gmra.mxu2 %vm426_vm0, %v4169_v33  ;;  %3611 = vmatmul.msk.f32.gmra.mxu0 %vm426_vm0, %v4169_v33  ;;  %v565_v17 = vadd.f32 %v4452_v12, %v4319_v3  ;;  %v1704_v12 = vld [vmem:[%s6521_s3 + $0xa0] sm:$0xff] }
 0x14f   : > { %3579 = vmatmul.msk.f32.gmra.mxu3 %vm426_vm0, %v4169_v33  ;;  %3643 = vmatmul.msk.f32.gmra.mxu1 %vm426_vm0, %v4169_v33 }
 0x150   : > { %v4790_v58 = vmax.f32 %v1754_v25, %v1478_v27  ;;  %v1491_v29 = vmax.f32 %v565_v17, 0.0  ;;  %1822 = vmatpush.msra.mxu0 %v1704_v12  ;;  %2208 = vmatpush.msrb.mxu2 %v1704_v12  ;;  %v681_v25 = vadd.f32 %v4470_v18, %v4326_v4  ;;  %v1711_v17 = vld [vmem:[%s6521_s3 + $0xd8] sm:$0xff]  ;;  %v1705_v12 = vld [vmem:[%s6521_s3 + $0xa8] sm:$0xff] }
 0x151   : > { %v787_v2 = vpop.f32.mrf.mxu2  ;;  %1932 = vmatpush.msra.mxu1 %v1711_v17  ;;  %2318 = vmatpush.msrb.mxu3 %v1711_v17 }
 0x152   : > { %v788_v20 = vadd.f32 %v787_v2, %v4611_v1  ;;  %v900_v11 = vpop.f32.mrf.mxu3  ;;  %v1500_v18 = vmax.f32 %v681_v25, 0.0 }
 0x153   : > { %v901_v36 = vadd.f32 %v900_v11, %v4625_v7  ;;  %v4813_v59 = vpop.f32.mrf.mxu0  ;;  %1933 = vmatpush.msra.mxu1 %v1709_v48  ;;  %2319 = vmatpush.msrb.mxu3 %v1709_v48  ;;  %v3898_v48 = vld [vmem:[%s4038_s13 + $0xd0] sm:$0xff] }
 0x154   : > { %v1485_v33 = vmax.f32 %v788_v20, 0.0  ;;  %v4817_v60 = vpop.f32.mrf.mxu1  ;;  %v1499_v20 = vmax.f32 %v568_v51, 0.0 }
 0x155   : > { %v1486_v63 = vmax.f32 %v901_v36, 0.0 }
 0x156   : > { %v1755_v31 = vmax.f32 %v1723_v23, %v1485_v33  ;;  %3548 = vmatmul.msk.f32.gmra.mxu2 %vm426_vm0, %v4183_v35  ;;  %3612 = vmatmul.msk.f32.gmra.mxu0 %vm426_vm0, %v4183_v35  ;;  %v1707_v33 = vld [vmem:[%s6521_s3 + $0xb8] sm:$0xff] }
 0x157   : > { %3580 = vmatmul.msk.f32.gmra.mxu3 %vm426_vm0, %v4183_v35  ;;  %3644 = vmatmul.msk.f32.gmra.mxu1 %vm426_vm0, %v4183_v35  ;;  %v1724_v35 = vmax.f32 %v1491_v29, %v1492_v49  ;;  %v571_v49 = vadd.f32 %v4490_v8, %v4319_v3 }
 0x158   : > { %v4815_v43 = vmax.f32 %v1755_v31, %v1486_v63  ;;  %v684_v31 = vadd.f32 %v4492_v38, %v4326_v4  ;;  %1934 = vmatpush.msra.mxu1 %v1707_v33  ;;  %2320 = vmatpush.msrb.mxu3 %v1707_v33  ;;  %v1702_v38 = vld [vmem:[%s6521_s3 + $0x90] sm:$0xff] }
 0x159   : > { %v790_v40 = vpop.f32.mrf.mxu2  ;;  %1823 = vmatpush.msra.mxu0 %v1702_v38  ;;  %v1507_v25 = vmax.f32 %v571_v49, 0.0  ;;  %2209 = vmatpush.msrb.mxu2 %v1702_v38  ;;  %v1699_v49 = vld [vmem:[%s6521_s3 + $0x78] sm:$0xff] }
 0x15a   : > { %v791_v27 = vadd.f32 %v790_v40, %v4611_v1  ;;  %v903_v2 = vpop.f32.mrf.mxu3  ;;  %1935 = vmatpush.msra.mxu1 %v1705_v12  ;;  %2321 = vmatpush.msrb.mxu3 %v1705_v12  ;;  %v687_v12 = vadd.f32 %v4508_v56, %v4326_v4  ;;  %v1694_v56 = vld [vmem:[%s6521_s3 + $0x50] sm:$0xff] }
 0x15b   : > { %v904_v23 = vadd.f32 %v903_v2, %v4625_v7  ;;  %v4854_v21 = vpop.f32.mrf.mxu0  ;;  %v1703_v2 = vld [vmem:[%s6521_s3 + $0x98] sm:$0xff] }
 0x15c   : > { %v1493_v28 = vmax.f32 %v791_v27, 0.0  ;;  %v1508_v27 = vmax.f32 %v684_v31, 0.0  ;;  %1936 = vmatpush.msra.mxu1 %v1703_v2  ;;  %v1696_v31 = vld [vmem:[%s6521_s3 + $0x60] sm:$0xff]  ;;  %2322 = vmatpush.msrb.mxu3 %v1703_v2 }
 0x15d   : > { %v1494_v36 = vmax.f32 %v904_v23, 0.0  ;;  %v1700_v23 = vld [vmem:[%s6521_s3 + $0x80] sm:$0xff] }
 0x15e   : > { %v1756_v11 = vmax.f32 %v1724_v35, %v1493_v28  ;;  %3549 = vmatmul.msk.f32.gmra.mxu2 %vm426_vm0, %v4203_v39  ;;  %3613 = vmatmul.msk.f32.gmra.mxu0 %vm426_vm0, %v4203_v39  ;;  %v4857_v35 = vpop.f32.mrf.mxu1 }
 0x15f   : > { %3581 = vmatmul.msk.f32.gmra.mxu3 %vm426_vm0, %v4203_v39  ;;  %3645 = vmatmul.msk.f32.gmra.mxu1 %vm426_vm0, %v4203_v39  ;;  %v1725_v39 = vmax.f32 %v1499_v20, %v1500_v18  ;;  %v1701_v20 = vld [vmem:[%s6521_s3 + $0x88] sm:$0xff]  ;;  %v1698_v18 = vld [vmem:[%s6521_s3 + $0x70] sm:$0xff] }
 0x160   : > { %v4845_v29 = vmax.f32 %v1756_v11, %v1494_v36  ;;  %1824 = vmatpush.msra.mxu0 %v1700_v23  ;;  %v1726_v36 = vmax.f32 %v1507_v25, %v1508_v27  ;;  %2210 = vmatpush.msrb.mxu2 %v1700_v23  ;;  %v1516_v27 = vmax.f32 %v687_v12, 0.0 }
 0x161   : > { %v793_v63 = vpop.f32.mrf.mxu2  ;;  %1937 = vmatpush.msra.mxu1 %v1701_v20  ;;  %2323 = vmatpush.msrb.mxu3 %v1701_v20 }
 0x162   : > { %v794_v40 = vadd.f32 %v793_v63, %v4611_v1  ;;  %v906_v13 = vpop.f32.mrf.mxu3  ;;  %v574_v63 = vadd.f32 %v4506_v53, %v4319_v3  ;;  %1825 = vmatpush.msra.mxu0 %v1698_v18  ;;  %2211 = vmatpush.msrb.mxu2 %v1698_v18  ;;  %v1697_v53 = vld [vmem:[%s6521_s3 + $0x68] sm:$0xff]  ;;  %v577_v18 = vadd.f32 %v4522_v24, %v4319_v3 }
 0x163   : > { %v907_v8 = vadd.f32 %v906_v13, %v4625_v7  ;;  %1938 = vmatpush.msra.mxu1 %v1699_v49  ;;  %2324 = vmatpush.msrb.mxu3 %v1699_v49  ;;  %v1693_v49 = vld [vmem:[%s6521_s3 + $0x48] sm:$0xff] }
 0x164   : > { %v1501_v51 = vmax.f32 %v794_v40, 0.0  ;;  %1826 = vmatpush.msra.mxu0 %v1696_v31  ;;  %2212 = vmatpush.msrb.mxu2 %v1696_v31  ;;  %v1515_v25 = vmax.f32 %v574_v63, 0.0  ;;  %v1690_v31 = vld [vmem:[%s6521_s3 + $0x30] sm:$0xff] }
 0x165   : > { %v1502_v28 = vmax.f32 %v907_v8, 0.0  ;;  %v4894_v8 = vpop.f32.mrf.mxu0  ;;  %1939 = vmatpush.msra.mxu1 %v1697_v53  ;;  %2325 = vmatpush.msrb.mxu3 %v1697_v53  ;;  %v1688_v53 = vld [vmem:[%s6521_s3 + $0x20] sm:$0xff] }
 0x166   : > { %v1757_v17 = vmax.f32 %v1725_v39, %v1501_v51  ;;  %3550 = vmatmul.msk.f32.gmra.mxu2 %vm426_vm0, %v3898_v48  ;;  %3614 = vmatmul.msk.f32.gmra.mxu0 %vm426_vm0, %v3898_v48  ;;  %v4896_v51 = vpop.f32.mrf.mxu1  ;;  %v1727_v63 = vmax.f32 %v1515_v25, %v1516_v27 }
 0x167   : > { %3582 = vmatmul.msk.f32.gmra.mxu3 %vm426_vm0, %v3898_v48  ;;  %3646 = vmatmul.msk.f32.gmra.mxu1 %vm426_vm0, %v3898_v48  ;;  %v1692_v48 = vld [vmem:[%s6521_s3 + $0x40] sm:$0xff] }
 0x168   : > { %v4880_v11 = vmax.f32 %v1757_v17, %v1502_v28  ;;  %v3899_v17 = vld [vmem:[%s4038_s13 + $0xd8] sm:$0xff]  ;;  %1827 = vmatpush.msra.mxu0 %v1694_v56  ;;  %2213 = vmatpush.msrb.mxu2 %v1694_v56 }
 0x169   : > { %v796_v33 = vpop.f32.mrf.mxu2  ;;  %v1695_v28 = vld [vmem:[%s6521_s3 + $0x58] sm:$0xff] }
 0x16a   : > { %v797_v39 = vadd.f32 %v796_v33, %v4611_v1  ;;  %v909_v40 = vpop.f32.mrf.mxu3  ;;  %1940 = vmatpush.msra.mxu1 %v1695_v28  ;;  %1828 = vmatpush.msra.mxu0 %v1692_v48 }
 0x16b   : > { %v910_v13 = vadd.f32 %v909_v40, %v4625_v7  ;;  %2326 = vmatpush.msrb.mxu3 %v1695_v28  ;;  %2214 = vmatpush.msrb.mxu2 %v1692_v48  ;;  %v1523_v40 = vmax.f32 %v577_v18, 0.0  ;;  %v1686_v28 = vld [vmem:[%s6521_s3 + $0x10] sm:$0xff] }
 0x16c   : > { %v1509_v38 = vmax.f32 %v797_v39, 0.0  ;;  %1941 = vmatpush.msra.mxu1 %v1693_v49  ;;  %1829 = vmatpush.msra.mxu0 %v1690_v31 }
 0x16d   : > { %v1510_v23 = vmax.f32 %v910_v13, 0.0  ;;  %2327 = vmatpush.msrb.mxu3 %v1693_v49  ;;  %2215 = vmatpush.msrb.mxu2 %v1690_v31  ;;  %v4935_v56 = vpop.f32.mrf.mxu0  ;;  %v1684_v49 = vld [vmem:[%s6521_s3] sm:$0xff]  ;;  %v580_v31 = vadd.f32 %v4538_v6, %v4319_v3  ;;  %v1685_v6 = vld [vmem:[%s6521_s3 + $0x8] sm:$0xff] }
 0x16e   : > { %v1758_v2 = vmax.f32 %v1726_v36, %v1509_v38  ;;  %3551 = vmatmul.msk.f32.gmra.mxu2 %vm426_vm0, %v3899_v17  ;;  %3615 = vmatmul.msk.f32.gmra.mxu0 %vm426_vm0, %v3899_v17  ;;  %v690_v36 = vadd.f32 %v4524_v16, %v4326_v4  ;;  %v1691_v38 = vld [vmem:[%s6521_s3 + $0x38] sm:$0xff] }
 0x16f   : > { %3583 = vmatmul.msk.f32.gmra.mxu3 %vm426_vm0, %v3899_v17  ;;  %3647 = vmatmul.msk.f32.gmra.mxu1 %vm426_vm0, %v3899_v17  ;;  %v1689_v17 = vld [vmem:[%s6521_s3 + $0x28] sm:$0xff] }
 0x170   : > { %v4915_v20 = vmax.f32 %v1758_v2, %v1510_v23  ;;  %v1524_v13 = vmax.f32 %v690_v36, 0.0  ;;  %v3900_v2 = vld [vmem:[%s4038_s13 + $0xe0] sm:$0xff]  ;;  %v4940_v23 = vpop.f32.mrf.mxu1  ;;  %1942 = vmatpush.msra.mxu1 %v1691_v38  ;;  %1830 = vmatpush.msra.mxu0 %v1688_v53 }
 0x171   : > { %v799_v33 = vpop.f32.mrf.mxu2  ;;  %2328 = vmatpush.msrb.mxu3 %v1691_v38  ;;  %2216 = vmatpush.msrb.mxu2 %v1688_v53  ;;  %v3901_v53 = vld [vmem:[%s4038_s13 + $0xe8] sm:$0xff] }
 0x172   : > { %v800_v12 = vadd.f32 %v799_v33, %v4611_v1  ;;  %v912_v39 = vpop.f32.mrf.mxu3  ;;  %v1728_v18 = vmax.f32 %v1523_v40, %v1524_v13  ;;  %v1687_v33 = vld [vmem:[%s6521_s3 + $0x18] sm:$0xff]  ;;  %1943 = vmatpush.msra.mxu1 %v1689_v17  ;;  %1831 = vmatpush.msra.mxu0 %v1686_v28 }
 0x173   : > { %v913_v24 = vadd.f32 %v912_v39, %v4625_v7  ;;  %2329 = vmatpush.msrb.mxu3 %v1689_v17  ;;  %2217 = vmatpush.msrb.mxu2 %v1686_v28 }
 0x174   : > { %v1517_v16 = vmax.f32 %v800_v12, 0.0  ;;  %1944 = vmatpush.msra.mxu1 %v1687_v33  ;;  %1832 = vmatpush.msra.mxu0 %v1684_v49 }
 0x175   : > { %v1518_v27 = vmax.f32 %v913_v24, 0.0  ;;  %2330 = vmatpush.msrb.mxu3 %v1687_v33  ;;  %2218 = vmatpush.msrb.mxu2 %v1684_v49 }
 0x176   : > { %v1759_v25 = vmax.f32 %v1727_v63, %v1517_v16  ;;  %3552 = vmatmul.msk.f32.gmra.mxu2 %vm426_vm0, %v3900_v2  ;;  %3616 = vmatmul.msk.f32.gmra.mxu0 %vm426_vm0, %v3900_v2  ;;  %v693_v63 = vadd.f32 %v4540_v10, %v4326_v4  ;;  %v1531_v10 = vmax.f32 %v580_v31, 0.0 }
 0x177   : > { %3584 = vmatmul.msk.f32.gmra.mxu3 %vm426_vm0, %v3900_v2  ;;  %3648 = vmatmul.msk.f32.gmra.mxu1 %vm426_vm0, %v3900_v2 }
 0x178   : > { %v4950_v48 = vmax.f32 %v1759_v25, %v1518_v27  ;;  %v1532_v40 = vmax.f32 %v693_v63, 0.0  ;;  %v4972_v25 = vpop.f32.mrf.mxu0  ;;  %1945 = vmatpush.msra.mxu1 %v1685_v6  ;;  %2331 = vmatpush.msrb.mxu3 %v1685_v6  ;;  %v4976_v2 = vpop.f32.mrf.mxu1  ;;  %v3902_v6 = vld [vmem:[%s4038_s13 + $0xf0] sm:$0xff] }
 0x179   : > { %v802_v36 = vpop.f32.mrf.mxu2 }
 0x17a   : > { %v803_v12 = vadd.f32 %v802_v36, %v4611_v1  ;;  %v915_v39 = vpop.f32.mrf.mxu3  ;;  %v1729_v28 = vmax.f32 %v1531_v10, %v1532_v40  ;;  %v696_v36 = vadd.f32 %v4556_v26, %v4326_v4  ;;  %v586_v40 = vadd.f32 %v4576_v34, %v4319_v3 }
 0x17b   : > { %v916_v24 = vadd.f32 %v915_v39, %v4625_v7 }
 0x17c   : > { %v1525_v16 = vmax.f32 %v803_v12, 0.0  ;;  %v1540_v39 = vmax.f32 %v696_v36, 0.0 }
 0x17d   : > { %v1526_v38 = vmax.f32 %v916_v24, 0.0 }
 0x17e   : > { %v1760_v13 = vmax.f32 %v1728_v18, %v1525_v16  ;;  %3553 = vmatmul.msk.f32.gmra.mxu2 %vm426_vm0, %v3901_v53  ;;  %3617 = vmatmul.msk.f32.gmra.mxu0 %vm426_vm0, %v3901_v53  ;;  %v583_v18 = vadd.f32 %v4554_v61, %v4319_v3 }
 0x17f   : > { %3585 = vmatmul.msk.f32.gmra.mxu3 %vm426_vm0, %v3901_v53  ;;  %3649 = vmatmul.msk.f32.gmra.mxu1 %vm426_vm0, %v3901_v53 }
 0x180   : > { %v4974_v27 = vmax.f32 %v1760_v13, %v1526_v38  ;;  %v1539_v12 = vmax.f32 %v583_v18, 0.0  ;;  %v699_v13 = vadd.f32 %v4578_v54, %v4326_v4  ;;  %v4995_v38 = vpop.f32.mrf.mxu0 }
 0x181   : > { %v805_v17 = vpop.f32.mrf.mxu2 }
 0x182   : > { %v806_v33 = vadd.f32 %v805_v17, %v4611_v1  ;;  %v918_v49 = vpop.f32.mrf.mxu3  ;;  %v1730_v10 = vmax.f32 %v1539_v12, %v1540_v39  ;;  %v3903_v12 = vld [vmem:[%s4038_s13 + $0xf8] sm:$0xff] }
 0x183   : > { %v919_v31 = vadd.f32 %v918_v49, %v4625_v7  ;;  %v1548_v49 = vmax.f32 %v699_v13, 0.0  ;;  %v3904_v13 = vld [vmem:[%s4038_s13] sm:$0xff] }
 0x184   : > { %v1533_v63 = vmax.f32 %v806_v33, 0.0  ;;  %v1547_v33 = vmax.f32 %v586_v40, 0.0 }
 0x185   : > { %v1534_v16 = vmax.f32 %v919_v31, 0.0 }
 0x186   : > { %v1761_v24 = vmax.f32 %v1729_v28, %v1533_v63  ;;  %3554 = vmatmul.msk.f32.gmra.mxu2 %vm426_vm0, %v3902_v6  ;;  %3618 = vmatmul.msk.f32.gmra.mxu0 %vm426_vm0, %v3902_v6  ;;  %v4998_v28 = vpop.f32.mrf.mxu1  ;;  %v1731_v54 = vmax.f32 %v1547_v33, %v1548_v49 }
 0x187   : > { %3586 = vmatmul.msk.f32.gmra.mxu3 %vm426_vm0, %v3902_v6  ;;  %3650 = vmatmul.msk.f32.gmra.mxu1 %vm426_vm0, %v3902_v6 }
 0x188   : > { %v4989_v26 = vmax.f32 %v1761_v24, %v1534_v16  ;;  %v5010_v16 = vpop.f32.mrf.mxu0 }
 0x189   : > { %v808_v61 = vpop.f32.mrf.mxu2 }
 0x18a   : > { %v809_v53 = vadd.f32 %v808_v61, %v4611_v1  ;;  %v921_v17 = vpop.f32.mrf.mxu3 }
 0x18b   : > { %v922_v18 = vadd.f32 %v921_v17, %v4625_v7 }
 0x18c   : > { %v1541_v36 = vmax.f32 %v809_v53, 0.0 }
 0x18d   : > { %v1542_v63 = vmax.f32 %v922_v18, 0.0 }
 0x18e   : > { %v1762_v31 = vmax.f32 %v1730_v10, %v1541_v36  ;;  %3555 = vmatmul.msk.f32.gmra.mxu2 %vm426_vm0, %v3903_v12  ;;  %3619 = vmatmul.msk.f32.gmra.mxu0 %vm426_vm0, %v3903_v12  ;;  %v5012_v61 = vpop.f32.mrf.mxu1 }
 0x18f   : > { %3587 = vmatmul.msk.f32.gmra.mxu3 %vm426_vm0, %v3903_v12  ;;  %3651 = vmatmul.msk.f32.gmra.mxu1 %vm426_vm0, %v3903_v12 }
 0x190   : > { %v5006_v3 = vmax.f32 %v1762_v31, %v1542_v63  ;;  %v5023_v31 = vpop.f32.mrf.mxu0 }
 0x191   : > { %v811_v4 = vpop.f32.mrf.mxu2 }
 0x192   : > { %v812_v34 = vadd.f32 %v811_v4, %v4611_v1  ;;  %v924_v39 = vpop.f32.mrf.mxu3  ;;  %v3905_v4 = vld [vmem:[%s4038_s13 + $0x8] sm:$0xff] }
 0x193   : > { %v925_v24 = vadd.f32 %v924_v39, %v4625_v7 }
 0x194   : > { %v1549_v6 = vmax.f32 %v812_v34, 0.0 }
 0x195   : > { %v1550_v40 = vmax.f32 %v925_v24, 0.0 }
 0x196   : > { %v1763_v10 = vmax.f32 %v1731_v54, %v1549_v6  ;;  %3652 = vmatmul.msk.f32.vlgmr.msra.gmra.mxu2 %vm426_vm0, %v3904_v13  ;;  %1833 = vmatmul.f32.vlgmr.msra.gmra.mxu0 %v4646_v9 }
 0x197   : > { %3684 = vmatmul.msk.f32.vlgmr.msra.gmra.mxu3 %vm426_vm0, %v3904_v13  ;;  %1946 = vmatmul.f32.vlgmr.msra.gmra.mxu1 %v4646_v9  ;;  %v5029_v9 = vpop.f32.mrf.mxu1  ;;  %v3906_v13 = vld [vmem:[%s4038_s13 + $0x10] sm:$0xff] }
 0x198   : > { %v5019_v53 = vmax.f32 %v1763_v10, %v1550_v40 }
 0x199   : > { %v814_v17 = vpop.f32.mrf.mxu2 }
 0x19a   : > { %v815_v18 = vadd.f32 %v814_v17, %v4611_v1  ;;  %v927_v36 = vpop.f32.mrf.mxu3 }
 0x19b   : > { %v928_v33 = vadd.f32 %v927_v36, %v4625_v7 }
 0x19c   : > { %v1557_v49 = vmax.f32 %v815_v18, 0.0 }
 0x19d   : > { %v1558_v12 = vmax.f32 %v928_v33, 0.0 }
 0x19e   : > { %v1764_v63 = vmax.f32 %v4342_v15, %v1557_v49  ;;  %3653 = vmatmul.msk.f32.gmra.mxu2 %vm426_vm0, %v3905_v4  ;;  %1836 = vmatmul.f32.gmra.mxu0 %v4672_v37 }
 0x19f   : > { %3685 = vmatmul.msk.f32.gmra.mxu3 %vm426_vm0, %v3905_v4  ;;  %1949 = vmatmul.f32.gmra.mxu1 %v4672_v37  ;;  %v5043_v37 = vpop.f32.mrf.mxu0  ;;  %v5047_v18 = vpop.f32.mrf.mxu1 }
 0x1a0   : > { %v5033_v54 = vmax.f32 %v1764_v63, %v1558_v12 }
 0x1a1   : > { %v817_v34 = vpop.f32.mrf.mxu2 }
 0x1a2   : > { %v818_v39 = vadd.f32 %v817_v34, %v4611_v1  ;;  %v930_v24 = vpop.f32.mrf.mxu3  ;;  %v3907_v34 = vld [vmem:[%s4038_s13 + $0x18] sm:$0xff] }
 0x1a3   : > { %v931_v15 = vadd.f32 %v930_v24, %v4625_v7 }
 0x1a4   : > { %v1565_v6 = vmax.f32 %v818_v39, 0.0 }
 0x1a5   : > { %v1566_v40 = vmax.f32 %v931_v15, 0.0 }
 0x1a6   : > { %v1765_v10 = vmax.f32 %v4358_v42, %v1565_v6  ;;  %3654 = vmatmul.msk.f32.gmra.mxu2 %vm426_vm0, %v3906_v13  ;;  %1839 = vmatmul.f32.gmra.mxu0 %v4692_v47 }
 0x1a7   : > { %3686 = vmatmul.msk.f32.gmra.mxu3 %vm426_vm0, %v3906_v13  ;;  %1952 = vmatmul.f32.gmra.mxu1 %v4692_v47  ;;  %v5059_v24 = vpop.f32.mrf.mxu0 }
 0x1a8   : > { %v5045_v17 = vmax.f32 %v1765_v10, %v1566_v40  ;;  %6545 = vst [vmem:[#allocation19_spill] sm:$0xff] %v5059_v24 }
 0x1a9   : > { %v820_v36 = vpop.f32.mrf.mxu2 }
 0x1aa   : > { %v821_v42 = vadd.f32 %v820_v36, %v4611_v1  ;;  %v933_v33 = vpop.f32.mrf.mxu3 }
 0x1ab   : > { %v934_v49 = vadd.f32 %v933_v33, %v4625_v7 }
 0x1ac   : > { %v1573_v63 = vmax.f32 %v821_v42, 0.0  ;;  %v3908_v42 = vld [vmem:[%s4038_s13 + $0x20] sm:$0xff] }
 0x1ad   : > { %v1574_v4 = vmax.f32 %v934_v49, 0.0 }
 0x1ae   : > { %v1766_v12 = vmax.f32 %v4374_v52, %v1573_v63  ;;  %3655 = vmatmul.msk.f32.gmra.mxu2 %vm426_vm0, %v3907_v34  ;;  %1842 = vmatmul.f32.gmra.mxu0 %v4718_v22  ;;  %v5062_v52 = vpop.f32.mrf.mxu1 }
 0x1af   : > { %3687 = vmatmul.msk.f32.gmra.mxu3 %vm426_vm0, %v3907_v34  ;;  %1955 = vmatmul.f32.gmra.mxu1 %v4718_v22  ;;  %6546 = vst [vmem:[#allocation20_spill] sm:$0xff] %v5062_v52 }
 0x1b0   : > { %v5057_v47 = vmax.f32 %v1766_v12, %v1574_v4 }
 0x1b1   : > { %v823_v39 = vpop.f32.mrf.mxu2 }
 0x1b2   : > { %v824_v15 = vadd.f32 %v823_v39, %v4611_v1  ;;  %v936_v6 = vpop.f32.mrf.mxu3  ;;  %v6549_v39 = vld [vmem:[#allocation2_spill] sm:$0xff] }
 0x1b3   : > { %v937_v10 = vadd.f32 %v936_v6, %v4625_v7 }
 0x1b4   : > { %v1581_v40 = vmax.f32 %v824_v15, 0.0 }
 0x1b5   : > { %v1582_v36 = vmax.f32 %v937_v10, 0.0  ;;  %v3909_v10 = vld [vmem:[%s4038_s13 + $0x28] sm:$0xff] }
 0x1b6   : > { %v1767_v13 = vmax.f32 %v4396_v5, %v1581_v40  ;;  %3656 = vmatmul.msk.f32.gmra.mxu2 %vm426_vm0, %v3908_v42  ;;  %1845 = vmatmul.f32.gmra.mxu0 %v4738_v14  ;;  %v5075_v5 = vpop.f32.mrf.mxu0  ;;  %v5077_v34 = vpop.f32.mrf.mxu1 }
 0x1b7   : > { %3688 = vmatmul.msk.f32.gmra.mxu3 %vm426_vm0, %v3908_v42  ;;  %1958 = vmatmul.f32.gmra.mxu1 %v4738_v14  ;;  %6547 = vst [vmem:[#allocation21_spill] sm:$0xff] %v5075_v5  ;;  %v6579_v5 = vld [vmem:[#allocation15_spill] sm:$0xff] }
 0x1b8   : > { %v5071_v22 = vmax.f32 %v1767_v13, %v1582_v36  ;;  %6548 = vst [vmem:[#allocation22_spill] sm:$0xff] %v5077_v34  ;;  %v3918_v34 = vld [vmem:[%s4038_s13 + $0x70] sm:$0xff] }
 0x1b9   : > { %v826_v33 = vpop.f32.mrf.mxu2 }
 0x1ba   : > { %v827_v49 = vadd.f32 %v826_v33, %v4611_v1  ;;  %v939_v63 = vpop.f32.mrf.mxu3 }
 0x1bb   : > { %v940_v12 = vadd.f32 %v939_v63, %v4625_v7  ;;  %v6551_v63 = vld [vmem:[#allocation3_spill] sm:$0xff] }
 0x1bc   : > { %v1589_v4 = vmax.f32 %v827_v49, 0.0 }
 0x1bd   : > { %v1590_v6 = vmax.f32 %v940_v12, 0.0 }
 0x1be   : > { %v1768_v15 = vmax.f32 %v6549_v39, %v1589_v4  ;;  %3657 = vmatmul.msk.f32.gmra.mxu2 %vm426_vm0, %v3909_v10  ;;  %1848 = vmatmul.f32.gmra.mxu0 %v4761_v46  ;;  %v5089_v49 = vpop.f32.mrf.mxu0  ;;  %v3910_v39 = vld [vmem:[%s4038_s13 + $0x30] sm:$0xff] }
 0x1bf   : > { %3689 = vmatmul.msk.f32.gmra.mxu3 %vm426_vm0, %v3909_v10  ;;  %1961 = vmatmul.f32.gmra.mxu1 %v4761_v46  ;;  %6550 = vst [vmem:[#allocation2_spill] sm:$0xff] %v5089_v49  ;;  %v5095_v46 = vpop.f32.mrf.mxu1  ;;  %v3911_v49 = vld [vmem:[%s4038_s13 + $0x38] sm:$0xff] }
 0x1c0   : > { %v5085_v14 = vmax.f32 %v1768_v15, %v1590_v6  ;;  %6552 = vst [vmem:[#allocation3_spill] sm:$0xff] %v5095_v46 }
 0x1c1   : > { %v829_v40 = vpop.f32.mrf.mxu2 }
 0x1c2   : > { %v830_v13 = vadd.f32 %v829_v40, %v4611_v1  ;;  %v942_v36 = vpop.f32.mrf.mxu3 }
 0x1c3   : > { %v943_v42 = vadd.f32 %v942_v36, %v4625_v7 }
 0x1c4   : > { %v1597_v33 = vmax.f32 %v830_v13, 0.0 }
 0x1c5   : > { %v1598_v4 = vmax.f32 %v943_v42, 0.0  ;;  %v6553_v42 = vld [vmem:[#allocation4_spill] sm:$0xff] }
 0x1c6   : > { %v1769_v12 = vmax.f32 %v6551_v63, %v1597_v33  ;;  %3658 = vmatmul.msk.f32.gmra.mxu2 %vm426_vm0, %v3910_v39  ;;  %1851 = vmatmul.f32.gmra.mxu0 %v4790_v58 }
 0x1c7   : > { %3690 = vmatmul.msk.f32.gmra.mxu3 %vm426_vm0, %v3910_v39  ;;  %1964 = vmatmul.f32.gmra.mxu1 %v4790_v58  ;;  %v5109_v58 = vpop.f32.mrf.mxu0 }
 0x1c8   : > { %v5099_v15 = vmax.f32 %v1769_v12, %v1598_v4  ;;  %6554 = vst [vmem:[#allocation4_spill] sm:$0xff] %v5109_v58  ;;  %v5113_v4 = vpop.f32.mrf.mxu1 }
 0x1c9   : > { %v832_v6 = vpop.f32.mrf.mxu2  ;;  %6555 = vst [vmem:[#allocation23_spill] sm:$0xff] %v5113_v4 }
 0x1ca   : > { %v833_v10 = vadd.f32 %v832_v6, %v4611_v1  ;;  %v945_v40 = vpop.f32.mrf.mxu3 }
 0x1cb   : > { %v946_v13 = vadd.f32 %v945_v40, %v4625_v7 }
 0x1cc   : > { %v1605_v36 = vmax.f32 %v833_v10, 0.0 }
 0x1cd   : > { %v1606_v63 = vmax.f32 %v946_v13, 0.0 }
 0x1ce   : > { %v1770_v33 = vmax.f32 %v6553_v42, %v1605_v36  ;;  %3659 = vmatmul.msk.f32.gmra.mxu2 %vm426_vm0, %v3911_v49  ;;  %1854 = vmatmul.f32.gmra.mxu0 %v4815_v43  ;;  %v6556_v36 = vld [vmem:[#allocation5_spill] sm:$0xff] }
 0x1cf   : > { %3691 = vmatmul.msk.f32.gmra.mxu3 %vm426_vm0, %v3911_v49  ;;  %1967 = vmatmul.f32.gmra.mxu1 %v4815_v43  ;;  %v3912_v49 = vld [vmem:[%s4038_s13 + $0x40] sm:$0xff] }
 0x1d0   : > { %v5111_v12 = vmax.f32 %v1770_v33, %v1606_v63  ;;  %v5125_v63 = vpop.f32.mrf.mxu0 }
 0x1d1   : > { %v835_v39 = vpop.f32.mrf.mxu2  ;;  %6557 = vst [vmem:[#allocation5_spill] sm:$0xff] %v5125_v63 }
 0x1d2   : > { %v836_v6 = vadd.f32 %v835_v39, %v4611_v1  ;;  %v948_v10 = vpop.f32.mrf.mxu3 }
 0x1d3   : > { %v949_v40 = vadd.f32 %v948_v10, %v4625_v7  ;;  %v5128_v10 = vpop.f32.mrf.mxu1 }
 0x1d4   : > { %v1613_v13 = vmax.f32 %v836_v6, 0.0  ;;  %6558 = vst [vmem:[#allocation24_spill] sm:$0xff] %v5128_v10 }
 0x1d5   : > { %v1614_v46 = vmax.f32 %v949_v40, 0.0 }
 0x1d6   : > { %v1771_v42 = vmax.f32 %v6556_v36, %v1613_v13  ;;  %3660 = vmatmul.msk.f32.gmra.mxu2 %vm426_vm0, %v3912_v49  ;;  %1857 = vmatmul.f32.gmra.mxu0 %v4845_v29  ;;  %v6559_v36 = vld [vmem:[#allocation6_spill] sm:$0xff] }
 0x1d7   : > { %3692 = vmatmul.msk.f32.gmra.mxu3 %vm426_vm0, %v3912_v49  ;;  %1970 = vmatmul.f32.gmra.mxu1 %v4845_v29  ;;  %v3913_v49 = vld [vmem:[%s4038_s13 + $0x48] sm:$0xff] }
 0x1d8   : > { %v5123_v43 = vmax.f32 %v1771_v42, %v1614_v46 }
 0x1d9   : > { %v838_v33 = vpop.f32.mrf.mxu2 }
 0x1da   : > { %v839_v39 = vadd.f32 %v838_v33, %v4611_v1  ;;  %v951_v6 = vpop.f32.mrf.mxu3 }
 0x1db   : > { %v952_v40 = vadd.f32 %v951_v6, %v4625_v7  ;;  %v5141_v6 = vpop.f32.mrf.mxu0 }
 0x1dc   : > { %v1621_v13 = vmax.f32 %v839_v39, 0.0  ;;  %6560 = vst [vmem:[#allocation6_spill] sm:$0xff] %v5141_v6  ;;  %v3915_v6 = vld [vmem:[%s4038_s13 + $0x58] sm:$0xff] }
 0x1dd   : > { %v1622_v58 = vmax.f32 %v952_v40, 0.0 }
 0x1de   : > { %v1772_v4 = vmax.f32 %v6559_v36, %v1621_v13  ;;  %3661 = vmatmul.msk.f32.gmra.mxu2 %vm426_vm0, %v3913_v49  ;;  %1860 = vmatmul.f32.gmra.mxu0 %v4880_v11  ;;  %v5143_v13 = vpop.f32.mrf.mxu1  ;;  %v6562_v36 = vld [vmem:[#allocation7_spill] sm:$0xff] }
 0x1df   : > { %3693 = vmatmul.msk.f32.gmra.mxu3 %vm426_vm0, %v3913_v49  ;;  %1973 = vmatmul.f32.gmra.mxu1 %v4880_v11  ;;  %6561 = vst [vmem:[#allocation25_spill] sm:$0xff] %v5143_v13  ;;  %v3914_v49 = vld [vmem:[%s4038_s13 + $0x50] sm:$0xff] }
 0x1e0   : > { %v5137_v29 = vmax.f32 %v1772_v4, %v1622_v58 }
 0x1e1   : > { %v841_v46 = vpop.f32.mrf.mxu2 }
 0x1e2   : > { %v842_v42 = vadd.f32 %v841_v46, %v4611_v1  ;;  %v954_v33 = vpop.f32.mrf.mxu3 }
 0x1e3   : > { %v955_v39 = vadd.f32 %v954_v33, %v4625_v7 }
 0x1e4   : > { %v1629_v40 = vmax.f32 %v842_v42, 0.0 }
 0x1e5   : > { %v1630_v63 = vmax.f32 %v955_v39, 0.0  ;;  %v6564_v39 = vld [vmem:[#allocation8_spill] sm:$0xff] }
 0x1e6   : > { %v1773_v10 = vmax.f32 %v6562_v36, %v1629_v40  ;;  %3662 = vmatmul.msk.f32.gmra.mxu2 %vm426_vm0, %v3914_v49  ;;  %1863 = vmatmul.f32.gmra.mxu0 %v4915_v20  ;;  %v5155_v40 = vpop.f32.mrf.mxu0 }
 0x1e7   : > { %3694 = vmatmul.msk.f32.gmra.mxu3 %vm426_vm0, %v3914_v49  ;;  %1976 = vmatmul.f32.gmra.mxu1 %v4915_v20  ;;  %6563 = vst [vmem:[#allocation7_spill] sm:$0xff] %v5155_v40  ;;  %v5161_v20 = vpop.f32.mrf.mxu1  ;;  %v3916_v40 = vld [vmem:[%s4038_s13 + $0x60] sm:$0xff] }
 0x1e8   : > { %v5151_v11 = vmax.f32 %v1773_v10, %v1630_v63  ;;  %6565 = vst [vmem:[#allocation8_spill] sm:$0xff] %v5161_v20 }
 0x1e9   : > { %v844_v58 = vpop.f32.mrf.mxu2 }
 0x1ea   : > { %v845_v4 = vadd.f32 %v844_v58, %v4611_v1  ;;  %v957_v46 = vpop.f32.mrf.mxu3 }
 0x1eb   : > { %v958_v42 = vadd.f32 %v957_v46, %v4625_v7 }
 0x1ec   : > { %v1637_v33 = vmax.f32 %v845_v4, 0.0 }
 0x1ed   : > { %v1638_v13 = vmax.f32 %v958_v42, 0.0  ;;  %v6566_v42 = vld [vmem:[#allocation9_spill] sm:$0xff] }
 0x1ee   : > { %v1774_v36 = vmax.f32 %v6564_v39, %v1637_v33  ;;  %3663 = vmatmul.msk.f32.gmra.mxu2 %vm426_vm0, %v3915_v6  ;;  %1866 = vmatmul.f32.gmra.mxu0 %v4950_v48 }
 0x1ef   : > { %3695 = vmatmul.msk.f32.gmra.mxu3 %vm426_vm0, %v3915_v6  ;;  %1979 = vmatmul.f32.gmra.mxu1 %v4950_v48  ;;  %v5175_v48 = vpop.f32.mrf.mxu0 }
 0x1f0   : > { %v5165_v63 = vmax.f32 %v1774_v36, %v1638_v13  ;;  %6567 = vst [vmem:[#allocation9_spill] sm:$0xff] %v5175_v48  ;;  %v5179_v13 = vpop.f32.mrf.mxu1 }
 0x1f1   : > { %v847_v10 = vpop.f32.mrf.mxu2  ;;  %6568 = vst [vmem:[#allocation26_spill] sm:$0xff] %v5179_v13 }
 0x1f2   : > { %v848_v49 = vadd.f32 %v847_v10, %v4611_v1  ;;  %v960_v58 = vpop.f32.mrf.mxu3 }
 0x1f3   : > { %v961_v4 = vadd.f32 %v960_v58, %v4625_v7 }
 0x1f4   : > { %v1645_v46 = vmax.f32 %v848_v49, 0.0 }
 0x1f5   : > { %v1646_v39 = vmax.f32 %v961_v4, 0.0 }
 0x1f6   : > { %v1775_v33 = vmax.f32 %v6566_v42, %v1645_v46  ;;  %3664 = vmatmul.msk.f32.gmra.mxu2 %vm426_vm0, %v3916_v40  ;;  %1869 = vmatmul.f32.gmra.mxu0 %v4974_v27  ;;  %v6569_v46 = vld [vmem:[#allocation10_spill] sm:$0xff] }
 0x1f7   : > { %3696 = vmatmul.msk.f32.gmra.mxu3 %vm426_vm0, %v3916_v40  ;;  %1982 = vmatmul.f32.gmra.mxu1 %v4974_v27  ;;  %v3917_v40 = vld [vmem:[%s4038_s13 + $0x68] sm:$0xff] }
 0x1f8   : > { %v5177_v6 = vmax.f32 %v1775_v33, %v1646_v39  ;;  %v5191_v39 = vpop.f32.mrf.mxu0 }
 0x1f9   : > { %v850_v36 = vpop.f32.mrf.mxu2  ;;  %6570 = vst [vmem:[#allocation10_spill] sm:$0xff] %v5191_v39 }
 0x1fa   : > { %v851_v10 = vadd.f32 %v850_v36, %v4611_v1  ;;  %v963_v49 = vpop.f32.mrf.mxu3 }
 0x1fb   : > { %v964_v58 = vadd.f32 %v963_v49, %v4625_v7  ;;  %v5194_v49 = vpop.f32.mrf.mxu1 }
 0x1fc   : > { %v1653_v4 = vmax.f32 %v851_v10, 0.0  ;;  %6571 = vst [vmem:[#allocation27_spill] sm:$0xff] %v5194_v49 }
 0x1fd   : > { %v1654_v20 = vmax.f32 %v964_v58, 0.0 }
 0x1fe   : > { %v1776_v42 = vmax.f32 %v6569_v46, %v1653_v4  ;;  %3665 = vmatmul.msk.f32.gmra.mxu2 %vm426_vm0, %v3917_v40  ;;  %1872 = vmatmul.f32.gmra.mxu0 %v4989_v26  ;;  %v6572_v46 = vld [vmem:[#allocation11_spill] sm:$0xff] }
 0x1ff   : > { %3697 = vmatmul.msk.f32.gmra.mxu3 %vm426_vm0, %v3917_v40  ;;  %1985 = vmatmul.f32.gmra.mxu1 %v4989_v26  ;;  %v2604_v26 = vld [vmem:[%s6523_s5 + $0x78] sm:$0xff] }
 0x200   : > { %v5189_v27 = vmax.f32 %v1776_v42, %v1654_v20  ;;  %2609 = vmatpush.msrb.mxu0 %v2604_v26 }
 0x201   : > { %v853_v33 = vpop.f32.mrf.mxu2 }
 0x202   : > { %v854_v36 = vadd.f32 %v853_v33, %v4611_v1  ;;  %v966_v10 = vpop.f32.mrf.mxu3 }
 0x203   : > { %v967_v58 = vadd.f32 %v966_v10, %v4625_v7  ;;  %v5210_v10 = vpop.f32.mrf.mxu0 }
 0x204   : > { %v1661_v4 = vmax.f32 %v854_v36, 0.0  ;;  %6573 = vst [vmem:[#allocation11_spill] sm:$0xff] %v5210_v10 }
 0x205   : > { %v1662_v48 = vmax.f32 %v967_v58, 0.0 }
 0x206   : > { %v1777_v13 = vmax.f32 %v6572_v46, %v1661_v4  ;;  %3666 = vmatmul.msk.f32.gmra.mxu2 %vm426_vm0, %v3918_v34  ;;  %1875 = vmatmul.f32.gmra.mxu0 %v5006_v3  ;;  %v5212_v4 = vpop.f32.mrf.mxu1  ;;  %v6575_v46 = vld [vmem:[#allocation12_spill] sm:$0xff] }
 0x207   : > { %3698 = vmatmul.msk.f32.gmra.mxu3 %vm426_vm0, %v3918_v34  ;;  %1988 = vmatmul.f32.gmra.mxu1 %v5006_v3  ;;  %6574 = vst [vmem:[#allocation28_spill] sm:$0xff] %v5212_v4  ;;  %v3919_v34 = vld [vmem:[%s4038_s13 + $0x78] sm:$0xff]  ;;  %v3920_v3 = vld [vmem:[%s6520_s2] sm:$0xff] }
 0x208   : > { %v5206_v20 = vmax.f32 %v1777_v13, %v1662_v48  ;;  %v5223_v48 = vperm.slane %v3920_v3, 4  ;;  %v5225_v13 = vperm.slane %v3920_v3, 5 }
 0x209   : > { %v856_v42 = vpop.f32.mrf.mxu2 }
 0x20a   : > { %v857_v40 = vadd.f32 %v856_v42, %v4611_v1  ;;  %v969_v33 = vpop.f32.mrf.mxu3 }
 0x20b   : > { %v970_v36 = vadd.f32 %v969_v33, %v4625_v7  ;;  %v5235_v10 = vpop.f32.mrf.mxu0 }
 0x20c   : > { %v1669_v58 = vmax.f32 %v857_v40, 0.0  ;;  %6578 = vst [vmem:[#allocation12_spill] sm:$0xff] %v5235_v10 }
 0x20d   : > { %v1670_v39 = vmax.f32 %v970_v36, 0.0 }
 0x20e   : > { %v1778_v49 = vmax.f32 %v6575_v46, %v1669_v58  ;;  %3667 = vmatmul.msk.f32.gmra.mxu2 %vm426_vm0, %v3919_v34  ;;  %1878 = vmatmul.f32.gmra.mxu0 %v5019_v53  ;;  %v6576_v58 = vld [vmem:[#allocation13_spill] sm:$0xff] }
 0x20f   : > { %3699 = vmatmul.msk.f32.gmra.mxu3 %vm426_vm0, %v3919_v34  ;;  %1991 = vmatmul.f32.gmra.mxu1 %v5019_v53  ;;  %v993_v46 = vadd.f32 %v6576_v58, %v5223_v48  ;;  %v6577_v53 = vld [vmem:[#allocation14_spill] sm:$0xff] }
 0x210   : > { %v5227_v26 = vmax.f32 %v1778_v49, %v1670_v39  ;;  %v1106_v34 = vadd.f32 %v6577_v53, %v5225_v13  ;;  %v3921_v39 = vld [vmem:[%s4038_s13 + $0x80] sm:$0xff]  ;;  %v5246_v49 = vpop.f32.mrf.mxu1 }
 0x211   : > { %v859_v42 = vpop.f32.mrf.mxu2  ;;  %6580 = vst [vmem:[#allocation13_spill] sm:$0xff] %v5246_v49 }
 0x212   : > { %v860_v40 = vadd.f32 %v859_v42, %v4611_v1  ;;  %v972_v33 = vpop.f32.mrf.mxu3  ;;  %v5241_v1 = vperm.slane %v3920_v3, 6  ;;  %v1432_v42 = vmax.f32 %v1106_v34, 0.0  ;;  %v3922_v34 = vld [vmem:[%s4038_s13 + $0x88] sm:$0xff] }
 0x213   : > { %v973_v36 = vadd.f32 %v972_v33, %v4625_v7  ;;  %v2603_v7 = vld [vmem:[%s6523_s5 + $0x70] sm:$0xff] }
 0x214   : > { %v1677_v4 = vmax.f32 %v860_v40, 0.0  ;;  %2610 = vmatpush.msrb.mxu0 %v2603_v7  ;;  %v5265_v7 = vpop.f32.mrf.mxu0 }
 0x215   : > { %v1678_v24 = vmax.f32 %v973_v36, 0.0 }
 0x216   : > { %v1779_v52 = vmax.f32 %v6579_v5, %v1677_v4  ;;  %3668 = vmatmul.msk.f32.gmra.mxu2 %vm426_vm0, %v3921_v39  ;;  %1881 = vmatmul.f32.gmra.mxu0 %v5033_v54  ;;  %v5250_v5 = vperm.slane %v3920_v3, 7  ;;  %v1431_v4 = vmax.f32 %v993_v46, 0.0 }
 0x217   : > { %3700 = vmatmul.msk.f32.gmra.mxu3 %vm426_vm0, %v3921_v39  ;;  %1994 = vmatmul.f32.gmra.mxu1 %v5033_v54  ;;  %v996_v39 = vadd.f32 %v4634_v62, %v5223_v48  ;;  %v1109_v54 = vadd.f32 %v4636_v0, %v5225_v13 }
 0x218   : > { %v5252_v40 = vmax.f32 %v1779_v52, %v1678_v24  ;;  %v2107_v10 = vmax.f32 %v1431_v4, %v1432_v42  ;;  %v5269_v0 = vpop.f32.mrf.mxu1 }
 0x219   : > { %v1218_v33 = vpop.f32.mrf.mxu2  ;;  %v1439_v24 = vmax.f32 %v996_v39, 0.0  ;;  %v1440_v52 = vmax.f32 %v1109_v54, 0.0 }
 0x21a   : > { %v1219_v36 = vadd.f32 %v1218_v33, %v5241_v1  ;;  %v1331_v58 = vpop.f32.mrf.mxu3 }
 0x21b   : > { %v1332_v53 = vadd.f32 %v1331_v58, %v5250_v5  ;;  %v999_v58 = vadd.f32 %v4654_v44, %v5223_v48 }
 0x21c   : > { %v1433_v3 = vmax.f32 %v1219_v36, 0.0  ;;  %v2108_v36 = vmax.f32 %v1439_v24, %v1440_v52 }
 0x21d   : > { %v1434_v46 = vmax.f32 %v1332_v53, 0.0  ;;  %v1447_v44 = vmax.f32 %v999_v58, 0.0  ;;  %v1115_v58 = vadd.f32 %v4682_v32, %v5225_v13 }
 0x21e   : > { %v2139_v49 = vmax.f32 %v2107_v10, %v1433_v3  ;;  %3669 = vmatmul.msk.f32.gmra.mxu2 %vm426_vm0, %v3922_v34  ;;  %1884 = vmatmul.f32.gmra.mxu0 %v5045_v17 }
 0x21f   : > { %3701 = vmatmul.msk.f32.gmra.mxu3 %vm426_vm0, %v3922_v34  ;;  %1997 = vmatmul.f32.gmra.mxu1 %v5045_v17  ;;  %v6581_v17 = vld [vmem:[#allocation16_spill] sm:$0xff] }
 0x220   : > { %v5267_v62 = vmax.f32 %v2139_v49, %v1434_v46  ;;  %v1112_v53 = vadd.f32 %v6581_v17, %v5225_v13  ;;  %v3923_v49 = vld [vmem:[%s4038_s13 + $0x90] sm:$0xff]  ;;  %v2602_v46 = vld [vmem:[%s6523_s5 + $0x68] sm:$0xff] }
 0x221   : > { %v1221_v10 = vpop.f32.mrf.mxu2  ;;  %2611 = vmatpush.msrb.mxu0 %v2602_v46  ;;  %v1456_v46 = vmax.f32 %v1115_v58, 0.0 }
 0x222   : > { %v1222_v4 = vadd.f32 %v1221_v10, %v5241_v1  ;;  %v1334_v42 = vpop.f32.mrf.mxu3  ;;  %v1448_v34 = vmax.f32 %v1112_v53, 0.0  ;;  %v5287_v10 = vpop.f32.mrf.mxu0 }
 0x223   : > { %v1335_v33 = vadd.f32 %v1334_v42, %v5250_v5 }
 0x224   : > { %v1441_v39 = vmax.f32 %v1222_v4, 0.0  ;;  %v2109_v17 = vmax.f32 %v1447_v44, %v1448_v34 }
 0x225   : > { %v1442_v3 = vmax.f32 %v1335_v33, 0.0  ;;  %v5290_v33 = vpop.f32.mrf.mxu1 }
 0x226   : > { %v2140_v54 = vmax.f32 %v2108_v36, %v1441_v39  ;;  %3670 = vmatmul.msk.f32.gmra.mxu2 %vm426_vm0, %v3923_v49  ;;  %1887 = vmatmul.f32.gmra.mxu0 %v5057_v47 }
 0x227   : > { %3702 = vmatmul.msk.f32.gmra.mxu3 %vm426_vm0, %v3923_v49  ;;  %2000 = vmatmul.f32.gmra.mxu1 %v5057_v47  ;;  %v1002_v47 = vadd.f32 %v4680_v30, %v5223_v48 }
 0x228   : > { %v5285_v24 = vmax.f32 %v2140_v54, %v1442_v3  ;;  %v3924_v3 = vld [vmem:[%s4038_s13 + $0x98] sm:$0xff] }
 0x229   : > { %v1224_v52 = vpop.f32.mrf.mxu2  ;;  %v1455_v49 = vmax.f32 %v1002_v47, 0.0 }
 0x22a   : > { %v1225_v4 = vadd.f32 %v1224_v52, %v5241_v1  ;;  %v1337_v42 = vpop.f32.mrf.mxu3 }
 0x22b   : > { %v1338_v36 = vadd.f32 %v1337_v42, %v5250_v5  ;;  %v1005_v42 = vadd.f32 %v4700_v41, %v5223_v48 }
 0x22c   : > { %v1449_v53 = vmax.f32 %v1225_v4, 0.0  ;;  %v2110_v4 = vmax.f32 %v1455_v49, %v1456_v46 }
 0x22d   : > { %v1450_v54 = vmax.f32 %v1338_v36, 0.0  ;;  %v6582_v36 = vld [vmem:[#allocation17_spill] sm:$0xff]  ;;  %v5312_v47 = vpop.f32.mrf.mxu1  ;;  %v1463_v41 = vmax.f32 %v1005_v42, 0.0 }
 0x22e   : > { %v2141_v39 = vmax.f32 %v2109_v17, %v1449_v53  ;;  %3671 = vmatmul.msk.f32.gmra.mxu2 %vm426_vm0, %v3924_v3  ;;  %1890 = vmatmul.f32.gmra.mxu0 %v5071_v22  ;;  %v1118_v17 = vadd.f32 %v6582_v36, %v5225_v13  ;;  %v5310_v53 = vpop.f32.mrf.mxu0  ;;  %6583 = vst [vmem:[#allocation14_spill] sm:$0xff] %v5312_v47 }
 0x22f   : > { %3703 = vmatmul.msk.f32.gmra.mxu3 %vm426_vm0, %v3924_v3  ;;  %2003 = vmatmul.f32.gmra.mxu1 %v5071_v22  ;;  %v2601_v3 = vld [vmem:[%s6523_s5 + $0x60] sm:$0xff]  ;;  %v1008_v36 = vadd.f32 %v4726_v45, %v5223_v48 }
 0x230   : > { %v5302_v44 = vmax.f32 %v2141_v39, %v1450_v54  ;;  %v3925_v54 = vld [vmem:[%s4038_s13 + $0xa0] sm:$0xff]  ;;  %v1464_v49 = vmax.f32 %v1118_v17, 0.0  ;;  %2612 = vmatpush.msrb.mxu0 %v2601_v3 }
 0x231   : > { %v1227_v30 = vpop.f32.mrf.mxu2  ;;  %v1471_v45 = vmax.f32 %v1008_v36, 0.0  ;;  %v3927_v36 = vld [vmem:[%s4038_s13 + $0xb0] sm:$0xff] }
 0x232   : > { %v1228_v32 = vadd.f32 %v1227_v30, %v5241_v1  ;;  %v1340_v34 = vpop.f32.mrf.mxu3 }
 0x233   : > { %v1341_v52 = vadd.f32 %v1340_v34, %v5250_v5 }
 0x234   : > { %v1457_v22 = vmax.f32 %v1228_v32, 0.0 }
 0x235   : > { %v1458_v39 = vmax.f32 %v1341_v52, 0.0 }
 0x236   : > { %v2142_v58 = vmax.f32 %v2110_v4, %v1457_v22  ;;  %3672 = vmatmul.msk.f32.gmra.mxu2 %vm426_vm0, %v3925_v54  ;;  %1893 = vmatmul.f32.gmra.mxu0 %v5085_v14  ;;  %v2111_v4 = vmax.f32 %v1463_v41, %v1464_v49  ;;  %v6584_v22 = vld [vmem:[#allocation18_spill] sm:$0xff]  ;;  %v5330_v47 = vpop.f32.mrf.mxu0 }
 0x237   : > { %3704 = vmatmul.msk.f32.gmra.mxu3 %vm426_vm0, %v3925_v54  ;;  %2006 = vmatmul.f32.gmra.mxu1 %v5085_v14  ;;  %v1121_v54 = vadd.f32 %v6584_v22, %v5225_v13  ;;  %v1124_v22 = vadd.f32 %v4748_v19, %v5225_v13 }
 0x238   : > { %v5322_v46 = vmax.f32 %v2142_v58, %v1458_v39  ;;  %v3926_v58 = vld [vmem:[%s4038_s13 + $0xa8] sm:$0xff]  ;;  %v5335_v39 = vpop.f32.mrf.mxu1 }
 0x239   : > { %v1230_v30 = vpop.f32.mrf.mxu2  ;;  %v1472_v3 = vmax.f32 %v1121_v54, 0.0  ;;  %v2600_v54 = vld [vmem:[%s6523_s5 + $0x58] sm:$0xff] }
 0x23a   : > { %v1231_v32 = vadd.f32 %v1230_v30, %v5241_v1  ;;  %v1343_v34 = vpop.f32.mrf.mxu3  ;;  %2613 = vmatpush.msrb.mxu0 %v2600_v54 }
 0x23b   : > { %v1344_v52 = vadd.f32 %v1343_v34, %v5250_v5 }
 0x23c   : > { %v1465_v14 = vmax.f32 %v1231_v32, 0.0 }
 0x23d   : > { %v1466_v17 = vmax.f32 %v1344_v52, 0.0  ;;  %v2112_v52 = vmax.f32 %v1471_v45, %v1472_v3 }
 0x23e   : > { %v2143_v42 = vmax.f32 %v2111_v4, %v1465_v14  ;;  %3673 = vmatmul.msk.f32.gmra.mxu2 %vm426_vm0, %v3926_v58  ;;  %1896 = vmatmul.f32.gmra.mxu0 %v5099_v15  ;;  %v1011_v4 = vadd.f32 %v4746_v50, %v5223_v48  ;;  %v5355_v19 = vpop.f32.mrf.mxu0 }
 0x23f   : > { %3705 = vmatmul.msk.f32.gmra.mxu3 %vm426_vm0, %v3926_v58  ;;  %2009 = vmatmul.f32.gmra.mxu1 %v5099_v15 }
 0x240   : > { %v5339_v41 = vmax.f32 %v2143_v42, %v1466_v17  ;;  %v1479_v50 = vmax.f32 %v1011_v4, 0.0  ;;  %v1480_v42 = vmax.f32 %v1124_v22, 0.0  ;;  %v5359_v45 = vpop.f32.mrf.mxu1 }
 0x241   : > { %v1233_v49 = vpop.f32.mrf.mxu2 }
 0x242   : > { %v1234_v30 = vadd.f32 %v1233_v49, %v5241_v1  ;;  %v1346_v32 = vpop.f32.mrf.mxu3 }
 0x243   : > { %v1347_v34 = vadd.f32 %v1346_v32, %v5250_v5 }
 0x244   : > { %v1473_v14 = vmax.f32 %v1234_v30, 0.0 }
 0x245   : > { %v1474_v15 = vmax.f32 %v1347_v34, 0.0  ;;  %v2113_v34 = vmax.f32 %v1479_v50, %v1480_v42 }
 0x246   : > { %v2144_v58 = vmax.f32 %v2112_v52, %v1473_v14  ;;  %3674 = vmatmul.msk.f32.gmra.mxu2 %vm426_vm0, %v3927_v36  ;;  %1899 = vmatmul.f32.gmra.mxu0 %v5111_v12  ;;  %v1127_v52 = vadd.f32 %v4783_v57, %v5225_v13  ;;  %v5374_v50 = vpop.f32.mrf.mxu0 }
 0x247   : > { %3706 = vmatmul.msk.f32.gmra.mxu3 %vm426_vm0, %v3927_v36  ;;  %2012 = vmatmul.f32.gmra.mxu1 %v5111_v12  ;;  %v1014_v12 = vadd.f32 %v4777_v55, %v5223_v48 }
 0x248   : > { %v5357_v17 = vmax.f32 %v2144_v58, %v1474_v15  ;;  %v3928_v58 = vld [vmem:[%s4038_s13 + $0xb8] sm:$0xff]  ;;  %v1488_v36 = vmax.f32 %v1127_v52, 0.0 }
 0x249   : > { %v1236_v3 = vpop.f32.mrf.mxu2  ;;  %v1487_v15 = vmax.f32 %v1014_v12, 0.0 }
 0x24a   : > { %v1237_v49 = vadd.f32 %v1236_v3, %v5241_v1  ;;  %v1349_v30 = vpop.f32.mrf.mxu3  ;;  %v5377_v3 = vpop.f32.mrf.mxu1 }
 0x24b   : > { %v1350_v32 = vadd.f32 %v1349_v30, %v5250_v5  ;;  %v2114_v30 = vmax.f32 %v1487_v15, %v1488_v36 }
 0x24c   : > { %v1481_v4 = vmax.f32 %v1237_v49, 0.0 }
 0x24d   : > { %v1482_v14 = vmax.f32 %v1350_v32, 0.0  ;;  %v1017_v32 = vadd.f32 %v4813_v59, %v5223_v48 }
 0x24e   : > { %v2145_v22 = vmax.f32 %v2113_v34, %v1481_v4  ;;  %3675 = vmatmul.msk.f32.gmra.mxu2 %vm426_vm0, %v3928_v58  ;;  %1902 = vmatmul.f32.gmra.mxu0 %v5123_v43  ;;  %v3929_v4 = vld [vmem:[%s4038_s13 + $0xc0] sm:$0xff] }
 0x24f   : > { %3707 = vmatmul.msk.f32.gmra.mxu3 %vm426_vm0, %v3928_v58  ;;  %2015 = vmatmul.f32.gmra.mxu1 %v5123_v43  ;;  %v1130_v43 = vadd.f32 %v4817_v60, %v5225_v13  ;;  %v1495_v59 = vmax.f32 %v1017_v32, 0.0 }
 0x250   : > { %v5372_v54 = vmax.f32 %v2145_v22, %v1482_v14  ;;  %v2599_v22 = vld [vmem:[%s6523_s5 + $0x50] sm:$0xff] }
 0x251   : > { %v1239_v55 = vpop.f32.mrf.mxu2  ;;  %v1496_v14 = vmax.f32 %v1130_v43, 0.0  ;;  %2614 = vmatpush.msrb.mxu0 %v2599_v22 }
 0x252   : > { %v1240_v57 = vadd.f32 %v1239_v55, %v5241_v1  ;;  %v1352_v42 = vpop.f32.mrf.mxu3  ;;  %v5402_v32 = vpop.f32.mrf.mxu1 }
 0x253   : > { %v1353_v49 = vadd.f32 %v1352_v42, %v5250_v5  ;;  %v1020_v42 = vadd.f32 %v4854_v21, %v5223_v48 }
 0x254   : > { %v1489_v34 = vmax.f32 %v1240_v57, 0.0  ;;  %v2115_v57 = vmax.f32 %v1495_v59, %v1496_v14 }
 0x255   : > { %v1490_v52 = vmax.f32 %v1353_v49, 0.0  ;;  %v1133_v49 = vadd.f32 %v4857_v35, %v5225_v13  ;;  %v1503_v21 = vmax.f32 %v1020_v42, 0.0 }
 0x256   : > { %v2146_v12 = vmax.f32 %v2114_v30, %v1489_v34  ;;  %3676 = vmatmul.msk.f32.gmra.mxu2 %vm426_vm0, %v3929_v4  ;;  %1905 = vmatmul.f32.gmra.mxu0 %v5137_v29 }
 0x257   : > { %3708 = vmatmul.msk.f32.gmra.mxu3 %vm426_vm0, %v3929_v4  ;;  %2018 = vmatmul.f32.gmra.mxu1 %v5137_v29  ;;  %v5400_v29 = vpop.f32.mrf.mxu0 }
 0x258   : > { %v5392_v60 = vmax.f32 %v2146_v12, %v1490_v52  ;;  %v3930_v12 = vld [vmem:[%s4038_s13 + $0xc8] sm:$0xff]  ;;  %v1504_v52 = vmax.f32 %v1133_v49, 0.0  ;;  %v3931_v49 = vld [vmem:[%s4038_s13 + $0xd0] sm:$0xff] }
 0x259   : > { %v1242_v58 = vpop.f32.mrf.mxu2 }
 0x25a   : > { %v1243_v15 = vadd.f32 %v1242_v58, %v5241_v1  ;;  %v1355_v36 = vpop.f32.mrf.mxu3  ;;  %v2116_v58 = vmax.f32 %v1503_v21, %v1504_v52 }
 0x25b   : > { %v1356_v55 = vadd.f32 %v1355_v36, %v5250_v5  ;;  %v1136_v36 = vadd.f32 %v4896_v51, %v5225_v13 }
 0x25c   : > { %v1497_v30 = vmax.f32 %v1243_v15, 0.0  ;;  %v1023_v15 = vadd.f32 %v4894_v8, %v5223_v48 }
 0x25d   : > { %v1498_v34 = vmax.f32 %v1356_v55, 0.0  ;;  %v1512_v51 = vmax.f32 %v1136_v36, 0.0  ;;  %v3932_v36 = vld [vmem:[%s4038_s13 + $0xd8] sm:$0xff] }
 0x25e   : > { %v2147_v43 = vmax.f32 %v2115_v57, %v1497_v30  ;;  %3677 = vmatmul.msk.f32.gmra.mxu2 %vm426_vm0, %v3930_v12  ;;  %1908 = vmatmul.f32.gmra.mxu0 %v5151_v11  ;;  %v2598_v30 = vld [vmem:[%s6523_s5 + $0x48] sm:$0xff]  ;;  %v1511_v8 = vmax.f32 %v1023_v15, 0.0 }
 0x25f   : > { %3709 = vmatmul.msk.f32.gmra.mxu3 %vm426_vm0, %v3930_v12  ;;  %2021 = vmatmul.f32.gmra.mxu1 %v5151_v11  ;;  %v5417_v57 = vpop.f32.mrf.mxu0 }
 0x260   : > { %v5409_v35 = vmax.f32 %v2147_v43, %v1498_v34  ;;  %v5425_v43 = vpop.f32.mrf.mxu1  ;;  %2615 = vmatpush.msrb.mxu0 %v2598_v30 }
 0x261   : > { %v1245_v4 = vpop.f32.mrf.mxu2 }
 0x262   : > { %v1246_v22 = vadd.f32 %v1245_v4, %v5241_v1  ;;  %v1358_v59 = vpop.f32.mrf.mxu3 }
 0x263   : > { %v1359_v14 = vadd.f32 %v1358_v59, %v5250_v5  ;;  %v1026_v59 = vadd.f32 %v4935_v56, %v5223_v48 }
 0x264   : > { %v1505_v55 = vmax.f32 %v1246_v22, 0.0  ;;  %v2117_v22 = vmax.f32 %v1511_v8, %v1512_v51 }
 0x265   : > { %v1506_v42 = vmax.f32 %v1359_v14, 0.0  ;;  %v1139_v14 = vadd.f32 %v4940_v23, %v5225_v13 }
 0x266   : > { %v2148_v11 = vmax.f32 %v2116_v58, %v1505_v55  ;;  %3678 = vmatmul.msk.f32.gmra.mxu2 %vm426_vm0, %v3931_v49  ;;  %1911 = vmatmul.f32.gmra.mxu0 %v5165_v63  ;;  %v1519_v55 = vmax.f32 %v1026_v59, 0.0  ;;  %v3933_v59 = vld [vmem:[%s4038_s13 + $0xe0] sm:$0xff] }
 0x267   : > { %3710 = vmatmul.msk.f32.gmra.mxu3 %vm426_vm0, %v3931_v49  ;;  %2024 = vmatmul.f32.gmra.mxu1 %v5165_v63 }
 0x268   : > { %v5429_v34 = vmax.f32 %v2148_v11, %v1506_v42  ;;  %v1520_v11 = vmax.f32 %v1139_v14, 0.0  ;;  %v5442_v42 = vpop.f32.mrf.mxu0  ;;  %v5446_v23 = vpop.f32.mrf.mxu1  ;;  %v2597_v14 = vld [vmem:[%s6523_s5 + $0x40] sm:$0xff] }
 0x269   : > { %v1248_v12 = vpop.f32.mrf.mxu2  ;;  %2616 = vmatpush.msrb.mxu0 %v2597_v14 }
 0x26a   : > { %v1249_v21 = vadd.f32 %v1248_v12, %v5241_v1  ;;  %v1361_v52 = vpop.f32.mrf.mxu3  ;;  %v2118_v12 = vmax.f32 %v1519_v55, %v1520_v11 }
 0x26b   : > { %v1362_v4 = vadd.f32 %v1361_v52, %v5250_v5 }
 0x26c   : > { %v1513_v58 = vmax.f32 %v1249_v21, 0.0  ;;  %v1029_v21 = vadd.f32 %v4972_v25, %v5223_v48 }
 0x26d   : > { %v1514_v15 = vmax.f32 %v1362_v4, 0.0 }
 0x26e   : > { %v2149_v63 = vmax.f32 %v2117_v22, %v1513_v58  ;;  %3679 = vmatmul.msk.f32.gmra.mxu2 %vm426_vm0, %v3932_v36  ;;  %1914 = vmatmul.f32.gmra.mxu0 %v5177_v6  ;;  %v1527_v25 = vmax.f32 %v1029_v21, 0.0 }
 0x26f   : > { %3711 = vmatmul.msk.f32.gmra.mxu3 %vm426_vm0, %v3932_v36  ;;  %2027 = vmatmul.f32.gmra.mxu1 %v5177_v6  ;;  %v1142_v6 = vadd.f32 %v4976_v2, %v5225_v13 }
 0x270   : > { %v5444_v56 = vmax.f32 %v2149_v63, %v1514_v15  ;;  %v5464_v15 = vpop.f32.mrf.mxu0  ;;  %v5467_v11 = vpop.f32.mrf.mxu1 }
 0x271   : > { %v1251_v49 = vpop.f32.mrf.mxu2  ;;  %v1528_v58 = vmax.f32 %v1142_v6, 0.0  ;;  %v3934_v6 = vld [vmem:[%s4038_s13 + $0xe8] sm:$0xff] }
 0x272   : > { %v1252_v30 = vadd.f32 %v1251_v49, %v5241_v1  ;;  %v1364_v8 = vpop.f32.mrf.mxu3 }
 0x273   : > { %v1365_v51 = vadd.f32 %v1364_v8, %v5250_v5  ;;  %v1145_v8 = vadd.f32 %v4998_v28, %v5225_v13 }
 0x274   : > { %v1521_v52 = vmax.f32 %v1252_v30, 0.0  ;;  %v2119_v30 = vmax.f32 %v1527_v25, %v1528_v58  ;;  %v1035_v58 = vadd.f32 %v5010_v16, %v5223_v48  ;;  %v2763_v16 = vld [vmem:[%s6525_s7 + $0x48] sm:$0xff] }
 0x275   : > { %v1522_v22 = vmax.f32 %v1365_v51, 0.0  ;;  %2871 = vmatpush.msrb.mxu1 %v2763_v16 }
 0x276   : > { %v2150_v4 = vmax.f32 %v2118_v12, %v1521_v52  ;;  %3680 = vmatmul.msk.f32.gmra.mxu2 %vm426_vm0, %v3933_v59  ;;  %1917 = vmatmul.f32.gmra.mxu0 %v5189_v27 }
 0x277   : > { %3712 = vmatmul.msk.f32.gmra.mxu3 %vm426_vm0, %v3933_v59  ;;  %2030 = vmatmul.f32.gmra.mxu1 %v5189_v27  ;;  %v1032_v27 = vadd.f32 %v4995_v38, %v5223_v48 }
 0x278   : > { %v5462_v2 = vmax.f32 %v2150_v4, %v1522_v22  ;;  %v1536_v4 = vmax.f32 %v1145_v8, 0.0  ;;  %v2596_v8 = vld [vmem:[%s6523_s5 + $0x38] sm:$0xff] }
 0x279   : > { %v1254_v63 = vpop.f32.mrf.mxu2  ;;  %v1535_v52 = vmax.f32 %v1032_v27, 0.0  ;;  %v3935_v27 = vld [vmem:[%s4038_s13 + $0xf0] sm:$0xff]  ;;  %2617 = vmatpush.msrb.mxu0 %v2596_v8 }
 0x27a   : > { %v1255_v36 = vadd.f32 %v1254_v63, %v5241_v1  ;;  %v1367_v55 = vpop.f32.mrf.mxu3  ;;  %v1148_v63 = vadd.f32 %v5012_v61, %v5225_v13  ;;  %v1543_v61 = vmax.f32 %v1035_v58, 0.0 }
 0x27b   : > { %v1368_v49 = vadd.f32 %v1367_v55, %v5250_v5  ;;  %v2120_v25 = vmax.f32 %v1535_v52, %v1536_v4  ;;  %v5489_v55 = vpop.f32.mrf.mxu1 }
 0x27c   : > { %v1529_v51 = vmax.f32 %v1255_v36, 0.0  ;;  %v5487_v36 = vpop.f32.mrf.mxu0 }
 0x27d   : > { %v1530_v21 = vmax.f32 %v1368_v49, 0.0 }
 0x27e   : > { %v2151_v12 = vmax.f32 %v2119_v30, %v1529_v51  ;;  %3681 = vmatmul.msk.f32.gmra.mxu2 %vm426_vm0, %v3934_v6  ;;  %1920 = vmatmul.f32.gmra.mxu0 %v5206_v20  ;;  %v1544_v51 = vmax.f32 %v1148_v63, 0.0  ;;  %v3936_v63 = vld [vmem:[%s4038_s13 + $0xf8] sm:$0xff] }
 0x27f   : > { %3713 = vmatmul.msk.f32.gmra.mxu3 %vm426_vm0, %v3934_v6  ;;  %2033 = vmatmul.f32.gmra.mxu1 %v5206_v20 }
 0x280   : > { %v5479_v22 = vmax.f32 %v2151_v12, %v1530_v21 }
 0x281   : > { %v1257_v38 = vpop.f32.mrf.mxu2 }
 0x282   : > { %v1258_v28 = vadd.f32 %v1257_v38, %v5241_v1  ;;  %v1370_v59 = vpop.f32.mrf.mxu3  ;;  %v2121_v38 = vmax.f32 %v1543_v61, %v1544_v51  ;;  %v1041_v51 = vadd.f32 %v5043_v37, %v5223_v48 }
 0x283   : > { %v1371_v14 = vadd.f32 %v1370_v59, %v5250_v5 }
 0x284   : > { %v1537_v20 = vmax.f32 %v1258_v28, 0.0  ;;  %v1151_v28 = vadd.f32 %v5029_v9, %v5225_v13 }
 0x285   : > { %v1538_v30 = vmax.f32 %v1371_v14, 0.0  ;;  %v5510_v14 = vpop.f32.mrf.mxu0 }
 0x286   : > { %v2152_v49 = vmax.f32 %v2120_v25, %v1537_v20  ;;  %3682 = vmatmul.msk.f32.gmra.mxu2 %vm426_vm0, %v3935_v27  ;;  %1923 = vmatmul.f32.gmra.mxu0 %v5227_v26  ;;  %v5515_v20 = vpop.f32.mrf.mxu1 }
 0x287   : > { %3714 = vmatmul.msk.f32.gmra.mxu3 %vm426_vm0, %v3935_v27  ;;  %2036 = vmatmul.f32.gmra.mxu1 %v5227_v26  ;;  %v1038_v26 = vadd.f32 %v5023_v31, %v5223_v48 }
 0x288   : > { %v5502_v12 = vmax.f32 %v2152_v49, %v1538_v30  ;;  %v1552_v49 = vmax.f32 %v1151_v28, 0.0 }
 0x289   : > { %v1260_v21 = vpop.f32.mrf.mxu2  ;;  %v1551_v31 = vmax.f32 %v1038_v26, 0.0 }
 0x28a   : > { %v1261_v6 = vadd.f32 %v1260_v21, %v5241_v1  ;;  %v1373_v52 = vpop.f32.mrf.mxu3  ;;  %v1154_v21 = vadd.f32 %v5047_v18, %v5225_v13 }
 0x28b   : > { %v1374_v4 = vadd.f32 %v1373_v52, %v5250_v5  ;;  %v2122_v61 = vmax.f32 %v1551_v31, %v1552_v49  ;;  %v6586_v49 = vld [vmem:[#allocation20_spill] sm:$0xff] }
 0x28c   : > { %v1545_v59 = vmax.f32 %v1261_v6, 0.0  ;;  %v1560_v26 = vmax.f32 %v1154_v21, 0.0 }
 0x28d   : > { %v1546_v58 = vmax.f32 %v1374_v4, 0.0  ;;  %v2595_v4 = vld [vmem:[%s6523_s5 + $0x30] sm:$0xff] }
 0x28e   : > { %v2153_v25 = vmax.f32 %v2121_v38, %v1545_v59  ;;  %3683 = vmatmul.msk.f32.gmra.mxu2 %vm426_vm0, %v3936_v63  ;;  %1926 = vmatmul.f32.gmra.mxu0 %v5252_v40  ;;  %v1559_v38 = vmax.f32 %v1041_v51, 0.0 }
 0x28f   : > { %3715 = vmatmul.msk.f32.gmra.mxu3 %vm426_vm0, %v3936_v63  ;;  %2039 = vmatmul.f32.gmra.mxu1 %v5252_v40  ;;  %v6585_v63 = vld [vmem:[#allocation19_spill] sm:$0xff] }
 0x290   : > { %v5519_v30 = vmax.f32 %v2153_v25, %v1546_v58  ;;  %2618 = vmatpush.msrb.mxu0 %v2595_v4  ;;  %v2123_v58 = vmax.f32 %v1559_v38, %v1560_v26  ;;  %v1044_v31 = vadd.f32 %v6585_v63, %v5223_v48  ;;  %v6587_v26 = vld [vmem:[#allocation21_spill] sm:$0xff]  ;;  %v2594_v63 = vld [vmem:[%s6523_s5 + $0x28] sm:$0xff] }
 0x291   : > { %v1263_v9 = vpop.f32.mrf.mxu2 }
 0x292   : > { %v1264_v27 = vadd.f32 %v1263_v9, %v5241_v1  ;;  %v1376_v8 = vpop.f32.mrf.mxu3  ;;  %v1157_v9 = vadd.f32 %v6586_v49, %v5225_v13  ;;  %2619 = vmatpush.msrb.mxu0 %v2594_v63 }
 0x293   : > { %v1377_v16 = vadd.f32 %v1376_v8, %v5250_v5 }
 0x294   : > { %v1553_v6 = vmax.f32 %v1264_v27, 0.0  ;;  %v1568_v51 = vmax.f32 %v1157_v9, 0.0 }
 0x295   : > { %v1554_v40 = vmax.f32 %v1377_v16, 0.0  ;;  %v2762_v16 = vld [vmem:[%s6525_s7 + $0x40] sm:$0xff] }
 0x296   : > { %v2154_v52 = vmax.f32 %v2122_v61, %v1553_v6  ;;  %2219 = vmatmul.f32.vlgmr.msrb.gmra.mxu2 %v5267_v62  ;;  %v1567_v61 = vmax.f32 %v1044_v31, 0.0  ;;  %2872 = vmatpush.msrb.mxu1 %v2762_v16 }
 0x297   : > { %2332 = vmatmul.f32.vlgmr.msrb.gmra.mxu3 %v5267_v62 }
 0x298   : > { %v5532_v28 = vmax.f32 %v2154_v52, %v1554_v40  ;;  %v2124_v38 = vmax.f32 %v1567_v61, %v1568_v51  ;;  %v6589_v51 = vld [vmem:[#allocation2_spill] sm:$0xff] }
 0x299   : > { %v1266_v37 = vpop.f32.mrf.mxu2 }
 0x29a   : > { %v1267_v59 = vadd.f32 %v1266_v37, %v5241_v1  ;;  %v1379_v18 = vpop.f32.mrf.mxu3  ;;  %v1047_v37 = vadd.f32 %v6587_v26, %v5223_v48 }
 0x29b   : > { %v1380_v25 = vadd.f32 %v1379_v18, %v5250_v5 }
 0x29c   : > { %v1561_v27 = vmax.f32 %v1267_v59, 0.0  ;;  %v1575_v31 = vmax.f32 %v1047_v37, 0.0 }
 0x29d   : > { %v1562_v8 = vmax.f32 %v1380_v25, 0.0 }
 0x29e   : > { %v2155_v62 = vmax.f32 %v2123_v58, %v1561_v27  ;;  %2222 = vmatmul.f32.gmra.mxu2 %v5285_v24 }
 0x29f   : > { %2335 = vmatmul.f32.gmra.mxu3 %v5285_v24  ;;  %v6588_v24 = vld [vmem:[#allocation22_spill] sm:$0xff] }
 0x2a0   : > { %v5545_v21 = vmax.f32 %v2155_v62, %v1562_v8  ;;  %v1160_v59 = vadd.f32 %v6588_v24, %v5225_v13 }
 0x2a1   : > { %v1269_v6 = vpop.f32.mrf.mxu2 }
 0x2a2   : > { %v1270_v52 = vadd.f32 %v1269_v6, %v5241_v1  ;;  %v1382_v40 = vpop.f32.mrf.mxu3  ;;  %v1576_v49 = vmax.f32 %v1160_v59, 0.0  ;;  %v1050_v6 = vadd.f32 %v6589_v51, %v5223_v48  ;;  %v2593_v51 = vld [vmem:[%s6523_s5 + $0x20] sm:$0xff] }
 0x2a3   : > { %v1383_v4 = vadd.f32 %v1382_v40, %v5250_v5  ;;  %2620 = vmatpush.msrb.mxu0 %v2593_v51 }
 0x2a4   : > { %v1569_v18 = vmax.f32 %v1270_v52, 0.0  ;;  %v2125_v61 = vmax.f32 %v1575_v31, %v1576_v49  ;;  %v6590_v52 = vld [vmem:[#allocation3_spill] sm:$0xff]  ;;  %v1583_v26 = vmax.f32 %v1050_v6, 0.0  ;;  %v6591_v49 = vld [vmem:[#allocation4_spill] sm:$0xff]  ;;  %v2761_v6 = vld [vmem:[%s6525_s7 + $0x38] sm:$0xff] }
 0x2a5   : > { %v1570_v58 = vmax.f32 %v1383_v4, 0.0  ;;  %v1163_v40 = vadd.f32 %v6590_v52, %v5225_v13  ;;  %2873 = vmatpush.msrb.mxu1 %v2761_v6 }
 0x2a6   : > { %v2156_v25 = vmax.f32 %v2124_v38, %v1569_v18  ;;  %2225 = vmatmul.f32.gmra.mxu2 %v5302_v44  ;;  %v5570_v18 = vpop.f32.mrf.mxu0 }
 0x2a7   : > { %2338 = vmatmul.f32.gmra.mxu3 %v5302_v44  ;;  %v1584_v37 = vmax.f32 %v1163_v40, 0.0 }
 0x2a8   : > { %v5558_v9 = vmax.f32 %v2156_v25, %v1570_v58 }
 0x2a9   : > { %v1272_v27 = vpop.f32.mrf.mxu2  ;;  %v2126_v31 = vmax.f32 %v1583_v26, %v1584_v37 }
 0x2aa   : > { %v1273_v62 = vadd.f32 %v1272_v27, %v5241_v1  ;;  %v1385_v8 = vpop.f32.mrf.mxu3  ;;  %v1053_v27 = vadd.f32 %v6591_v49, %v5223_v48 }
 0x2ab   : > { %v1386_v16 = vadd.f32 %v1385_v8, %v5250_v5 }
 0x2ac   : > { %v1577_v4 = vmax.f32 %v1273_v62, 0.0  ;;  %v6592_v62 = vld [vmem:[#allocation23_spill] sm:$0xff]  ;;  %v1591_v52 = vmax.f32 %v1053_v27, 0.0 }
 0x2ad   : > { %v1578_v38 = vmax.f32 %v1386_v16, 0.0  ;;  %v1166_v8 = vadd.f32 %v6592_v62, %v5225_v13 }
 0x2ae   : > { %v2157_v44 = vmax.f32 %v2125_v61, %v1577_v4  ;;  %2228 = vmatmul.f32.gmra.mxu2 %v5322_v46 }
 0x2af   : > { %2341 = vmatmul.f32.gmra.mxu3 %v5322_v46  ;;  %v1592_v40 = vmax.f32 %v1166_v8, 0.0 }
 0x2b0   : > { %v5568_v24 = vmax.f32 %v2157_v44, %v1578_v38 }
 0x2b1   : > { %v1275_v59 = vpop.f32.mrf.mxu2 }
 0x2b2   : > { %v1276_v25 = vadd.f32 %v1275_v59, %v5241_v1  ;;  %v1388_v58 = vpop.f32.mrf.mxu3  ;;  %v2127_v59 = vmax.f32 %v1591_v52, %v1592_v40 }
 0x2b3   : > { %v1389_v63 = vadd.f32 %v1388_v58, %v5250_v5  ;;  %v6594_v58 = vld [vmem:[#allocation24_spill] sm:$0xff] }
 0x2b4   : > { %v1585_v46 = vmax.f32 %v1276_v25, 0.0  ;;  %v6593_v25 = vld [vmem:[#allocation5_spill] sm:$0xff] }
 0x2b5   : > { %v1586_v61 = vmax.f32 %v1389_v63, 0.0  ;;  %v1169_v63 = vadd.f32 %v6594_v58, %v5225_v13  ;;  %v2592_v58 = vld [vmem:[%s6523_s5 + $0x18] sm:$0xff] }
 0x2b6   : > { %v2158_v16 = vmax.f32 %v2126_v31, %v1585_v46  ;;  %2231 = vmatmul.f32.gmra.mxu2 %v5339_v41  ;;  %v5594_v31 = vpop.f32.mrf.mxu0  ;;  %2621 = vmatpush.msrb.mxu0 %v2592_v58 }
 0x2b7   : > { %2344 = vmatmul.f32.gmra.mxu3 %v5339_v41  ;;  %v1056_v41 = vadd.f32 %v6593_v25, %v5223_v48  ;;  %v1600_v46 = vmax.f32 %v1169_v63, 0.0 }
 0x2b8   : > { %v5586_v4 = vmax.f32 %v2158_v16, %v1586_v61 }
 0x2b9   : > { %v1278_v44 = vpop.f32.mrf.mxu2  ;;  %v1599_v8 = vmax.f32 %v1056_v41, 0.0 }
 0x2ba   : > { %v1279_v38 = vadd.f32 %v1278_v44, %v5241_v1  ;;  %v1391_v26 = vpop.f32.mrf.mxu3  ;;  %v6595_v44 = vld [vmem:[#allocation6_spill] sm:$0xff] }
 0x2bb   : > { %v1392_v37 = vadd.f32 %v1391_v26, %v5250_v5  ;;  %v2128_v40 = vmax.f32 %v1599_v8, %v1600_v46  ;;  %v6596_v26 = vld [vmem:[#allocation25_spill] sm:$0xff] }
 0x2bc   : > { %v1593_v49 = vmax.f32 %v1279_v38, 0.0  ;;  %v1059_v38 = vadd.f32 %v6595_v44, %v5223_v48 }
 0x2bd   : > { %v1594_v62 = vmax.f32 %v1392_v37, 0.0  ;;  %v1172_v37 = vadd.f32 %v6596_v26, %v5225_v13 }
 0x2be   : > { %v2159_v27 = vmax.f32 %v2127_v59, %v1593_v49  ;;  %2234 = vmatmul.f32.gmra.mxu2 %v5357_v17  ;;  %v5606_v25 = vpop.f32.mrf.mxu0  ;;  %v1607_v63 = vmax.f32 %v1059_v38, 0.0 }
 0x2bf   : > { %2347 = vmatmul.f32.gmra.mxu3 %v5357_v17  ;;  %v1608_v49 = vmax.f32 %v1172_v37, 0.0 }
 0x2c0   : > { %v5598_v16 = vmax.f32 %v2159_v27, %v1594_v62 }
 0x2c1   : > { %v1281_v61 = vpop.f32.mrf.mxu2 }
 0x2c2   : > { %v1282_v51 = vadd.f32 %v1281_v61, %v5241_v1  ;;  %v1394_v6 = vpop.f32.mrf.mxu3 }
 0x2c3   : > { %v1395_v52 = vadd.f32 %v1394_v6, %v5250_v5  ;;  %v6597_v6 = vld [vmem:[#allocation7_spill] sm:$0xff] }
 0x2c4   : > { %v1601_v59 = vmax.f32 %v1282_v51, 0.0  ;;  %v2129_v51 = vmax.f32 %v1607_v63, %v1608_v49 }
 0x2c5   : > { %v1602_v41 = vmax.f32 %v1395_v52, 0.0  ;;  %v1062_v52 = vadd.f32 %v6597_v6, %v5223_v48 }
 0x2c6   : > { %v2160_v17 = vmax.f32 %v2128_v40, %v1601_v59  ;;  %2237 = vmatmul.f32.gmra.mxu2 %v5372_v54  ;;  %v6598_v40 = vld [vmem:[#allocation8_spill] sm:$0xff] }
 0x2c7   : > { %2350 = vmatmul.f32.gmra.mxu3 %v5372_v54  ;;  %v1175_v44 = vadd.f32 %v6598_v40, %v5225_v13  ;;  %v1615_v38 = vmax.f32 %v1062_v52, 0.0 }
 0x2c8   : > { %v5613_v27 = vmax.f32 %v2160_v17, %v1602_v41  ;;  %v5623_v17 = vpop.f32.mrf.mxu0 }
 0x2c9   : > { %v1284_v62 = vpop.f32.mrf.mxu2  ;;  %v1616_v37 = vmax.f32 %v1175_v44, 0.0  ;;  %v2760_v44 = vld [vmem:[%s6525_s7 + $0x30] sm:$0xff] }
 0x2ca   : > { %v1285_v8 = vadd.f32 %v1284_v62, %v5241_v1  ;;  %v1397_v46 = vpop.f32.mrf.mxu3  ;;  %2874 = vmatpush.msrb.mxu1 %v2760_v44 }
 0x2cb   : > { %v1398_v61 = vadd.f32 %v1397_v46, %v5250_v5  ;;  %v2130_v46 = vmax.f32 %v1615_v38, %v1616_v37 }
 0x2cc   : > { %v1609_v26 = vmax.f32 %v1285_v8, 0.0  ;;  %v6599_v8 = vld [vmem:[#allocation9_spill] sm:$0xff] }
 0x2cd   : > { %v1610_v59 = vmax.f32 %v1398_v61, 0.0  ;;  %v1065_v61 = vadd.f32 %v6599_v8, %v5223_v48  ;;  %v6602_v8 = vld [vmem:[#allocation10_spill] sm:$0xff] }
 0x2ce   : > { %v2161_v54 = vmax.f32 %v2129_v51, %v1609_v26  ;;  %2240 = vmatmul.f32.gmra.mxu2 %v5392_v60  ;;  %v6600_v51 = vld [vmem:[#allocation26_spill] sm:$0xff]  ;;  %v2591_v26 = vld [vmem:[%s6523_s5 + $0x10] sm:$0xff] }
 0x2cf   : > { %2353 = vmatmul.f32.gmra.mxu3 %v5392_v60  ;;  %v1178_v6 = vadd.f32 %v6600_v51, %v5225_v13  ;;  %2622 = vmatpush.msrb.mxu0 %v2591_v26  ;;  %v1068_v51 = vadd.f32 %v6602_v8, %v5223_v48 }
 0x2d0   : > { %v5625_v41 = vmax.f32 %v2161_v54, %v1610_v59  ;;  %v1623_v54 = vmax.f32 %v1065_v61, 0.0 }
 0x2d1   : > { %v1287_v58 = vpop.f32.mrf.mxu2  ;;  %v1624_v59 = vmax.f32 %v1178_v6, 0.0 }
 0x2d2   : > { %v1288_v63 = vadd.f32 %v1287_v58, %v5241_v1  ;;  %v1400_v49 = vpop.f32.mrf.mxu3  ;;  %v5643_v58 = vpop.f32.mrf.mxu0 }
 0x2d3   : > { %v1401_v62 = vadd.f32 %v1400_v49, %v5250_v5  ;;  %6601 = vst [vmem:[#allocation15_spill] sm:$0xff] %v5643_v58 }
 0x2d4   : > { %v1617_v60 = vmax.f32 %v1288_v63, 0.0 }
 0x2d5   : > { %v1618_v40 = vmax.f32 %v1401_v62, 0.0 }
 0x2d6   : > { %v2162_v52 = vmax.f32 %v2130_v46, %v1617_v60  ;;  %2243 = vmatmul.f32.gmra.mxu2 %v5409_v35  ;;  %v2131_v46 = vmax.f32 %v1623_v54, %v1624_v59 }
 0x2d7   : > { %2356 = vmatmul.f32.gmra.mxu3 %v5409_v35  ;;  %v6603_v35 = vld [vmem:[#allocation27_spill] sm:$0xff] }
 0x2d8   : > { %v5641_v38 = vmax.f32 %v2162_v52, %v1618_v40  ;;  %v1181_v60 = vadd.f32 %v6603_v35, %v5225_v13  ;;  %v1631_v52 = vmax.f32 %v1068_v51, 0.0  ;;  %v6604_v35 = vld [vmem:[#allocation11_spill] sm:$0xff] }
 0x2d9   : > { %v1290_v37 = vpop.f32.mrf.mxu2 }
 0x2da   : > { %v1291_v63 = vadd.f32 %v1290_v37, %v5241_v1  ;;  %v1403_v49 = vpop.f32.mrf.mxu3  ;;  %v1632_v40 = vmax.f32 %v1181_v60, 0.0 }
 0x2db   : > { %v1404_v62 = vadd.f32 %v1403_v49, %v5250_v5 }
 0x2dc   : > { %v1625_v61 = vmax.f32 %v1291_v63, 0.0  ;;  %v2132_v8 = vmax.f32 %v1631_v52, %v1632_v40  ;;  %v1071_v63 = vadd.f32 %v6604_v35, %v5223_v48 }
 0x2dd   : > { %v1626_v44 = vmax.f32 %v1404_v62, 0.0  ;;  %v6605_v62 = vld [vmem:[#allocation28_spill] sm:$0xff] }
 0x2de   : > { %v2163_v6 = vmax.f32 %v2131_v46, %v1625_v61  ;;  %2246 = vmatmul.f32.gmra.mxu2 %v5429_v34  ;;  %v1184_v46 = vadd.f32 %v6605_v62, %v5225_v13  ;;  %v5661_v61 = vpop.f32.mrf.mxu0 }
 0x2df   : > { %2359 = vmatmul.f32.gmra.mxu3 %v5429_v34  ;;  %6606 = vst [vmem:[#allocation16_spill] sm:$0xff] %v5661_v61 }
 0x2e0   : > { %v5653_v26 = vmax.f32 %v2163_v6, %v1626_v44  ;;  %v2590_v6 = vld [vmem:[%s6523_s5 + $0x8] sm:$0xff]  ;;  %v1639_v44 = vmax.f32 %v1071_v63, 0.0  ;;  %v1640_v52 = vmax.f32 %v1184_v46, 0.0 }
 0x2e1   : > { %v1293_v37 = vpop.f32.mrf.mxu2  ;;  %2623 = vmatpush.msrb.mxu0 %v2590_v6 }
 0x2e2   : > { %v1294_v54 = vadd.f32 %v1293_v37, %v5241_v1  ;;  %v1406_v59 = vpop.f32.mrf.mxu3 }
 0x2e3   : > { %v1407_v49 = vadd.f32 %v1406_v59, %v5250_v5 }
 0x2e4   : > { %v1633_v34 = vmax.f32 %v1294_v54, 0.0 }
 0x2e5   : > { %v1634_v60 = vmax.f32 %v1407_v49, 0.0  ;;  %v2133_v49 = vmax.f32 %v1639_v44, %v1640_v52 }
 0x2e6   : > { %v2164_v51 = vmax.f32 %v2132_v8, %v1633_v34  ;;  %2249 = vmatmul.f32.gmra.mxu2 %v5444_v56  ;;  %v6607_v8 = vld [vmem:[#allocation12_spill] sm:$0xff]  ;;  %v6608_v34 = vld [vmem:[#allocation13_spill] sm:$0xff] }
 0x2e7   : > { %2362 = vmatmul.f32.gmra.mxu3 %v5444_v56  ;;  %v1074_v62 = vadd.f32 %v6607_v8, %v5223_v48  ;;  %v1187_v61 = vadd.f32 %v6608_v34, %v5225_v13  ;;  %v5676_v56 = vpop.f32.mrf.mxu0 }
 0x2e8   : > { %v5668_v40 = vmax.f32 %v2164_v51, %v1634_v60  ;;  %v2759_v51 = vld [vmem:[%s6525_s7 + $0x28] sm:$0xff] }
 0x2e9   : > { %v1296_v37 = vpop.f32.mrf.mxu2  ;;  %v1647_v60 = vmax.f32 %v1074_v62, 0.0  ;;  %v1648_v6 = vmax.f32 %v1187_v61, 0.0  ;;  %2875 = vmatpush.msrb.mxu1 %v2759_v51  ;;  %v2589_v61 = vld [vmem:[%s6523_s5] sm:$0xff] }
 0x2ea   : > { %v1297_v59 = vadd.f32 %v1296_v37, %v5241_v1  ;;  %v1409_v35 = vpop.f32.mrf.mxu3  ;;  %2624 = vmatpush.msrb.mxu0 %v2589_v61 }
 0x2eb   : > { %v1410_v54 = vadd.f32 %v1409_v35, %v5250_v5  ;;  %v2134_v35 = vmax.f32 %v1647_v60, %v1648_v6 }
 0x2ec   : > { %v1641_v58 = vmax.f32 %v1297_v59, 0.0 }
 0x2ed   : > { %v1642_v46 = vmax.f32 %v1410_v54, 0.0  ;;  %v1077_v54 = vadd.f32 %v5265_v7, %v5223_v48 }
 0x2ee   : > { %v2165_v63 = vmax.f32 %v2133_v49, %v1641_v58  ;;  %2252 = vmatmul.f32.gmra.mxu2 %v5462_v2 }
 0x2ef   : > { %2365 = vmatmul.f32.gmra.mxu3 %v5462_v2  ;;  %v1190_v2 = vadd.f32 %v5269_v0, %v5225_v13  ;;  %v1655_v34 = vmax.f32 %v1077_v54, 0.0 }
 0x2f0   : > { %v5683_v44 = vmax.f32 %v2165_v63, %v1642_v46  ;;  %v5696_v46 = vpop.f32.mrf.mxu0 }
 0x2f1   : > { %v1299_v52 = vpop.f32.mrf.mxu2  ;;  %v1656_v63 = vmax.f32 %v1190_v2, 0.0 }
 0x2f2   : > { %v1300_v37 = vadd.f32 %v1299_v52, %v5241_v1  ;;  %v1412_v59 = vpop.f32.mrf.mxu3 }
 0x2f3   : > { %v1413_v58 = vadd.f32 %v1412_v59, %v5250_v5  ;;  %v2135_v52 = vmax.f32 %v1655_v34, %v1656_v63  ;;  %v1083_v63 = vadd.f32 %v5310_v53, %v5223_v48 }
 0x2f4   : > { %v1649_v49 = vmax.f32 %v1300_v37, 0.0  ;;  %v1080_v37 = vadd.f32 %v5287_v10, %v5223_v48 }
 0x2f5   : > { %v1650_v62 = vmax.f32 %v1413_v58, 0.0 }
 0x2f6   : > { %v2166_v8 = vmax.f32 %v2134_v35, %v1649_v49  ;;  %2255 = vmatmul.f32.gmra.mxu2 %v5479_v22  ;;  %v1663_v54 = vmax.f32 %v1080_v37, 0.0  ;;  %v1671_v37 = vmax.f32 %v1083_v63, 0.0 }
 0x2f7   : > { %2368 = vmatmul.f32.gmra.mxu3 %v5479_v22  ;;  %v1193_v22 = vadd.f32 %v5290_v33, %v5225_v13 }
 0x2f8   : > { %v5698_v7 = vmax.f32 %v2166_v8, %v1650_v62  ;;  %v5710_v62 = vpop.f32.mrf.mxu0 }
 0x2f9   : > { %v1302_v51 = vpop.f32.mrf.mxu2  ;;  %v1664_v2 = vmax.f32 %v1193_v22, 0.0 }
 0x2fa   : > { %v1303_v0 = vadd.f32 %v1302_v51, %v5241_v1  ;;  %v1415_v60 = vpop.f32.mrf.mxu3  ;;  %v6609_v51 = vld [vmem:[#allocation14_spill] sm:$0xff] }
 0x2fb   : > { %v1416_v6 = vadd.f32 %v1415_v60, %v5250_v5  ;;  %v2136_v33 = vmax.f32 %v1663_v54, %v1664_v2 }
 0x2fc   : > { %v1657_v59 = vmax.f32 %v1303_v0, 0.0  ;;  %v1196_v0 = vadd.f32 %v6609_v51, %v5225_v13 }
 0x2fd   : > { %v1658_v35 = vmax.f32 %v1416_v6, 0.0 }
 0x2fe   : > { %v2167_v58 = vmax.f32 %v2135_v52, %v1657_v59  ;;  %2258 = vmatmul.f32.gmra.mxu2 %v5502_v12  ;;  %v2758_v52 = vld [vmem:[%s6525_s7 + $0x20] sm:$0xff]  ;;  %v1672_v22 = vmax.f32 %v1196_v0, 0.0 }
 0x2ff   : > { %2371 = vmatmul.f32.gmra.mxu3 %v5502_v12  ;;  %2876 = vmatpush.msrb.mxu1 %v2758_v52 }
 0x300   : > { %v5708_v49 = vmax.f32 %v2167_v58, %v1658_v35  ;;  %v2137_v2 = vmax.f32 %v1671_v37, %v1672_v22 }
 0x301   : > { %v1305_v8 = vpop.f32.mrf.mxu2 }
 0x302   : > { %v1306_v61 = vadd.f32 %v1305_v8, %v5241_v1  ;;  %v1418_v10 = vpop.f32.mrf.mxu3  ;;  %v1086_v8 = vadd.f32 %v5330_v47, %v5223_v48  ;;  %v1683_v48 = vld [vmem:[%s6522_s4] sm:$0x3] }
 0x303   : > { %v1419_v34 = vadd.f32 %v1418_v10, %v5250_v5  ;;  %v5744_v37 = vperm.slane %v1683_v48, 1 }
 0x304   : > { %v1665_v12 = vmax.f32 %v1306_v61, 0.0  ;;  %v5731_v61 = vpop.f32.mrf.mxu0  ;;  %v1679_v63 = vmax.f32 %v1086_v8, 0.0 }
 0x305   : > { %v1666_v6 = vmax.f32 %v1419_v34, 0.0 }
 0x306   : > { %v2168_v60 = vmax.f32 %v2136_v33, %v1665_v12  ;;  %2261 = vmatmul.f32.gmra.mxu2 %v5519_v30 }
 0x307   : > { %2374 = vmatmul.f32.gmra.mxu3 %v5519_v30  ;;  %v1199_v30 = vadd.f32 %v5335_v39, %v5225_v13 }
 0x308   : > { %v5723_v59 = vmax.f32 %v2168_v60, %v1666_v6  ;;  %v5742_v6 = vperm.slane %v1683_v48, 0  ;;  %v1951_v48 = vadd.f32 %v5377_v3, %v5744_v37 }
 0x309   : > { %v1308_v53 = vpop.f32.mrf.mxu2  ;;  %v1680_v51 = vmax.f32 %v1199_v30, 0.0 }
 0x30a   : > { %v1309_v58 = vadd.f32 %v1308_v53, %v5241_v1  ;;  %v1421_v35 = vpop.f32.mrf.mxu3  ;;  %v1841_v3 = vadd.f32 %v5400_v29, %v5742_v6 }
 0x30b   : > { %v1422_v54 = vadd.f32 %v1421_v35, %v5250_v5  ;;  %v2138_v60 = vmax.f32 %v1679_v63, %v1680_v51 }
 0x30c   : > { %v1673_v10 = vmax.f32 %v1309_v58, 0.0 }
 0x30d   : > { %v1674_v33 = vmax.f32 %v1422_v54, 0.0 }
 0x30e   : > { %v2169_v34 = vmax.f32 %v2137_v2, %v1673_v10  ;;  %2264 = vmatmul.f32.gmra.mxu2 %v5532_v28 }
 0x30f   : > { %2377 = vmatmul.f32.gmra.mxu3 %v5532_v28  ;;  %v5746_v28 = vpop.f32.mrf.mxu0 }
 0x310   : > { %v5735_v0 = vmax.f32 %v2169_v34, %v1674_v33 }
 0x311   : > { %v1311_v47 = vpop.f32.mrf.mxu2 }
 0x312   : > { %v1312_v13 = vadd.f32 %v1311_v47, %v5241_v1  ;;  %v1424_v39 = vpop.f32.mrf.mxu3  ;;  %v1835_v1 = vadd.f32 %v5355_v19, %v5742_v6  ;;  %v2757_v19 = vld [vmem:[%s6525_s7 + $0x18] sm:$0xff] }
 0x313   : > { %v1425_v12 = vadd.f32 %v1424_v39, %v5250_v5  ;;  %v1948_v5 = vadd.f32 %v5359_v45, %v5744_v37  ;;  %v1838_v45 = vadd.f32 %v5374_v50, %v5742_v6  ;;  %2877 = vmatpush.msrb.mxu1 %v2757_v19 }
 0x314   : > { %v1681_v52 = vmax.f32 %v1312_v13, 0.0  ;;  %v2043_v30 = vmax.f32 %v1835_v1, 0.0 }
 0x315   : > { %v1682_v53 = vmax.f32 %v1425_v12, 0.0  ;;  %v2044_v34 = vmax.f32 %v1948_v5, 0.0  ;;  %v5775_v5 = vpop.f32.mrf.mxu1 }
 0x316   : > { %v2170_v22 = vmax.f32 %v2138_v60, %v1681_v52  ;;  %2267 = vmatmul.f32.gmra.mxu2 %v5545_v21  ;;  %v2045_v60 = vmax.f32 %v1838_v45, 0.0  ;;  %v1957_v45 = vadd.f32 %v5425_v43, %v5744_v37 }
 0x317   : > { %2380 = vmatmul.f32.gmra.mxu3 %v5545_v21  ;;  %v5765_v51 = vpop.f32.mrf.mxu0 }
 0x318   : > { %v5752_v58 = vmax.f32 %v2170_v22, %v1682_v53  ;;  %v2046_v22 = vmax.f32 %v1951_v48, 0.0 }
 0x319   : > { %v2220_v35 = vpop.f32.mrf.mxu2 }
 0x31a   : > { %v2221_v54 = vadd.f32 %v2220_v35, %v5742_v6  ;;  %v2333_v2 = vpop.f32.mrf.mxu3  ;;  %v1954_v35 = vadd.f32 %v5402_v32, %v5744_v37  ;;  %v1844_v32 = vadd.f32 %v5417_v57, %v5742_v6 }
 0x31b   : > { %v2334_v8 = vadd.f32 %v2333_v2, %v5744_v37 }
 0x31c   : > { %v2429_v10 = vmax.f32 %v2221_v54, 0.0 }
 0x31d   : > { %v2430_v33 = vmax.f32 %v2334_v8, 0.0 }
 0x31e   : > { %v2493_v63 = vmax.f32 %v2043_v30, %v2429_v10  ;;  %2270 = vmatmul.f32.gmra.mxu2 %v5558_v9 }
 0x31f   : > { %v2494_v21 = vmax.f32 %v2044_v34, %v2430_v33  ;;  %2383 = vmatmul.f32.gmra.mxu3 %v5558_v9  ;;  %v5779_v8 = vpop.f32.mrf.mxu0  ;;  %v2047_v33 = vmax.f32 %v1841_v3, 0.0  ;;  %v1960_v3 = vadd.f32 %v5446_v23, %v5744_v37 }
 0x321   : > { %v2557_v47 = vmax.f32 %v2493_v63, %v2494_v21  ;;  %v2223_v13 = vpop.f32.mrf.mxu2  ;;  %v2048_v63 = vmax.f32 %v1954_v35, 0.0 }
 0x322   : > { %v2224_v39 = vadd.f32 %v2223_v13, %v5742_v6  ;;  %v2336_v12 = vpop.f32.mrf.mxu3  ;;  %v5789_v13 = vpop.f32.mrf.mxu1 }
 0x323   : > { %v2337_v9 = vadd.f32 %v2336_v12, %v5744_v37  ;;  %2625 = vmatmul.f32.vlgmr.msrb.gmra.mxu0 %v2557_v47 }
 0x324   : > { %v2431_v52 = vmax.f32 %v2224_v39, 0.0 }
 0x325   : > { %v2432_v53 = vmax.f32 %v2337_v9, 0.0 }
 0x326   : > { %v2495_v1 = vmax.f32 %v2045_v60, %v2431_v52  ;;  %2273 = vmatmul.f32.gmra.mxu2 %v5568_v24  ;;  %v2049_v60 = vmax.f32 %v1844_v32, 0.0 }
 0x327   : > { %v2496_v50 = vmax.f32 %v2046_v22, %v2432_v53  ;;  %2386 = vmatmul.f32.gmra.mxu3 %v5568_v24  ;;  %v5793_v52 = vpop.f32.mrf.mxu0  ;;  %v2050_v22 = vmax.f32 %v1957_v45, 0.0 }
 0x329   : > { %v2226_v54 = vpop.f32.mrf.mxu2  ;;  %v2558_v2 = vmax.f32 %v2495_v1, %v2496_v50  ;;  %v2756_v1 = vld [vmem:[%s6525_s7 + $0x10] sm:$0xff]  ;;  %v1847_v50 = vadd.f32 %v5442_v42, %v5742_v6 }
 0x32a   : > { %v2227_v30 = vadd.f32 %v2226_v54, %v5742_v6  ;;  %v2339_v10 = vpop.f32.mrf.mxu3  ;;  %2878 = vmatpush.msrb.mxu1 %v2756_v1 }
 0x32b   : > { %v2340_v34 = vadd.f32 %v2339_v10, %v5744_v37  ;;  %2628 = vmatmul.f32.gmra.mxu0 %v2558_v2 }
 0x32c   : > { %v2433_v24 = vmax.f32 %v2227_v30, 0.0 }
 0x32d   : > { %v2434_v21 = vmax.f32 %v2340_v34, 0.0  ;;  %v5806_v34 = vpop.f32.mrf.mxu1 }
 0x32e   : > { %v2497_v29 = vmax.f32 %v2047_v33, %v2433_v24  ;;  %2276 = vmatmul.f32.gmra.mxu2 %v5586_v4  ;;  %v2052_v24 = vmax.f32 %v1960_v3, 0.0 }
 0x32f   : > { %v2498_v19 = vmax.f32 %v2048_v63, %v2434_v21  ;;  %2389 = vmatmul.f32.gmra.mxu3 %v5586_v4  ;;  %v5808_v21 = vpop.f32.mrf.mxu0 }
 0x331   : > { %v2229_v48 = vpop.f32.mrf.mxu2  ;;  %v2559_v47 = vmax.f32 %v2497_v29, %v2498_v19  ;;  %v1850_v29 = vadd.f32 %v5464_v15, %v5742_v6  ;;  %v1963_v19 = vadd.f32 %v5467_v11, %v5744_v37  ;;  %v1853_v11 = vadd.f32 %v5487_v36, %v5742_v6 }
 0x332   : > { %v2230_v39 = vadd.f32 %v2229_v48, %v5742_v6  ;;  %v2342_v12 = vpop.f32.mrf.mxu3 }
 0x333   : > { %v2343_v9 = vadd.f32 %v2342_v12, %v5744_v37  ;;  %2631 = vmatmul.f32.gmra.mxu0 %v2559_v47  ;;  %v2053_v12 = vmax.f32 %v1850_v29, 0.0 }
 0x334   : > { %v2435_v4 = vmax.f32 %v2230_v39, 0.0 }
 0x335   : > { %v2436_v53 = vmax.f32 %v2343_v9, 0.0 }
 0x336   : > { %v2499_v57 = vmax.f32 %v2049_v60, %v2435_v4  ;;  %2279 = vmatmul.f32.gmra.mxu2 %v5598_v16  ;;  %v2054_v60 = vmax.f32 %v1963_v19, 0.0 }
 0x337   : > { %v2500_v43 = vmax.f32 %v2050_v22, %v2436_v53  ;;  %2392 = vmatmul.f32.gmra.mxu3 %v5598_v16  ;;  %v2051_v16 = vmax.f32 %v1847_v50, 0.0  ;;  %v5818_v22 = vpop.f32.mrf.mxu1  ;;  %v5824_v53 = vpop.f32.mrf.mxu0 }
 0x339   : > { %v2232_v35 = vpop.f32.mrf.mxu2  ;;  %v2560_v54 = vmax.f32 %v2499_v57, %v2500_v43  ;;  %v1966_v57 = vadd.f32 %v5489_v55, %v5744_v37  ;;  %v1856_v55 = vadd.f32 %v5510_v14, %v5742_v6 }
 0x33a   : > { %v2233_v2 = vadd.f32 %v2232_v35, %v5742_v6  ;;  %v2345_v30 = vpop.f32.mrf.mxu3 }
 0x33b   : > { %v2346_v10 = vadd.f32 %v2345_v30, %v5744_v37  ;;  %2634 = vmatmul.f32.gmra.mxu0 %v2560_v54  ;;  %v2055_v54 = vmax.f32 %v1853_v11, 0.0  ;;  %v2056_v30 = vmax.f32 %v1966_v57, 0.0 }
 0x33c   : > { %v2437_v33 = vmax.f32 %v2233_v2, 0.0 }
 0x33d   : > { %v2438_v63 = vmax.f32 %v2346_v10, 0.0 }
 0x33e   : > { %v2501_v42 = vmax.f32 %v2051_v16, %v2437_v33  ;;  %2282 = vmatmul.f32.gmra.mxu2 %v5613_v27  ;;  %v1969_v33 = vadd.f32 %v5515_v20, %v5744_v37  ;;  %v2755_v20 = vld [vmem:[%s6525_s7 + $0x8] sm:$0xff] }
 0x33f   : > { %v2502_v23 = vmax.f32 %v2052_v24, %v2438_v63  ;;  %2395 = vmatmul.f32.gmra.mxu3 %v5613_v27  ;;  %v5834_v16 = vpop.f32.mrf.mxu1  ;;  %2879 = vmatpush.msrb.mxu1 %v2755_v20 }
 0x341   : > { %v2235_v32 = vpop.f32.mrf.mxu2  ;;  %v2561_v45 = vmax.f32 %v2501_v42, %v2502_v23  ;;  %v5838_v42 = vpop.f32.mrf.mxu0 }
 0x342   : > { %v2236_v48 = vadd.f32 %v2235_v32, %v5742_v6  ;;  %v2348_v47 = vpop.f32.mrf.mxu3  ;;  %v2057_v32 = vmax.f32 %v1856_v55, 0.0 }
 0x343   : > { %v2349_v39 = vadd.f32 %v2348_v47, %v5744_v37  ;;  %2637 = vmatmul.f32.gmra.mxu0 %v2561_v45  ;;  %v2058_v45 = vmax.f32 %v1969_v33, 0.0 }
 0x344   : > { %v2439_v9 = vmax.f32 %v2236_v48, 0.0 }
 0x345   : > { %v2440_v4 = vmax.f32 %v2349_v39, 0.0  ;;  %v1859_v39 = vadd.f32 %v5570_v18, %v5742_v6 }
 0x346   : > { %v2503_v27 = vmax.f32 %v2053_v12, %v2439_v9  ;;  %2285 = vmatmul.f32.gmra.mxu2 %v5625_v41  ;;  %v1972_v12 = vadd.f32 %v5775_v5, %v5744_v37 }
 0x347   : > { %v2504_v15 = vmax.f32 %v2054_v60, %v2440_v4  ;;  %2398 = vmatmul.f32.gmra.mxu3 %v5625_v41  ;;  %v5851_v4 = vpop.f32.mrf.mxu1  ;;  %v2059_v11 = vmax.f32 %v1859_v39, 0.0 }
 0x349   : > { %v2238_v43 = vpop.f32.mrf.mxu2  ;;  %v2562_v1 = vmax.f32 %v2503_v27, %v2504_v15  ;;  %v5855_v57 = vpop.f32.mrf.mxu0 }
 0x34a   : > { %v2239_v50 = vadd.f32 %v2238_v43, %v5742_v6  ;;  %v2351_v3 = vpop.f32.mrf.mxu3 }
 0x34b   : > { %v2352_v35 = vadd.f32 %v2351_v3, %v5744_v37  ;;  %2640 = vmatmul.f32.gmra.mxu0 %v2562_v1  ;;  %v2060_v1 = vmax.f32 %v1972_v12, 0.0  ;;  %v1862_v3 = vadd.f32 %v5594_v31, %v5742_v6 }
 0x34c   : > { %v2441_v2 = vmax.f32 %v2239_v50, 0.0 }
 0x34d   : > { %v2442_v41 = vmax.f32 %v2352_v35, 0.0  ;;  %v1975_v35 = vadd.f32 %v5789_v13, %v5744_v37 }
 0x34e   : > { %v2505_v10 = vmax.f32 %v2055_v54, %v2441_v2  ;;  %2288 = vmatmul.f32.gmra.mxu2 %v5641_v38 }
 0x34f   : > { %v2506_v36 = vmax.f32 %v2056_v30, %v2442_v41  ;;  %2401 = vmatmul.f32.gmra.mxu3 %v5641_v38  ;;  %v5865_v55 = vpop.f32.mrf.mxu1 }
 0x351   : > { %v2241_v24 = vpop.f32.mrf.mxu2  ;;  %v2563_v63 = vmax.f32 %v2505_v10, %v2506_v36  ;;  %v2061_v36 = vmax.f32 %v1862_v3, 0.0 }
 0x352   : > { %v2242_v23 = vadd.f32 %v2241_v24, %v5742_v6  ;;  %v2354_v29 = vpop.f32.mrf.mxu3  ;;  %v2062_v24 = vmax.f32 %v1975_v35, 0.0 }
 0x353   : > { %v2355_v19 = vadd.f32 %v2354_v29, %v5744_v37  ;;  %2643 = vmatmul.f32.gmra.mxu0 %v2563_v63  ;;  %v5867_v63 = vpop.f32.mrf.mxu0  ;;  %v1978_v29 = vadd.f32 %v5806_v34, %v5744_v37  ;;  %v2754_v34 = vld [vmem:[%s6525_s7] sm:$0xff] }
 0x354   : > { %v2443_v38 = vmax.f32 %v2242_v23, 0.0  ;;  %v1865_v23 = vadd.f32 %v5606_v25, %v5742_v6  ;;  %2880 = vmatpush.msrb.mxu1 %v2754_v34 }
 0x355   : > { %v2444_v48 = vmax.f32 %v2355_v19, 0.0  ;;  %v2064_v20 = vmax.f32 %v1978_v29, 0.0 }
 0x356   : > { %v2507_v14 = vmax.f32 %v2057_v32, %v2443_v38  ;;  %2291 = vmatmul.f32.gmra.mxu2 %v5653_v26 }
 0x357   : > { %v2508_v47 = vmax.f32 %v2058_v45, %v2444_v48  ;;  %2404 = vmatmul.f32.gmra.mxu3 %v5653_v26  ;;  %v5877_v12 = vpop.f32.mrf.mxu1 }
 0x359   : > { %v2244_v9 = vpop.f32.mrf.mxu2  ;;  %v2564_v60 = vmax.f32 %v2507_v14, %v2508_v47  ;;  %v2063_v14 = vmax.f32 %v1865_v23, 0.0 }
 0x35a   : > { %v2245_v27 = vadd.f32 %v2244_v9, %v5742_v6  ;;  %v2357_v15 = vpop.f32.mrf.mxu3  ;;  %v1868_v9 = vadd.f32 %v5623_v17, %v5742_v6 }
 0x35b   : > { %v2358_v26 = vadd.f32 %v2357_v15, %v5744_v37  ;;  %2646 = vmatmul.f32.gmra.mxu0 %v2564_v60  ;;  %v5886_v60 = vpop.f32.mrf.mxu0 }
 0x35c   : > { %v2445_v43 = vmax.f32 %v2245_v27, 0.0  ;;  %v1981_v27 = vadd.f32 %v5818_v22, %v5744_v37  ;;  %v6610_v22 = vld [vmem:[#allocation15_spill] sm:$0xff] }
 0x35d   : > { %v2446_v18 = vmax.f32 %v2358_v26, 0.0  ;;  %v1871_v35 = vadd.f32 %v6610_v22, %v5742_v6 }
 0x35e   : > { %v2509_v50 = vmax.f32 %v2059_v11, %v2445_v43  ;;  %2294 = vmatmul.f32.gmra.mxu2 %v5668_v40 }
 0x35f   : > { %v2510_v5 = vmax.f32 %v2060_v1, %v2446_v18  ;;  %2407 = vmatmul.f32.gmra.mxu3 %v5668_v40  ;;  %v2065_v1 = vmax.f32 %v1868_v9, 0.0 }
 0x361   : > { %v2247_v54 = vpop.f32.mrf.mxu2  ;;  %v2565_v2 = vmax.f32 %v2509_v50, %v2510_v5  ;;  %v2066_v50 = vmax.f32 %v1981_v27, 0.0  ;;  %v1877_v27 = vadd.f32 %v5676_v56, %v5742_v6 }
 0x362   : > { %v2248_v30 = vadd.f32 %v2247_v54, %v5742_v6  ;;  %v2360_v41 = vpop.f32.mrf.mxu3  ;;  %v5896_v54 = vpop.f32.mrf.mxu1 }
 0x363   : > { %v2361_v10 = vadd.f32 %v2360_v41, %v5744_v37  ;;  %2649 = vmatmul.f32.gmra.mxu0 %v2565_v2  ;;  %v1984_v2 = vadd.f32 %v5834_v16, %v5744_v37  ;;  %v6611_v16 = vld [vmem:[#allocation16_spill] sm:$0xff] }
 0x364   : > { %v2447_v33 = vmax.f32 %v2248_v30, 0.0 }
 0x365   : > { %v2448_v40 = vmax.f32 %v2361_v10, 0.0  ;;  %v5900_v10 = vpop.f32.mrf.mxu0 }
 0x366   : > { %v2511_v31 = vmax.f32 %v2061_v36, %v2447_v33  ;;  %2297 = vmatmul.f32.gmra.mxu2 %v5683_v44 }
 0x367   : > { %v2512_v13 = vmax.f32 %v2062_v24, %v2448_v40  ;;  %2410 = vmatmul.f32.gmra.mxu3 %v5683_v44  ;;  %v2067_v40 = vmax.f32 %v1871_v35, 0.0  ;;  %v1993_v35 = vadd.f32 %v5877_v12, %v5744_v37  ;;  %v1996_v12 = vadd.f32 %v5896_v54, %v5744_v37 }
 0x368   : > { %v1886_v54 = vadd.f32 %v5731_v61, %v5742_v6 }
 0x369   : > { %v2250_v19 = vpop.f32.mrf.mxu2  ;;  %v2566_v32 = vmax.f32 %v2511_v31, %v2512_v13  ;;  %v2068_v31 = vmax.f32 %v1984_v2, 0.0 }
 0x36a   : > { %v2251_v38 = vadd.f32 %v2250_v19, %v5742_v6  ;;  %v2363_v45 = vpop.f32.mrf.mxu3  ;;  %v1874_v19 = vadd.f32 %v6611_v16, %v5742_v6 }
 0x36b   : > { %v2364_v48 = vadd.f32 %v2363_v45, %v5744_v37  ;;  %2652 = vmatmul.f32.gmra.mxu0 %v2566_v32  ;;  %v1987_v32 = vadd.f32 %v5851_v4, %v5744_v37 }
 0x36c   : > { %v2449_v47 = vmax.f32 %v2251_v38, 0.0 }
 0x36d   : > { %v2450_v39 = vmax.f32 %v2364_v48, 0.0  ;;  %v5910_v48 = vpop.f32.mrf.mxu1 }
 0x36e   : > { %v2513_v44 = vmax.f32 %v2063_v14, %v2449_v47  ;;  %2300 = vmatmul.f32.gmra.mxu2 %v5698_v7 }
 0x36f   : > { %v2514_v25 = vmax.f32 %v2064_v20, %v2450_v39  ;;  %2413 = vmatmul.f32.gmra.mxu3 %v5698_v7  ;;  %v2069_v39 = vmax.f32 %v1874_v19, 0.0 }
 0x371   : > { %v2253_v15 = vpop.f32.mrf.mxu2  ;;  %v2567_v26 = vmax.f32 %v2513_v44, %v2514_v25  ;;  %v5914_v44 = vpop.f32.mrf.mxu0  ;;  %v2070_v25 = vmax.f32 %v1987_v32, 0.0 }
 0x372   : > { %v2254_v11 = vadd.f32 %v2253_v15, %v5742_v6  ;;  %v2366_v43 = vpop.f32.mrf.mxu3  ;;  %v1990_v15 = vadd.f32 %v5865_v55, %v5744_v37  ;;  %v1880_v55 = vadd.f32 %v5696_v46, %v5742_v6  ;;  %v1883_v46 = vadd.f32 %v5710_v62, %v5742_v6  ;;  %v5945_v62 = vld [vmem:[%s6524_s6] ss:$0 sm:$0xff] }
 0x373   : > { %v2367_v7 = vadd.f32 %v2366_v43, %v5744_v37  ;;  %2655 = vmatmul.f32.gmra.mxu0 %v2567_v26 }
 0x374   : > { %v2451_v18 = vmax.f32 %v2254_v11, 0.0 }
 0x375   : > { %v2452_v5 = vmax.f32 %v2367_v7, 0.0 }
 0x376   : > { %v2515_v3 = vmax.f32 %v2065_v1, %v2451_v18  ;;  %2303 = vmatmul.f32.gmra.mxu2 %v5708_v49  ;;  %v2071_v18 = vmax.f32 %v1877_v27, 0.0 }
 0x377   : > { %v2516_v17 = vmax.f32 %v2066_v50, %v2452_v5  ;;  %2416 = vmatmul.f32.gmra.mxu3 %v5708_v49  ;;  %v2001_v50 = vpop.f32.mrf.mxu1 }
 0x379   : > { %v2256_v30 = vpop.f32.mrf.mxu2  ;;  %v2568_v41 = vmax.f32 %v2515_v3, %v2516_v17  ;;  %v2072_v3 = vmax.f32 %v1990_v15, 0.0 }
 0x37a   : > { %v2257_v36 = vadd.f32 %v2256_v30, %v5742_v6  ;;  %v2369_v33 = vpop.f32.mrf.mxu3 }
 0x37b   : > { %v2370_v24 = vadd.f32 %v2369_v33, %v5744_v37  ;;  %2658 = vmatmul.f32.gmra.mxu0 %v2568_v41 }
 0x37c   : > { %v2453_v49 = vmax.f32 %v2257_v36, 0.0 }
 0x37d   : > { %v2454_v13 = vmax.f32 %v2370_v24, 0.0  ;;  %v2073_v24 = vmax.f32 %v1880_v55, 0.0  ;;  %v2002_v55 = vadd.f32 %v2001_v50, %v5744_v37 }
 0x37e   : > { %v2517_v23 = vmax.f32 %v2067_v40, %v2453_v49  ;;  %2306 = vmatmul.f32.gmra.mxu2 %v5723_v59  ;;  %v2074_v49 = vmax.f32 %v1993_v35, 0.0 }
 0x37f   : > { %v2518_v29 = vmax.f32 %v2068_v31, %v2454_v13  ;;  %2419 = vmatmul.f32.gmra.mxu3 %v5723_v59  ;;  %v2004_v13 = vpop.f32.mrf.mxu1 }
 0x381   : > { %v2259_v38 = vpop.f32.mrf.mxu2  ;;  %v2569_v45 = vmax.f32 %v2517_v23, %v2518_v29 }
 0x382   : > { %v2260_v14 = vadd.f32 %v2259_v38, %v5742_v6  ;;  %v2372_v47 = vpop.f32.mrf.mxu3 }
 0x383   : > { %v2373_v20 = vadd.f32 %v2372_v47, %v5744_v37  ;;  %2661 = vmatmul.f32.gmra.mxu0 %v2569_v45 }
 0x384   : > { %v2455_v59 = vmax.f32 %v2260_v14, 0.0  ;;  %v2075_v14 = vmax.f32 %v1883_v46, 0.0  ;;  %v1892_v46 = vadd.f32 %v5765_v51, %v5742_v6 }
 0x385   : > { %v2456_v34 = vmax.f32 %v2373_v20, 0.0  ;;  %v2076_v20 = vmax.f32 %v1996_v12, 0.0 }
 0x386   : > { %v2519_v9 = vmax.f32 %v2069_v39, %v2455_v59  ;;  %2309 = vmatmul.f32.gmra.mxu2 %v5735_v0 }
 0x387   : > { %v2520_v4 = vmax.f32 %v2070_v25, %v2456_v34  ;;  %2422 = vmatmul.f32.gmra.mxu3 %v5735_v0  ;;  %v5924_v0 = vpop.f32.mrf.mxu0  ;;  %v2007_v34 = vpop.f32.mrf.mxu1 }
 0x389   : > { %v2262_v26 = vpop.f32.mrf.mxu2  ;;  %v2570_v11 = vmax.f32 %v2519_v9, %v2520_v4  ;;  %v1999_v4 = vadd.f32 %v5910_v48, %v5744_v37 }
 0x38a   : > { %v2263_v43 = vadd.f32 %v2262_v26, %v5742_v6  ;;  %v2375_v7 = vpop.f32.mrf.mxu3 }
 0x38b   : > { %v2376_v1 = vadd.f32 %v2375_v7, %v5744_v37  ;;  %2664 = vmatmul.f32.gmra.mxu0 %v2570_v11  ;;  %v2078_v61 = vmax.f32 %v1999_v4, 0.0  ;;  %v1895_v4 = vadd.f32 %v5779_v8, %v5742_v6 }
 0x38c   : > { %v2457_v5 = vmax.f32 %v2263_v43, 0.0 }
 0x38d   : > { %v2458_v17 = vmax.f32 %v2376_v1, 0.0 }
 0x38e   : > { %v2521_v22 = vmax.f32 %v2071_v18, %v2457_v5  ;;  %2312 = vmatmul.f32.gmra.mxu2 %v5752_v58  ;;  %v2077_v18 = vmax.f32 %v1886_v54, 0.0 }
 0x38f   : > { %v2522_v56 = vmax.f32 %v2072_v3, %v2458_v17  ;;  %2425 = vmatmul.f32.gmra.mxu3 %v5752_v58  ;;  %v5936_v29 = vpop.f32.mrf.mxu0 }
 0x391   : > { %v2265_v2 = vpop.f32.mrf.mxu2  ;;  %v2571_v30 = vmax.f32 %v2521_v22, %v2522_v56  ;;  %v1889_v22 = vadd.f32 %v5746_v28, %v5742_v6 }
 0x392   : > { %v2266_v41 = vadd.f32 %v2265_v2, %v5742_v6  ;;  %v2378_v36 = vpop.f32.mrf.mxu3 }
 0x393   : > { %v2379_v33 = vadd.f32 %v2378_v36, %v5744_v37  ;;  %2667 = vmatmul.f32.gmra.mxu0 %v2571_v30 }
 0x394   : > { %v2459_v40 = vmax.f32 %v2266_v41, 0.0  ;;  %v2010_v41 = vpop.f32.mrf.mxu1 }
 0x395   : > { %v2460_v31 = vmax.f32 %v2379_v33, 0.0 }
 0x396   : > { %v2523_v58 = vmax.f32 %v2073_v24, %v2459_v40 }
 0x397   : > { %v2524_v23 = vmax.f32 %v2074_v49, %v2460_v31  ;;  %v2079_v49 = vmax.f32 %v1889_v22, 0.0 }
 0x399   : > { %v2268_v16 = vpop.f32.mrf.mxu2  ;;  %v2572_v19 = vmax.f32 %v2523_v58, %v2524_v23  ;;  %v2080_v58 = vmax.f32 %v2002_v55, 0.0 }
 0x39a   : > { %v2269_v32 = vadd.f32 %v2268_v16, %v5742_v6  ;;  %v2381_v38 = vpop.f32.mrf.mxu3  ;;  %v2005_v16 = vadd.f32 %v2004_v13, %v5744_v37 }
 0x39b   : > { %v2382_v45 = vadd.f32 %v2381_v38, %v5744_v37  ;;  %2670 = vmatmul.f32.gmra.mxu0 %v2572_v19 }
 0x39c   : > { %v2461_v47 = vmax.f32 %v2269_v32, 0.0  ;;  %v2082_v54 = vmax.f32 %v2005_v16, 0.0 }
 0x39d   : > { %v2462_v39 = vmax.f32 %v2382_v45, 0.0 }
 0x39e   : > { %v2525_v59 = vmax.f32 %v2075_v14, %v2461_v47 }
 0x39f   : > { %v2526_v25 = vmax.f32 %v2076_v20, %v2462_v39  ;;  %v2081_v39 = vmax.f32 %v1892_v46, 0.0 }
 0x3a0   : > { %v2626_v9 = vpop.f32.mrf.mxu0 }
 0x3a1   : > { %v2627_v27 = vadd.f32 %v5945_v62, %v2626_v9  ;;  %v2271_v15 = vpop.f32.mrf.mxu2  ;;  %v2573_v26 = vmax.f32 %v2525_v59, %v2526_v25  ;;  %v2013_v59 = vpop.f32.mrf.mxu1 }
 0x3a2   : > { %v2272_v11 = vadd.f32 %v2271_v15, %v5742_v6  ;;  %v2384_v43 = vpop.f32.mrf.mxu3  ;;  %v2008_v15 = vadd.f32 %v2007_v34, %v5744_v37  ;;  %v2014_v16 = vadd.f32 %v2013_v59, %v5744_v37  ;;  %v1904_v59 = vadd.f32 %v5824_v53, %v5742_v6 }
 0x3a3   : > { %v2722_v7 = vmax.f32 %v2627_v27, 0.0  ;;  %v2385_v1 = vadd.f32 %v2384_v43, %v5744_v37  ;;  %2673 = vmatmul.f32.gmra.mxu0 %v2573_v26 }
 0x3a4   : > { %v2463_v5 = vmax.f32 %v2272_v11, 0.0 }
 0x3a5   : > { %v2464_v3 = vmax.f32 %v2385_v1, 0.0  ;;  %3716 = vmatmul.msk.f32.vlgmr.msrb.gmra.mxu1 %vm2768_vm1, %v2722_v7 }
 0x3a6   : > { %v2527_v17 = vmax.f32 %v2077_v18, %v2463_v5 }
 0x3a7   : > { %v2528_v48 = vmax.f32 %v2078_v61, %v2464_v3  ;;  %v2083_v61 = vmax.f32 %v1895_v4, 0.0 }
 0x3a8   : > { %v2629_v56 = vpop.f32.mrf.mxu0 }
 0x3a9   : > { %v2630_v35 = vadd.f32 %v5945_v62, %v2629_v56  ;;  %v2274_v2 = vpop.f32.mrf.mxu2  ;;  %v2574_v30 = vmax.f32 %v2527_v17, %v2528_v48  ;;  %v2084_v17 = vmax.f32 %v2008_v15, 0.0  ;;  %v2016_v8 = vpop.f32.mrf.mxu1  ;;  %v1898_v56 = vadd.f32 %v5793_v52, %v5742_v6 }
 0x3aa   : > { %v2275_v36 = vadd.f32 %v2274_v2, %v5742_v6  ;;  %v2387_v33 = vpop.f32.mrf.mxu3  ;;  %v2017_v4 = vadd.f32 %v2016_v8, %v5744_v37  ;;  %v1907_v8 = vadd.f32 %v5838_v42, %v5742_v6 }
 0x3ab   : > { %v2723_v24 = vmax.f32 %v2630_v35, 0.0  ;;  %v2388_v40 = vadd.f32 %v2387_v33, %v5744_v37  ;;  %2676 = vmatmul.f32.gmra.mxu0 %v2574_v30  ;;  %v2011_v35 = vadd.f32 %v2010_v41, %v5744_v37  ;;  %v1901_v41 = vadd.f32 %v5808_v21, %v5742_v6 }
 0x3ac   : > { %v2465_v31 = vmax.f32 %v2275_v36, 0.0 }
 0x3ad   : > { %v2466_v23 = vmax.f32 %v2388_v40, 0.0  ;;  %3717 = vmatmul.msk.f32.gmra.mxu1 %vm2768_vm1, %v2723_v24 }
 0x3ae   : > { %v2529_v28 = vmax.f32 %v2079_v49, %v2465_v31  ;;  %v2085_v31 = vmax.f32 %v1898_v56, 0.0 }
 0x3af   : > { %v2530_v50 = vmax.f32 %v2080_v58, %v2466_v23  ;;  %v2086_v23 = vmax.f32 %v2011_v35, 0.0 }
 0x3b0   : > { %v2632_v12 = vpop.f32.mrf.mxu0 }
 0x3b1   : > { %v2633_v19 = vadd.f32 %v5945_v62, %v2632_v12  ;;  %v2277_v32 = vpop.f32.mrf.mxu2  ;;  %v2575_v38 = vmax.f32 %v2529_v28, %v2530_v50  ;;  %v2019_v46 = vpop.f32.mrf.mxu1 }
 0x3b2   : > { %v2278_v45 = vadd.f32 %v2277_v32, %v5742_v6  ;;  %v2390_v14 = vpop.f32.mrf.mxu3 }
 0x3b3   : > { %v2724_v47 = vmax.f32 %v2633_v19, 0.0  ;;  %v2391_v20 = vadd.f32 %v2390_v14, %v5744_v37  ;;  %2679 = vmatmul.f32.gmra.mxu0 %v2575_v38 }
 0x3b4   : > { %v2467_v25 = vmax.f32 %v2278_v45, 0.0 }
 0x3b5   : > { %v2468_v9 = vmax.f32 %v2391_v20, 0.0  ;;  %3718 = vmatmul.msk.f32.gmra.mxu1 %vm2768_vm1, %v2724_v47 }
 0x3b6   : > { %v2531_v51 = vmax.f32 %v2081_v39, %v2467_v25  ;;  %v2087_v39 = vmax.f32 %v1901_v41, 0.0 }
 0x3b7   : > { %v2532_v13 = vmax.f32 %v2082_v54, %v2468_v9  ;;  %v2088_v54 = vmax.f32 %v2014_v16, 0.0 }
 0x3b8   : > { %v2635_v27 = vpop.f32.mrf.mxu0 }
 0x3b9   : > { %v2636_v26 = vadd.f32 %v5945_v62, %v2635_v27  ;;  %v2280_v11 = vpop.f32.mrf.mxu2  ;;  %v2576_v43 = vmax.f32 %v2531_v51, %v2532_v13 }
 0x3ba   : > { %v2281_v7 = vadd.f32 %v2280_v11, %v5742_v6  ;;  %v2393_v1 = vpop.f32.mrf.mxu3  ;;  %v2022_v11 = vpop.f32.mrf.mxu1 }
 0x3bb   : > { %v2725_v18 = vmax.f32 %v2636_v26, 0.0  ;;  %v2394_v5 = vadd.f32 %v2393_v1, %v5744_v37  ;;  %2682 = vmatmul.f32.gmra.mxu0 %v2576_v43 }
 0x3bc   : > { %v2469_v3 = vmax.f32 %v2281_v7, 0.0 }
 0x3bd   : > { %v2470_v48 = vmax.f32 %v2394_v5, 0.0  ;;  %3719 = vmatmul.msk.f32.gmra.mxu1 %vm2768_vm1, %v2725_v18  ;;  %v2089_v5 = vmax.f32 %v1904_v59, 0.0 }
 0x3be   : > { %v2533_v22 = vmax.f32 %v2083_v61, %v2469_v3  ;;  %v2090_v3 = vmax.f32 %v2017_v4, 0.0 }
 0x3bf   : > { %v2534_v34 = vmax.f32 %v2084_v17, %v2470_v48 }
 0x3c0   : > { %v2638_v55 = vpop.f32.mrf.mxu0 }
 0x3c1   : > { %v2639_v2 = vadd.f32 %v5945_v62, %v2638_v55  ;;  %v2283_v30 = vpop.f32.mrf.mxu2  ;;  %v2577_v36 = vmax.f32 %v2533_v22, %v2534_v34  ;;  %v2020_v34 = vadd.f32 %v2019_v46, %v5744_v37 }
 0x3c2   : > { %v2284_v33 = vadd.f32 %v2283_v30, %v5742_v6  ;;  %v2396_v24 = vpop.f32.mrf.mxu3 }
 0x3c3   : > { %v2726_v40 = vmax.f32 %v2639_v2, 0.0  ;;  %v2397_v49 = vadd.f32 %v2396_v24, %v5744_v37  ;;  %2685 = vmatmul.f32.gmra.mxu0 %v2577_v36  ;;  %v2091_v24 = vmax.f32 %v1907_v8, 0.0 }
 0x3c4   : > { %v2471_v58 = vmax.f32 %v2284_v33, 0.0 }
 0x3c5   : > { %v2472_v28 = vmax.f32 %v2397_v49, 0.0  ;;  %3720 = vmatmul.msk.f32.gmra.mxu1 %vm2768_vm1, %v2726_v40  ;;  %v2025_v40 = vpop.f32.mrf.mxu1 }
 0x3c6   : > { %v2535_v52 = vmax.f32 %v2085_v31, %v2471_v58  ;;  %v2092_v31 = vmax.f32 %v2020_v34, 0.0 }
 0x3c7   : > { %v2536_v50 = vmax.f32 %v2086_v23, %v2472_v28  ;;  %v1910_v28 = vadd.f32 %v5855_v57, %v5742_v6 }
 0x3c8   : > { %v2641_v12 = vpop.f32.mrf.mxu0 }
 0x3c9   : > { %v2642_v19 = vadd.f32 %v5945_v62, %v2641_v12  ;;  %v2286_v32 = vpop.f32.mrf.mxu2  ;;  %v2578_v38 = vmax.f32 %v2535_v52, %v2536_v50  ;;  %v2023_v50 = vadd.f32 %v2022_v11, %v5744_v37 }
 0x3ca   : > { %v2287_v45 = vadd.f32 %v2286_v32, %v5742_v6  ;;  %v2399_v14 = vpop.f32.mrf.mxu3 }
 0x3cb   : > { %v2727_v47 = vmax.f32 %v2642_v19, 0.0  ;;  %v2400_v20 = vadd.f32 %v2399_v14, %v5744_v37  ;;  %2688 = vmatmul.f32.gmra.mxu0 %v2578_v38 }
 0x3cc   : > { %v2473_v25 = vmax.f32 %v2287_v45, 0.0  ;;  %v2093_v45 = vmax.f32 %v1910_v28, 0.0 }
 0x3cd   : > { %v2474_v9 = vmax.f32 %v2400_v20, 0.0  ;;  %3721 = vmatmul.msk.f32.gmra.mxu1 %vm2768_vm1, %v2727_v47  ;;  %v2094_v47 = vmax.f32 %v2023_v50, 0.0  ;;  %v2028_v57 = vpop.f32.mrf.mxu1 }
 0x3ce   : > { %v2537_v21 = vmax.f32 %v2087_v39, %v2473_v25 }
 0x3cf   : > { %v2538_v51 = vmax.f32 %v2088_v54, %v2474_v9  ;;  %v1913_v54 = vadd.f32 %v5867_v63, %v5742_v6 }
 0x3d0   : > { %v2644_v13 = vpop.f32.mrf.mxu0 }
 0x3d1   : > { %v2645_v27 = vadd.f32 %v5945_v62, %v2644_v13  ;;  %v2289_v15 = vpop.f32.mrf.mxu2  ;;  %v2579_v26 = vmax.f32 %v2537_v21, %v2538_v51  ;;  %v2026_v21 = vadd.f32 %v2025_v40, %v5744_v37  ;;  %v2095_v11 = vmax.f32 %v1913_v54, 0.0 }
 0x3d2   : > { %v2290_v43 = vadd.f32 %v2289_v15, %v5742_v6  ;;  %v2402_v7 = vpop.f32.mrf.mxu3 }
 0x3d3   : > { %v2728_v1 = vmax.f32 %v2645_v27, 0.0  ;;  %v2403_v18 = vadd.f32 %v2402_v7, %v5744_v37  ;;  %2691 = vmatmul.f32.gmra.mxu0 %v2579_v26  ;;  %v2096_v7 = vmax.f32 %v2026_v21, 0.0 }
 0x3d4   : > { %v2475_v61 = vmax.f32 %v2290_v43, 0.0 }
 0x3d5   : > { %v2476_v17 = vmax.f32 %v2403_v18, 0.0  ;;  %3722 = vmatmul.msk.f32.gmra.mxu1 %vm2768_vm1, %v2728_v1 }
 0x3d6   : > { %v2539_v53 = vmax.f32 %v2089_v5, %v2475_v61  ;;  %v1916_v5 = vadd.f32 %v5886_v60, %v5742_v6  ;;  %v2031_v61 = vpop.f32.mrf.mxu1 }
 0x3d7   : > { %v2540_v48 = vmax.f32 %v2090_v3, %v2476_v17  ;;  %v2029_v17 = vadd.f32 %v2028_v57, %v5744_v37 }
 0x3d8   : > { %v2647_v22 = vpop.f32.mrf.mxu0 }
 0x3d9   : > { %v2648_v56 = vadd.f32 %v5945_v62, %v2647_v22  ;;  %v2292_v55 = vpop.f32.mrf.mxu2  ;;  %v2580_v35 = vmax.f32 %v2539_v53, %v2540_v48 }
 0x3da   : > { %v2293_v2 = vadd.f32 %v2292_v55, %v5742_v6  ;;  %v2405_v30 = vpop.f32.mrf.mxu3 }
 0x3db   : > { %v2729_v36 = vmax.f32 %v2648_v56, 0.0  ;;  %v2406_v33 = vadd.f32 %v2405_v30, %v5744_v37  ;;  %2694 = vmatmul.f32.gmra.mxu0 %v2580_v35  ;;  %v2097_v35 = vmax.f32 %v1916_v5, 0.0  ;;  %v2098_v30 = vmax.f32 %v2029_v17, 0.0 }
 0x3dc   : > { %v2477_v49 = vmax.f32 %v2293_v2, 0.0 }
 0x3dd   : > { %v2478_v58 = vmax.f32 %v2406_v33, 0.0  ;;  %3723 = vmatmul.msk.f32.gmra.mxu1 %vm2768_vm1, %v2729_v36 }
 0x3de   : > { %v2541_v42 = vmax.f32 %v2091_v24, %v2477_v49  ;;  %v1919_v24 = vadd.f32 %v5900_v10, %v5742_v6  ;;  %v2032_v49 = vadd.f32 %v2031_v61, %v5744_v37 }
 0x3df   : > { %v2542_v23 = vmax.f32 %v2092_v31, %v2478_v58 }
 0x3e0   : > { %v2650_v52 = vpop.f32.mrf.mxu0 }
 0x3e1   : > { %v2651_v41 = vadd.f32 %v5945_v62, %v2650_v52  ;;  %v2295_v46 = vpop.f32.mrf.mxu2  ;;  %v2581_v12 = vmax.f32 %v2541_v42, %v2542_v23  ;;  %v2034_v23 = vpop.f32.mrf.mxu1 }
 0x3e2   : > { %v2296_v16 = vadd.f32 %v2295_v46, %v5742_v6  ;;  %v2408_v19 = vpop.f32.mrf.mxu3  ;;  %v2099_v46 = vmax.f32 %v1919_v24, 0.0 }
 0x3e3   : > { %v2730_v32 = vmax.f32 %v2651_v41, 0.0  ;;  %v2409_v38 = vadd.f32 %v2408_v19, %v5744_v37  ;;  %2697 = vmatmul.f32.gmra.mxu0 %v2581_v12 }
 0x3e4   : > { %v2479_v14 = vmax.f32 %v2296_v16, 0.0  ;;  %v2100_v16 = vmax.f32 %v2032_v49, 0.0 }
 0x3e5   : > { %v2480_v20 = vmax.f32 %v2409_v38, 0.0  ;;  %3724 = vmatmul.msk.f32.gmra.mxu1 %vm2768_vm1, %v2730_v32  ;;  %v1922_v38 = vadd.f32 %v5914_v44, %v5742_v6 }
 0x3e6   : > { %v2543_v39 = vmax.f32 %v2093_v45, %v2479_v14  ;;  %v2035_v14 = vadd.f32 %v2034_v23, %v5744_v37 }
 0x3e7   : > { %v2544_v25 = vmax.f32 %v2094_v47, %v2480_v20  ;;  %v2101_v21 = vmax.f32 %v1922_v38, 0.0 }
 0x3e8   : > { %v2653_v9 = vpop.f32.mrf.mxu0 }
 0x3e9   : > { %v2654_v51 = vadd.f32 %v5945_v62, %v2653_v9  ;;  %v2298_v59 = vpop.f32.mrf.mxu2  ;;  %v2582_v13 = vmax.f32 %v2543_v39, %v2544_v25 }
 0x3ea   : > { %v2299_v4 = vadd.f32 %v2298_v59, %v5742_v6  ;;  %v2411_v27 = vpop.f32.mrf.mxu3 }
 0x3eb   : > { %v2731_v15 = vmax.f32 %v2654_v51, 0.0  ;;  %v2412_v26 = vadd.f32 %v2411_v27, %v5744_v37  ;;  %2700 = vmatmul.f32.gmra.mxu0 %v2582_v13  ;;  %v2037_v51 = vpop.f32.mrf.mxu1  ;;  %v2102_v13 = vmax.f32 %v2035_v14, 0.0 }
 0x3ec   : > { %v2481_v43 = vmax.f32 %v2299_v4, 0.0 }
 0x3ed   : > { %v2482_v1 = vmax.f32 %v2412_v26, 0.0  ;;  %3725 = vmatmul.msk.f32.gmra.mxu1 %vm2768_vm1, %v2731_v15  ;;  %v1925_v15 = vadd.f32 %v5924_v0, %v5742_v6 }
 0x3ee   : > { %v2545_v63 = vmax.f32 %v2095_v11, %v2481_v43  ;;  %v2038_v11 = vadd.f32 %v2037_v51, %v5744_v37 }
 0x3ef   : > { %v2546_v18 = vmax.f32 %v2096_v7, %v2482_v1 }
 0x3f0   : > { %v2656_v3 = vpop.f32.mrf.mxu0 }
 0x3f1   : > { %v2657_v53 = vadd.f32 %v5945_v62, %v2656_v3  ;;  %v2301_v48 = vpop.f32.mrf.mxu2  ;;  %v2583_v8 = vmax.f32 %v2545_v63, %v2546_v18  ;;  %v2103_v3 = vmax.f32 %v1925_v15, 0.0 }
 0x3f2   : > { %v2302_v22 = vadd.f32 %v2301_v48, %v5742_v6  ;;  %v2414_v34 = vpop.f32.mrf.mxu3 }
 0x3f3   : > { %v2732_v56 = vmax.f32 %v2657_v53, 0.0  ;;  %v2415_v55 = vadd.f32 %v2414_v34, %v5744_v37  ;;  %2703 = vmatmul.f32.gmra.mxu0 %v2583_v8  ;;  %v2104_v53 = vmax.f32 %v2038_v11, 0.0  ;;  %v2040_v0 = vpop.f32.mrf.mxu1  ;;  %v1928_v34 = vadd.f32 %v5936_v29, %v5742_v6 }
 0x3f4   : > { %v2483_v2 = vmax.f32 %v2302_v22, 0.0 }
 0x3f5   : > { %v2484_v36 = vmax.f32 %v2415_v55, 0.0  ;;  %3726 = vmatmul.msk.f32.gmra.mxu1 %vm2768_vm1, %v2732_v56  ;;  %v2041_v55 = vadd.f32 %v2040_v0, %v5744_v37 }
 0x3f6   : > { %v2547_v60 = vmax.f32 %v2097_v35, %v2483_v2 }
 0x3f7   : > { %v2548_v33 = vmax.f32 %v2098_v30, %v2484_v36 }
 0x3f8   : > { %v2659_v40 = vpop.f32.mrf.mxu0 }
 0x3f9   : > { %v2660_v31 = vadd.f32 %v5945_v62, %v2659_v40  ;;  %v2304_v58 = vpop.f32.mrf.mxu2  ;;  %v2584_v42 = vmax.f32 %v2547_v60, %v2548_v33  ;;  %v2105_v40 = vmax.f32 %v1928_v34, 0.0 }
 0x3fa   : > { %v2305_v28 = vadd.f32 %v2304_v58, %v5742_v6  ;;  %v2417_v52 = vpop.f32.mrf.mxu3 }
 0x3fb   : > { %v2733_v50 = vmax.f32 %v2660_v31, 0.0  ;;  %v2418_v41 = vadd.f32 %v2417_v52, %v5744_v37  ;;  %2706 = vmatmul.f32.gmra.mxu0 %v2584_v42  ;;  %v2106_v31 = vmax.f32 %v2041_v55, 0.0 }
 0x3fc   : > { %v2485_v12 = vmax.f32 %v2305_v28, 0.0 }
 0x3fd   : > { %v2486_v19 = vmax.f32 %v2418_v41, 0.0  ;;  %3727 = vmatmul.msk.f32.gmra.mxu1 %vm2768_vm1, %v2733_v50 }
 0x3fe   : > { %v2549_v10 = vmax.f32 %v2099_v46, %v2485_v12 }
 0x3ff   : > { %v2550_v32 = vmax.f32 %v2100_v16, %v2486_v19 }
 0x400   : > { %v2662_v45 = vpop.f32.mrf.mxu0 }
 0x401   : > { %v2663_v47 = vadd.f32 %v5945_v62, %v2662_v45  ;;  %v2307_v20 = vpop.f32.mrf.mxu2  ;;  %v2585_v57 = vmax.f32 %v2549_v10, %v2550_v32 }
 0x402   : > { %v2308_v39 = vadd.f32 %v2307_v20, %v5742_v6  ;;  %v2420_v25 = vpop.f32.mrf.mxu3 }
 0x403   : > { %v2734_v54 = vmax.f32 %v2663_v47, 0.0  ;;  %v2421_v9 = vadd.f32 %v2420_v25, %v5744_v37  ;;  %2709 = vmatmul.f32.gmra.mxu0 %v2585_v57 }
 0x404   : > { %v2487_v59 = vmax.f32 %v2308_v39, 0.0 }
 0x405   : > { %v2488_v4 = vmax.f32 %v2421_v9, 0.0  ;;  %3728 = vmatmul.msk.f32.gmra.mxu1 %vm2768_vm1, %v2734_v54 }
 0x406   : > { %v2551_v44 = vmax.f32 %v2101_v21, %v2487_v59 }
 0x407   : > { %v2552_v27 = vmax.f32 %v2102_v13, %v2488_v4 }
 0x408   : > { %v2665_v26 = vpop.f32.mrf.mxu0 }
 0x409   : > { %v2666_v43 = vadd.f32 %v5945_v62, %v2665_v26  ;;  %v2310_v7 = vpop.f32.mrf.mxu2  ;;  %v2586_v1 = vmax.f32 %v2551_v44, %v2552_v27 }
 0x40a   : > { %v2311_v63 = vadd.f32 %v2310_v7, %v5742_v6  ;;  %v2423_v18 = vpop.f32.mrf.mxu3 }
 0x40b   : > { %v2735_v5 = vmax.f32 %v2666_v43, 0.0  ;;  %v2424_v61 = vadd.f32 %v2423_v18, %v5744_v37  ;;  %2712 = vmatmul.f32.gmra.mxu0 %v2586_v1 }
 0x40c   : > { %v2489_v17 = vmax.f32 %v2311_v63, 0.0 }
 0x40d   : > { %v2490_v48 = vmax.f32 %v2424_v61, 0.0  ;;  %3729 = vmatmul.msk.f32.gmra.mxu1 %vm2768_vm1, %v2735_v5 }
 0x40e   : > { %v2553_v8 = vmax.f32 %v2103_v3, %v2489_v17 }
 0x40f   : > { %v2554_v22 = vmax.f32 %v2104_v53, %v2490_v48 }
 0x410   : > { %v2668_v56 = vpop.f32.mrf.mxu0 }
 0x411   : > { %v2669_v35 = vadd.f32 %v5945_v62, %v2668_v56  ;;  %v2313_v2 = vpop.f32.mrf.mxu2  ;;  %v2587_v30 = vmax.f32 %v2553_v8, %v2554_v22 }
 0x412   : > { %v2314_v36 = vadd.f32 %v2313_v2, %v5742_v6  ;;  %v2426_v60 = vpop.f32.mrf.mxu3  ;;  %v6058_v6 = vld [vmem:[%s6526_s8] ss:$0 sm:$0xff] }
 0x413   : > { %v2736_v33 = vmax.f32 %v2669_v35, 0.0  ;;  %v2427_v24 = vadd.f32 %v2426_v60, %v5744_v37  ;;  %2715 = vmatmul.f32.gmra.mxu0 %v2587_v30 }
 0x414   : > { %v2491_v49 = vmax.f32 %v2314_v36, 0.0 }
 0x415   : > { %v2492_v58 = vmax.f32 %v2427_v24, 0.0  ;;  %3730 = vmatmul.msk.f32.gmra.mxu1 %vm2768_vm1, %v2736_v33 }
 0x416   : > { %v2555_v29 = vmax.f32 %v2105_v40, %v2491_v49 }
 0x417   : > { %v2556_v42 = vmax.f32 %v2106_v31, %v2492_v58 }
 0x418   : > { %v2671_v23 = vpop.f32.mrf.mxu0 }
 0x419   : > { %v2672_v28 = vadd.f32 %v5945_v62, %v2671_v23  ;;  %v2588_v52 = vmax.f32 %v2555_v29, %v2556_v42 }
 0x41b   : > { %v2737_v50 = vmax.f32 %v2672_v28, 0.0  ;;  %2718 = vmatmul.f32.gmra.mxu0 %v2588_v52 }
 0x41d   : > { %3731 = vmatmul.msk.f32.gmra.mxu1 %vm2768_vm1, %v2737_v50 }
 0x420   : > { %v2674_v37 = vpop.f32.mrf.mxu0 }
 0x421   : > { %v2675_v41 = vadd.f32 %v5945_v62, %v2674_v37 }
 0x422   : > { %v2882_v46 = vpop.f32.mrf.mxu1 }
 0x423   : > { %v2738_v12 = vmax.f32 %v2675_v41, 0.0  ;;  %v6062_v16 = vadd.f32 %v6058_v6, %v2882_v46 }
 0x425   : > { %3732 = vmatmul.msk.f32.gmra.mxu1 %vm2768_vm1, %v2738_v12  ;;  %v2979_v19 = vsel %vm2978_vm2, %v6062_v16, -inf }
 0x426   : > { %2980 = vmax.xlane.f32.xlu0 %v2979_v19 }
 0x428   : > { %v2677_v10 = vpop.f32.mrf.mxu0 }
 0x429   : > { %v2678_v32 = vadd.f32 %v5945_v62, %v2677_v10 }
 0x42a   : > { %v2885_v38 = vpop.f32.mrf.mxu1 }
 0x42b   : > { %v2739_v45 = vmax.f32 %v2678_v32, 0.0  ;;  %v6069_v14 = vadd.f32 %v6058_v6, %v2885_v38 }
 0x42d   : > { %3733 = vmatmul.msk.f32.gmra.mxu1 %vm2768_vm1, %v2739_v45  ;;  %v2982_v47 = vsel %vm2978_vm2, %v6069_v14, -inf }
 0x42e   : > { %2983 = vmax.xlane.f32.xlu0 %v2982_v47 }
 0x430   : > { %v2680_v20 = vpop.f32.mrf.mxu0 }
 0x431   : > { %v2681_v57 = vadd.f32 %v5945_v62, %v2680_v20 }
 0x432   : > { %v2888_v39 = vpop.f32.mrf.mxu1 }
 0x433   : > { %v2740_v25 = vmax.f32 %v2681_v57, 0.0  ;;  %v6076_v54 = vadd.f32 %v6058_v6, %v2888_v39 }
 0x435   : > { %3734 = vmatmul.msk.f32.gmra.mxu1 %vm2768_vm1, %v2740_v25  ;;  %v2985_v9 = vsel %vm2978_vm2, %v6076_v54, -inf }
 0x436   : > { %2986 = vmax.xlane.f32.xlu1 %v2985_v9 }
 0x438   : > { %v2683_v21 = vpop.f32.mrf.mxu0 }
 0x439   : > { %v2684_v51 = vadd.f32 %v5945_v62, %v2683_v21 }
 0x43a   : > { %v2891_v59 = vpop.f32.mrf.mxu1 }
 0x43b   : > { %v2741_v13 = vmax.f32 %v2684_v51, 0.0  ;;  %v6083_v4 = vadd.f32 %v6058_v6, %v2891_v59 }
 0x43d   : > { %3735 = vmatmul.msk.f32.gmra.mxu1 %vm2768_vm1, %v2741_v13  ;;  %v2988_v44 = vsel %vm2978_vm2, %v6083_v4, -inf }
 0x43e   : > { %2989 = vmax.xlane.f32.xlu1 %v2988_v44 }
 0x440   : > { %v2686_v27 = vpop.f32.mrf.mxu0 }
 0x441   : > { %v2687_v15 = vadd.f32 %v5945_v62, %v2686_v27 }
 0x442   : > { %v2894_v26 = vpop.f32.mrf.mxu1 }
 0x443   : > { %v2742_v11 = vmax.f32 %v2687_v15, 0.0  ;;  %v6090_v43 = vadd.f32 %v6058_v6, %v2894_v26 }
 0x445   : > { %3736 = vmatmul.msk.f32.gmra.mxu1 %vm2768_vm1, %v2742_v11  ;;  %v2991_v7 = vsel %vm2978_vm2, %v6090_v43, -inf }
 0x446   : > { %2992 = vmax.xlane.f32.xlu2 %v2991_v7 }
 0x448   : > { %v2689_v1 = vpop.f32.mrf.mxu0 }
 0x449   : > { %v2690_v63 = vadd.f32 %v5945_v62, %v2689_v1 }
 0x44a   : > { %v2897_v18 = vpop.f32.mrf.mxu1 }
 0x44b   : > { %v2743_v5 = vmax.f32 %v2690_v63, 0.0  ;;  %v6097_v61 = vadd.f32 %v6058_v6, %v2897_v18 }
 0x44d   : > { %3737 = vmatmul.msk.f32.gmra.mxu1 %vm2768_vm1, %v2743_v5  ;;  %v2994_v3 = vsel %vm2978_vm2, %v6097_v61, -inf }
 0x44e   : > { %2995 = vmax.xlane.f32.xlu2 %v2994_v3 }
 0x450   : > { %v2692_v17 = vpop.f32.mrf.mxu0 }
 0x451   : > { %v2693_v53 = vadd.f32 %v5945_v62, %v2692_v17 }
 0x452   : > { %v2900_v48 = vpop.f32.mrf.mxu1 }
 0x453   : > { %v2744_v0 = vmax.f32 %v2693_v53, 0.0  ;;  %v6104_v8 = vadd.f32 %v6058_v6, %v2900_v48 }
 0x455   : > { %3738 = vmatmul.msk.f32.gmra.mxu1 %vm2768_vm1, %v2744_v0  ;;  %v2997_v22 = vsel %vm2978_vm2, %v6104_v8, -inf }
 0x456   : > { %2998 = vmax.xlane.f32.xlu0 %v2997_v22 }
 0x458   : > { %v2695_v34 = vpop.f32.mrf.mxu0 }
 0x459   : > { %v2696_v56 = vadd.f32 %v5945_v62, %v2695_v34 }
 0x45a   : > { %v2903_v55 = vpop.f32.mrf.mxu1 }
 0x45b   : > { %v2745_v35 = vmax.f32 %v2696_v56, 0.0  ;;  %v6111_v2 = vadd.f32 %v6058_v6, %v2903_v55 }
 0x45d   : > { %3739 = vmatmul.msk.f32.gmra.mxu1 %vm2768_vm1, %v2745_v35  ;;  %v3000_v30 = vsel %vm2978_vm2, %v6111_v2, -inf }
 0x45e   : > { %3001 = vmax.xlane.f32.xlu1 %v3000_v30 }
 0x460   : > { %v2698_v36 = vpop.f32.mrf.mxu0 }
 0x461   : > { %v2699_v60 = vadd.f32 %v5945_v62, %v2698_v36 }
 0x462   : > { %v2906_v33 = vpop.f32.mrf.mxu1 }
 0x463   : > { %v2746_v24 = vmax.f32 %v2699_v60, 0.0  ;;  %v6118_v40 = vadd.f32 %v6058_v6, %v2906_v33 }
 0x465   : > { %3740 = vmatmul.msk.f32.gmra.mxu1 %vm2768_vm1, %v2746_v24  ;;  %v3003_v49 = vsel %vm2978_vm2, %v6118_v40, -inf }
 0x466   : > { %3004 = vmax.xlane.f32.xlu2 %v3003_v49 }
 0x468   : > { %v2701_v31 = vpop.f32.mrf.mxu0 }
 0x469   : > { %v2702_v58 = vadd.f32 %v5945_v62, %v2701_v31 }
 0x46a   : > { %v2909_v29 = vpop.f32.mrf.mxu1 }
 0x46b   : > { %v2747_v42 = vmax.f32 %v2702_v58, 0.0  ;;  %v6125_v23 = vadd.f32 %v6058_v6, %v2909_v29 }
 0x46d   : > { %3741 = vmatmul.msk.f32.gmra.mxu1 %vm2768_vm1, %v2747_v42  ;;  %v3006_v28 = vsel %vm2978_vm2, %v6125_v23, -inf }
 0x46e   : > { %3007 = vmax.xlane.f32.xlu0 %v3006_v28 }
 0x470   : > { %v2704_v52 = vpop.f32.mrf.mxu0 }
 0x471   : > { %v2705_v50 = vadd.f32 %v5945_v62, %v2704_v52 }
 0x472   : > { %v2912_v37 = vpop.f32.mrf.mxu1 }
 0x473   : > { %v2748_v41 = vmax.f32 %v2705_v50, 0.0  ;;  %v6132_v46 = vadd.f32 %v6058_v6, %v2912_v37 }
 0x475   : > { %3742 = vmatmul.msk.f32.gmra.mxu1 %vm2768_vm1, %v2748_v41  ;;  %v3009_v12 = vsel %vm2978_vm2, %v6132_v46, -inf }
 0x476   : > { %3010 = vmax.xlane.f32.xlu1 %v3009_v12 }
 0x478   : > { %v2707_v19 = vpop.f32.mrf.mxu0 }
 0x479   : > { %v2708_v10 = vadd.f32 %v5945_v62, %v2707_v19 }
 0x47a   : > { %v2915_v32 = vpop.f32.mrf.mxu1 }
 0x47b   : > { %v2749_v38 = vmax.f32 %v2708_v10, 0.0  ;;  %v6139_v45 = vadd.f32 %v6058_v6, %v2915_v32 }
 0x47d   : > { %3743 = vmatmul.msk.f32.gmra.mxu1 %vm2768_vm1, %v2749_v38  ;;  %v3012_v47 = vsel %vm2978_vm2, %v6139_v45, -inf }
 0x47e   : > { %3013 = vmax.xlane.f32.xlu2 %v3012_v47 }
 0x480   : > { %v2710_v20 = vpop.f32.mrf.mxu0 }
 0x481   : > { %v2711_v57 = vadd.f32 %v5945_v62, %v2710_v20 }
 0x482   : > { %v2918_v39 = vpop.f32.mrf.mxu1 }
 0x483   : > { %v2750_v25 = vmax.f32 %v2711_v57, 0.0  ;;  %v6146_v9 = vadd.f32 %v6058_v6, %v2918_v39 }
 0x485   : > { %3744 = vmatmul.msk.f32.gmra.mxu1 %vm2768_vm1, %v2750_v25  ;;  %v3015_v21 = vsel %vm2978_vm2, %v6146_v9, -inf }
 0x486   : > { %3016 = vmax.xlane.f32.xlu0 %v3015_v21 }
 0x488   : > { %v2713_v51 = vpop.f32.mrf.mxu0 }
 0x489   : > { %v2714_v59 = vadd.f32 %v5945_v62, %v2713_v51 }
 0x48a   : > { %v2921_v13 = vpop.f32.mrf.mxu1 }
 0x48b   : > { %v2751_v44 = vmax.f32 %v2714_v59, 0.0  ;;  %v6153_v27 = vadd.f32 %v6058_v6, %v2921_v13 }
 0x48d   : > { %3745 = vmatmul.msk.f32.gmra.mxu1 %vm2768_vm1, %v2751_v44  ;;  %v3018_v15 = vsel %vm2978_vm2, %v6153_v27, -inf }
 0x48e   : > { %3019 = vmax.xlane.f32.xlu1 %v3018_v15 }
 0x490   : > { %v2716_v26 = vpop.f32.mrf.mxu0 }
 0x491   : > { %v2717_v11 = vadd.f32 %v5945_v62, %v2716_v26 }
 0x492   : > { %v2924_v7 = vpop.f32.mrf.mxu1 }
 0x493   : > { %v2752_v1 = vmax.f32 %v2717_v11, 0.0  ;;  %v6160_v63 = vadd.f32 %v6058_v6, %v2924_v7 }
 0x495   : > { %3746 = vmatmul.msk.f32.gmra.mxu1 %vm2768_vm1, %v2752_v1  ;;  %v3021_v18 = vsel %vm2978_vm2, %v6160_v63, -inf }
 0x496   : > { %3022 = vmax.xlane.f32.xlu2 %v3021_v18 }
 0x498   : > { %v2719_v5 = vpop.f32.mrf.mxu0 }
 0x499   : > { %v2720_v3 = vadd.f32 %v5945_v62, %v2719_v5  ;;  %v2981_v17 = vpop.xlane.xlu0 %2980 }
 0x49a   : > { %v6167_v53 = vsub.f32 %v6062_v16, %v2981_v17  ;;  %v2927_v48 = vpop.f32.mrf.mxu1 }
 0x49b   : > { %v2753_v0 = vmax.f32 %v2720_v3, 0.0  ;;  %v6170_v22 = vadd.f32 %v6058_v6, %v2927_v48 }
 0x49c   : > { %v3107_v34 = vmul.f32 1.442695, %v6167_v53 }
 0x49d   : > { %3747 = vmatmul.msk.f32.gmra.mxu1 %vm2768_vm1, %v2753_v0  ;;  %v3024_v56 = vsel %vm2978_vm2, %v6170_v22, -inf }
 0x49e   : > { %3770 = vpow2.f32 %v3107_v34  ;;  %3025 = vmax.xlane.f32.xlu0 %v3024_v56 }
 0x4a1   : > { %v2984_v55 = vpop.xlane.xlu0 %2983 }
 0x4a2   : > { %v6177_v62 = vsub.f32 %v6069_v14, %v2984_v55  ;;  %v2930_v16 = vpop.f32.mrf.mxu1 }
 0x4a3   : > { %v6180_v35 = vadd.f32 %v6058_v6, %v2930_v16 }
 0x4a4   : > { %v3771_v30 = vpop.eup %3770  ;;  %v3109_v36 = vmul.f32 1.442695, %v6177_v62 }
 0x4a5   : > { %v3027_v60 = vsel %vm2978_vm2, %v6180_v35, -inf  ;;  %v3171_v33 = vsel %vm2978_vm2, %v3771_v30, 0.0 }
 0x4a6   : > { %3772 = vpow2.f32 %v3109_v36  ;;  %3028 = vmax.xlane.f32.xlu1 %v3027_v60  ;;  %3172 = vadd.xlane.f32.xlu2 %v3171_v33 }
 0x4a9   : > { %v2987_v24 = vpop.xlane.xlu1 %2986 }
 0x4aa   : > { %v6187_v49 = vsub.f32 %v6076_v54, %v2987_v24  ;;  %v2933_v14 = vpop.f32.mrf.mxu1 }
 0x4ab   : > { %v6190_v31 = vadd.f32 %v6058_v6, %v2933_v14 }
 0x4ac   : > { %v3773_v58 = vpop.eup %3772  ;;  %v3111_v29 = vmul.f32 1.442695, %v6187_v49 }
 0x4ad   : > { %v3030_v42 = vsel %vm2978_vm2, %v6190_v31, -inf  ;;  %v3174_v28 = vsel %vm2978_vm2, %v3773_v58, 0.0 }
 0x4ae   : > { %3774 = vpow2.f32 %v3111_v29  ;;  %3031 = vmax.xlane.f32.xlu2 %v3030_v42  ;;  %3175 = vadd.xlane.f32.xlu0 %v3174_v28 }
 0x4b1   : > { %v2990_v52 = vpop.xlane.xlu1 %2989 }
 0x4b2   : > { %v6197_v50 = vsub.f32 %v6083_v4, %v2990_v52  ;;  %v2936_v54 = vpop.f32.mrf.mxu1 }
 0x4b3   : > { %v6200_v37 = vadd.f32 %v6058_v6, %v2936_v54 }
 0x4b4   : > { %v3775_v41 = vpop.eup %3774  ;;  %v3113_v12 = vmul.f32 1.442695, %v6197_v50 }
 0x4b5   : > { %v3177_v19 = vsel %vm2978_vm2, %v3775_v41, 0.0  ;;  %v3033_v10 = vsel %vm2978_vm2, %v6200_v37, -inf }
 0x4b6   : > { %3776 = vpow2.f32 %v3113_v12  ;;  %3178 = vadd.xlane.f32.xlu1 %v3177_v19  ;;  %3034 = vmax.xlane.f32.xlu0 %v3033_v10 }
 0x4b9   : > { %v2993_v32 = vpop.xlane.xlu2 %2992 }
 0x4ba   : > { %v6207_v38 = vsub.f32 %v6090_v43, %v2993_v32  ;;  %v2939_v4 = vpop.f32.mrf.mxu1 }
 0x4bb   : > { %v6210_v47 = vadd.f32 %v6058_v6, %v2939_v4 }
 0x4bc   : > { %v3777_v20 = vpop.eup %3776  ;;  %v3115_v57 = vmul.f32 1.442695, %v6207_v38 }
 0x4bd   : > { %v3036_v39 = vsel %vm2978_vm2, %v6210_v47, -inf  ;;  %v3180_v25 = vsel %vm2978_vm2, %v3777_v20, 0.0 }
 0x4be   : > { %3778 = vpow2.f32 %v3115_v57  ;;  %3037 = vmax.xlane.f32.xlu1 %v3036_v39  ;;  %3181 = vadd.xlane.f32.xlu2 %v3180_v25 }
 0x4c1   : > { %v2996_v21 = vpop.xlane.xlu2 %2995 }
 0x4c2   : > { %v6217_v51 = vsub.f32 %v6097_v61, %v2996_v21  ;;  %v2942_v43 = vpop.f32.mrf.mxu1 }
 0x4c3   : > { %v6220_v59 = vadd.f32 %v6058_v6, %v2942_v43 }
 0x4c4   : > { %v3779_v13 = vpop.eup %3778  ;;  %v3117_v44 = vmul.f32 1.442695, %v6217_v51 }
 0x4c5   : > { %v3039_v15 = vsel %vm2978_vm2, %v6220_v59, -inf  ;;  %v3183_v26 = vsel %vm2978_vm2, %v3779_v13, 0.0 }
 0x4c6   : > { %3780 = vpow2.f32 %v3117_v44  ;;  %3040 = vmax.xlane.f32.xlu2 %v3039_v15  ;;  %3184 = vadd.xlane.f32.xlu0 %v3183_v26 }
 0x4c9   : > { %v2999_v11 = vpop.xlane.xlu0 %2998 }
 0x4ca   : > { %v6227_v7 = vsub.f32 %v6104_v8, %v2999_v11  ;;  %v2945_v61 = vpop.f32.mrf.mxu1 }
 0x4cb   : > { %v6230_v1 = vadd.f32 %v6058_v6, %v2945_v61 }
 0x4cc   : > { %v3781_v18 = vpop.eup %3780  ;;  %v3119_v5 = vmul.f32 1.442695, %v6227_v7 }
 0x4cd   : > { %v3186_v3 = vsel %vm2978_vm2, %v3781_v18, 0.0  ;;  %v3042_v17 = vsel %vm2978_vm2, %v6230_v1, -inf }
 0x4ce   : > { %3782 = vpow2.f32 %v3119_v5  ;;  %3187 = vadd.xlane.f32.xlu1 %v3186_v3  ;;  %3043 = vmax.xlane.f32.xlu0 %v3042_v17 }
 0x4d1   : > { %v3002_v48 = vpop.xlane.xlu1 %3001 }
 0x4d2   : > { %v6237_v0 = vsub.f32 %v6111_v2, %v3002_v48  ;;  %v2948_v8 = vpop.f32.mrf.mxu1 }
 0x4d3   : > { %v6240_v34 = vadd.f32 %v6058_v6, %v2948_v8 }
 0x4d4   : > { %v3783_v56 = vpop.eup %3782  ;;  %v3121_v55 = vmul.f32 1.442695, %v6237_v0 }
 0x4d5   : > { %v3045_v16 = vsel %vm2978_vm2, %v6240_v34, -inf  ;;  %v3189_v30 = vsel %vm2978_vm2, %v3783_v56, 0.0 }
 0x4d6   : > { %3784 = vpow2.f32 %v3121_v55  ;;  %3046 = vmax.xlane.f32.xlu1 %v3045_v16  ;;  %3190 = vadd.xlane.f32.xlu2 %v3189_v30 }
 0x4d9   : > { %v3005_v36 = vpop.xlane.xlu2 %3004 }
 0x4da   : > { %v6247_v60 = vsub.f32 %v6118_v40, %v3005_v36  ;;  %v2951_v2 = vpop.f32.mrf.mxu1 }
 0x4db   : > { %v6250_v33 = vadd.f32 %v6058_v6, %v2951_v2 }
 0x4dc   : > { %v3785_v24 = vpop.eup %3784  ;;  %v3123_v14 = vmul.f32 1.442695, %v6247_v60 }
 0x4dd   : > { %v3192_v58 = vsel %vm2978_vm2, %v3785_v24, 0.0  ;;  %v3048_v29 = vsel %vm2978_vm2, %v6250_v33, -inf }
 0x4de   : > { %3786 = vpow2.f32 %v3123_v14  ;;  %3193 = vadd.xlane.f32.xlu0 %v3192_v58  ;;  %3049 = vmax.xlane.f32.xlu2 %v3048_v29 }
 0x4e1   : > { %v3008_v42 = vpop.xlane.xlu0 %3007 }
 0x4e2   : > { %v6257_v28 = vsub.f32 %v6125_v23, %v3008_v42  ;;  %v2954_v40 = vpop.f32.mrf.mxu1 }
 0x4e3   : > { %v6260_v52 = vadd.f32 %v6058_v6, %v2954_v40 }
 0x4e4   : > { %v3787_v54 = vpop.eup %3786  ;;  %v3125_v41 = vmul.f32 1.442695, %v6257_v28 }
 0x4e5   : > { %v3195_v12 = vsel %vm2978_vm2, %v3787_v54, 0.0  ;;  %v3051_v19 = vsel %vm2978_vm2, %v6260_v52, -inf }
 0x4e6   : > { %3788 = vpow2.f32 %v3125_v41  ;;  %3196 = vadd.xlane.f32.xlu1 %v3195_v12  ;;  %3052 = vmax.xlane.f32.xlu0 %v3051_v19 }
 0x4e9   : > { %v3011_v10 = vpop.xlane.xlu1 %3010 }
 0x4ea   : > { %v6267_v32 = vsub.f32 %v6132_v46, %v3011_v10  ;;  %v2957_v23 = vpop.f32.mrf.mxu1 }
 0x4eb   : > { %v6270_v4 = vadd.f32 %v6058_v6, %v2957_v23 }
 0x4ec   : > { %v3789_v20 = vpop.eup %3788  ;;  %v3127_v57 = vmul.f32 1.442695, %v6267_v32 }
 0x4ed   : > { %v3054_v39 = vsel %vm2978_vm2, %v6270_v4, -inf  ;;  %v3198_v25 = vsel %vm2978_vm2, %v3789_v20, 0.0 }
 0x4ee   : > { %3790 = vpow2.f32 %v3127_v57  ;;  %3055 = vmax.xlane.f32.xlu1 %v3054_v39  ;;  %3199 = vadd.xlane.f32.xlu2 %v3198_v25 }
 0x4f1   : > { %v3014_v8 = vpop.xlane.xlu2 %3013 }
 0x4f2   : > { %v2960_v21 = vpop.f32.mrf.mxu1  ;;  %v6312_v40 = vsub.f32 %v6139_v45, %v3014_v8 }
 0x4f3   : > { %v6277_v43 = vadd.f32 %v6058_v6, %v2960_v21 }
 0x4f4   : > { %v3791_v46 = vpop.eup %3790 }
 0x4f5   : > { %v3201_v13 = vsel %vm2978_vm2, %v3791_v46, 0.0  ;;  %v3057_v44 = vsel %vm2978_vm2, %v6277_v43, -inf }
 0x4f6   : > { %3202 = vadd.xlane.f32.xlu0 %v3201_v13  ;;  %3058 = vmax.xlane.f32.xlu2 %v3057_v44 }
 0x4f9   : > { %v3017_v61 = vpop.xlane.xlu0 %3016 }
 0x4fa   : > { %v2963_v15 = vpop.f32.mrf.mxu1  ;;  %v6291_v3 = vsub.f32 %v6146_v9, %v3017_v61 }
 0x4fb   : > { %v6283_v26 = vadd.f32 %v6058_v6, %v2963_v15 }
 0x4fc   : > { %v3131_v48 = vmul.f32 1.442695, %v6291_v3 }
 0x4fd   : > { %v3060_v11 = vsel %vm2978_vm2, %v6283_v26, -inf }
 0x4fe   : > { %3061 = vmax.xlane.f32.xlu0 %v3060_v11  ;;  %3792 = vpow2.f32 %v3131_v48 }
 0x501   : > { %v3020_v56 = vpop.xlane.xlu1 %3019 }
 0x502   : > { %v2966_v18 = vpop.f32.mrf.mxu1  ;;  %v6300_v30 = vsub.f32 %v6153_v27, %v3020_v56 }
 0x503   : > { %v6288_v5 = vadd.f32 %v6058_v6, %v2966_v18 }
 0x504   : > { %v3133_v36 = vmul.f32 1.442695, %v6300_v30  ;;  %v3793_v14 = vpop.eup %3792 }
 0x505   : > { %v3063_v17 = vsel %vm2978_vm2, %v6288_v5, -inf  ;;  %v3207_v41 = vsel %vm2978_vm2, %v3793_v14, 0.0 }
 0x506   : > { %3064 = vmax.xlane.f32.xlu1 %v3063_v17  ;;  %3794 = vpow2.f32 %v3133_v36 }
 0x509   : > { %v3023_v2 = vpop.xlane.xlu2 %3022 }
 0x50a   : > { %v2969_v55 = vpop.f32.mrf.mxu1  ;;  %v6326_v39 = vsub.f32 %v6160_v63, %v3023_v2 }
 0x50b   : > { %v6297_v16 = vadd.f32 %v6058_v6, %v2969_v55 }
 0x50c   : > { %v3795_v10 = vpop.eup %3794  ;;  %v3135_v13 = vmul.f32 1.442695, %v6326_v39 }
 0x50d   : > { %v3066_v9 = vsel %vm2978_vm2, %v6297_v16, -inf  ;;  %v3210_v46 = vsel %vm2978_vm2, %v3795_v10, 0.0 }
 0x50e   : > { %3067 = vmax.xlane.f32.xlu2 %v3066_v9 }
 0x511   : > { %v3026_v24 = vpop.xlane.xlu0 %3025 }
 0x512   : > { %v6306_v58 = vsub.f32 %v6170_v22, %v3026_v24  ;;  %v2972_v29 = vpop.f32.mrf.mxu1  ;;  %v3129_v22 = vmul.f32 1.442695, %v6312_v40 }
 0x513   : > { %v6309_v42 = vadd.f32 %v6058_v6, %v2972_v29 }
 0x514   : > { %v3137_v27 = vmul.f32 1.442695, %v6306_v58 }
 0x515   : > { %v3069_v54 = vsel %vm2978_vm2, %v6309_v42, -inf }
 0x516   : > { %3796 = vpow2.f32 %v3137_v27  ;;  %3070 = vmax.xlane.f32.xlu0 %v3069_v54  ;;  %3208 = vadd.xlane.f32.xlu2 %v3207_v41 }
 0x519   : > { %v3029_v12 = vpop.xlane.xlu1 %3028  ;;  %v3173_v19 = vpop.xlane.xlu2 %3172 }
 0x51a   : > { %v6320_v23 = vsub.f32 %v6180_v35, %v3029_v12  ;;  %3798 = vlog2.f32 %v3173_v19  ;;  %v2975_v45 = vpop.f32.mrf.mxu1 }
 0x51b   : > { %v6323_v20 = vadd.f32 %v6058_v6, %v2975_v45  ;;  %3800 = vpow2.f32 %v3129_v22 }
 0x51c   : > { %v3797_v57 = vpop.eup %3796  ;;  %v3139_v25 = vmul.f32 1.442695, %v6320_v23 }
 0x51d   : > { %v3072_v21 = vsel %vm2978_vm2, %v6323_v20, -inf  ;;  %v3216_v35 = vsel %vm2978_vm2, %v3797_v57, 0.0 }
 0x51e   : > { %3802 = vpow2.f32 %v3139_v25  ;;  %3073 = vmax.xlane.f32.xlu1 %v3072_v21  ;;  %3211 = vadd.xlane.f32.xlu0 %v3210_v46 }
 0x51f   : > { %3217 = vadd.xlane.f32.xlu2 %v3216_v35 }
 0x520   : > { %v3799_v6 = vpop.eup %3798 }
 0x521   : > { %v3268_v44 = vmul.f32 0.6931472, %v3799_v6  ;;  %v3032_v15 = vpop.xlane.xlu2 %3031  ;;  %v3176_v63 = vpop.xlane.xlu0 %3175 }
 0x522   : > { %v3801_v11 = vpop.eup %3800  ;;  %3804 = vlog2.f32 %v3176_v63  ;;  %v6343_v17 = vsub.f32 %v6190_v31, %v3032_v15 }
 0x523   : > { %v3331_v61 = vsub.f32 %v6167_v53, %v3268_v44  ;;  %3806 = vpow2.f32 %v3135_v13  ;;  %v3204_v48 = vsel %vm2978_vm2, %v3801_v11, 0.0 }
 0x524   : > { %v3803_v18 = vpop.eup %3802  ;;  %v3141_v55 = vmul.f32 1.442695, %v6343_v17 }
 0x525   : > { %3363 = vst.msk [vmem:[%s6339_s14] sm:$0xff] %vm2978_vm2, %v3331_v61  ;;  %v3219_v8 = vsel %vm2978_vm2, %v3803_v18, 0.0 }
 0x526   : > { %3205 = vadd.xlane.f32.xlu1 %v3204_v48  ;;  %3220 = vadd.xlane.f32.xlu0 %v3219_v8 }
 0x528   : > { %v3805_v56 = vpop.eup %3804 }
 0x529   : > { %v3270_v9 = vmul.f32 0.6931472, %v3805_v56  ;;  %v3179_v36 = vpop.xlane.xlu1 %3178  ;;  %v3035_v53 = vpop.xlane.xlu0 %3034 }
 0x52a   : > { %v3807_v2 = vpop.eup %3806  ;;  %3808 = vlog2.f32 %v3179_v36  ;;  %v6351_v31 = vsub.f32 %v6200_v37, %v3035_v53 }
 0x52b   : > { %v3332_v24 = vsub.f32 %v6177_v62, %v3270_v9  ;;  %3810 = vpow2.f32 %v3141_v55  ;;  %v3213_v29 = vsel %vm2978_vm2, %v3807_v2, 0.0 }
 0x52c   : > { %v3143_v14 = vmul.f32 1.442695, %v6351_v31 }
 0x52d   : > { %3364 = vst.msk [vmem:[%s6339_s14 + $0x8] sm:$0xff] %vm2978_vm2, %v3332_v24 }
 0x52e   : > { %3812 = vpow2.f32 %v3143_v14  ;;  %3214 = vadd.xlane.f32.xlu1 %v3213_v29 }
 0x530   : > { %v3809_v27 = vpop.eup %3808 }
 0x531   : > { %v3272_v54 = vmul.f32 0.6931472, %v3809_v27  ;;  %v3038_v41 = vpop.xlane.xlu1 %3037  ;;  %v3182_v22 = vpop.xlane.xlu2 %3181 }
 0x532   : > { %v3811_v12 = vpop.eup %3810  ;;  %v6359_v37 = vsub.f32 %v6210_v47, %v3038_v41  ;;  %3814 = vlog2.f32 %v3182_v22 }
 0x533   : > { %v3333_v62 = vsub.f32 %v6187_v49, %v3272_v54  ;;  %v3222_v45 = vsel %vm2978_vm2, %v3811_v12, 0.0 }
 0x534   : > { %v3813_v19 = vpop.eup %3812  ;;  %v3145_v10 = vmul.f32 1.442695, %v6359_v37 }
 0x535   : > { %3365 = vst.msk [vmem:[%s6339_s14 + $0x10] sm:$0xff] %vm2978_vm2, %v3333_v62  ;;  %v3225_v57 = vsel %vm2978_vm2, %v3813_v19, 0.0 }
 0x536   : > { %3816 = vpow2.f32 %v3145_v10  ;;  %3223 = vadd.xlane.f32.xlu1 %v3222_v45  ;;  %3226 = vadd.xlane.f32.xlu2 %v3225_v57 }
 0x538   : > { %v3815_v25 = vpop.eup %3814 }
 0x539   : > { %v3274_v21 = vmul.f32 0.6931472, %v3815_v25  ;;  %v3041_v47 = vpop.xlane.xlu2 %3040  ;;  %v3185_v46 = vpop.xlane.xlu0 %3184 }
 0x53a   : > { %v6368_v35 = vsub.f32 %v6220_v59, %v3041_v47  ;;  %3818 = vlog2.f32 %v3185_v46 }
 0x53b   : > { %v3334_v49 = vsub.f32 %v6197_v50, %v3274_v21 }
 0x53c   : > { %v3817_v6 = vpop.eup %3816  ;;  %v3147_v13 = vmul.f32 1.442695, %v6368_v35 }
 0x53d   : > { %3366 = vst.msk [vmem:[%s6339_s14 + $0x18] sm:$0xff] %vm2978_vm2, %v3334_v49  ;;  %v3228_v44 = vsel %vm2978_vm2, %v3817_v6, 0.0 }
 0x53e   : > { %3820 = vpow2.f32 %v3147_v13  ;;  %3229 = vadd.xlane.f32.xlu0 %v3228_v44 }
 0x540   : > { %v3819_v15 = vpop.eup %3818 }
 0x541   : > { %v3276_v63 = vmul.f32 0.6931472, %v3819_v15  ;;  %v3188_v11 = vpop.xlane.xlu1 %3187  ;;  %v3044_v61 = vpop.xlane.xlu0 %3043 }
 0x542   : > { %3822 = vlog2.f32 %v3188_v11  ;;  %v6376_v59 = vsub.f32 %v6230_v1, %v3044_v61 }
 0x543   : > { %v3335_v50 = vsub.f32 %v6207_v38, %v3276_v63 }
 0x544   : > { %v3821_v18 = vpop.eup %3820  ;;  %v3149_v48 = vmul.f32 1.442695, %v6376_v59 }
 0x545   : > { %3367 = vst.msk [vmem:[%s6339_s14 + $0x20] sm:$0xff] %vm2978_vm2, %v3335_v50  ;;  %v3231_v8 = vsel %vm2978_vm2, %v3821_v18, 0.0 }
 0x546   : > { %3824 = vpow2.f32 %v3149_v48  ;;  %3232 = vadd.xlane.f32.xlu1 %v3231_v8 }
 0x548   : > { %v3823_v56 = vpop.eup %3822 }
 0x549   : > { %v3278_v55 = vmul.f32 0.6931472, %v3823_v56  ;;  %v3047_v9 = vpop.xlane.xlu1 %3046  ;;  %v3191_v36 = vpop.xlane.xlu2 %3190 }
 0x54a   : > { %v6384_v53 = vsub.f32 %v6240_v34, %v3047_v9  ;;  %3826 = vlog2.f32 %v3191_v36 }
 0x54b   : > { %v3336_v38 = vsub.f32 %v6217_v51, %v3278_v55 }
 0x54c   : > { %v3825_v1 = vpop.eup %3824  ;;  %v3151_v2 = vmul.f32 1.442695, %v6384_v53 }
 0x54d   : > { %3368 = vst.msk [vmem:[%s6339_s14 + $0x28] sm:$0xff] %vm2978_vm2, %v3336_v38  ;;  %v3234_v24 = vsel %vm2978_vm2, %v3825_v1, 0.0 }
 0x54e   : > { %3828 = vpow2.f32 %v3151_v2  ;;  %3235 = vadd.xlane.f32.xlu2 %v3234_v24 }
 0x550   : > { %v3827_v14 = vpop.eup %3826 }
 0x551   : > { %v3280_v29 = vmul.f32 0.6931472, %v3827_v14  ;;  %v3050_v27 = vpop.xlane.xlu2 %3049  ;;  %v3194_v54 = vpop.xlane.xlu0 %3193 }
 0x552   : > { %v6392_v34 = vsub.f32 %v6250_v33, %v3050_v27  ;;  %3830 = vlog2.f32 %v3194_v54 }
 0x553   : > { %v3337_v51 = vsub.f32 %v6227_v7, %v3280_v29 }
 0x554   : > { %v3829_v41 = vpop.eup %3828  ;;  %v3153_v22 = vmul.f32 1.442695, %v6392_v34 }
 0x555   : > { %3369 = vst.msk [vmem:[%s6339_s14 + $0x30] sm:$0xff] %vm2978_vm2, %v3337_v51  ;;  %v3237_v12 = vsel %vm2978_vm2, %v3829_v41, 0.0 }
 0x556   : > { %3832 = vpow2.f32 %v3153_v22  ;;  %3238 = vadd.xlane.f32.xlu0 %v3237_v12 }
 0x558   : > { %v3831_v62 = vpop.eup %3830 }
 0x559   : > { %v3282_v19 = vmul.f32 0.6931472, %v3831_v62  ;;  %v3197_v10 = vpop.xlane.xlu1 %3196  ;;  %v3053_v45 = vpop.xlane.xlu0 %3052 }
 0x55a   : > { %3834 = vlog2.f32 %v3197_v10  ;;  %v6400_v33 = vsub.f32 %v6260_v52, %v3053_v45 }
 0x55b   : > { %v3338_v7 = vsub.f32 %v6237_v0, %v3282_v19 }
 0x55c   : > { %v3833_v57 = vpop.eup %3832  ;;  %v3155_v25 = vmul.f32 1.442695, %v6400_v33 }
 0x55d   : > { %3370 = vst.msk [vmem:[%s6339_s14 + $0x38] sm:$0xff] %vm2978_vm2, %v3338_v7  ;;  %v3240_v21 = vsel %vm2978_vm2, %v3833_v57, 0.0 }
 0x55e   : > { %3836 = vpow2.f32 %v3155_v25  ;;  %3241 = vadd.xlane.f32.xlu1 %v3240_v21 }
 0x560   : > { %v3835_v47 = vpop.eup %3834 }
 0x561   : > { %v3284_v46 = vmul.f32 0.6931472, %v3835_v47  ;;  %v3056_v49 = vpop.xlane.xlu1 %3055  ;;  %v3200_v6 = vpop.xlane.xlu2 %3199 }
 0x562   : > { %v6408_v13 = vsub.f32 %v6270_v4, %v3056_v49  ;;  %3838 = vlog2.f32 %v3200_v6 }
 0x563   : > { %v3339_v0 = vsub.f32 %v6247_v60, %v3284_v46 }
 0x564   : > { %v3837_v52 = vpop.eup %3836  ;;  %v3157_v44 = vmul.f32 1.442695, %v6408_v13 }
 0x565   : > { %3371 = vst.msk [vmem:[%s6339_s14 + $0x40] sm:$0xff] %vm2978_vm2, %v3339_v0  ;;  %v3243_v15 = vsel %vm2978_vm2, %v3837_v52, 0.0 }
 0x566   : > { %3840 = vpow2.f32 %v3157_v44  ;;  %3244 = vadd.xlane.f32.xlu2 %v3243_v15 }
 0x568   : > { %v3839_v63 = vpop.eup %3838 }
 0x569   : > { %v3286_v11 = vmul.f32 0.6931472, %v3839_v63  ;;  %v3059_v61 = vpop.xlane.xlu2 %3058  ;;  %v3203_v50 = vpop.xlane.xlu0 %3202 }
 0x56a   : > { %v6416_v4 = vsub.f32 %v6277_v43, %v3059_v61  ;;  %3842 = vlog2.f32 %v3203_v50 }
 0x56b   : > { %v3340_v60 = vsub.f32 %v6257_v28, %v3286_v11 }
 0x56c   : > { %v3841_v18 = vpop.eup %3840  ;;  %v3159_v48 = vmul.f32 1.442695, %v6416_v4 }
 0x56d   : > { %3372 = vst.msk [vmem:[%s6339_s14 + $0x48] sm:$0xff] %vm2978_vm2, %v3340_v60  ;;  %v3246_v8 = vsel %vm2978_vm2, %v3841_v18, 0.0 }
 0x56e   : > { %3844 = vpow2.f32 %v3159_v48  ;;  %3247 = vadd.xlane.f32.xlu0 %v3246_v8 }
 0x570   : > { %v3843_v56 = vpop.eup %3842 }
 0x571   : > { %v3288_v55 = vmul.f32 0.6931472, %v3843_v56  ;;  %v3062_v9 = vpop.xlane.xlu0 %3061 }
 0x572   : > { %v6424_v36 = vsub.f32 %v6283_v26, %v3062_v9 }
 0x573   : > { %v3341_v43 = vsub.f32 %v6267_v32, %v3288_v55 }
 0x574   : > { %v3845_v38 = vpop.eup %3844  ;;  %v3161_v28 = vmul.f32 1.442695, %v6424_v36 }
 0x575   : > { %3373 = vst.msk [vmem:[%s6339_s14 + $0x50] sm:$0xff] %vm2978_vm2, %v3341_v43  ;;  %v3249_v1 = vsel %vm2978_vm2, %v3845_v38, 0.0 }
 0x576   : > { %3846 = vpow2.f32 %v3161_v28  ;;  %3250 = vadd.xlane.f32.xlu1 %v3249_v1 }
 0x579   : > { %v3065_v2 = vpop.xlane.xlu1 %3064 }
 0x57a   : > { %v6432_v24 = vsub.f32 %v6288_v5, %v3065_v2 }
 0x57c   : > { %v3847_v14 = vpop.eup %3846  ;;  %v3163_v29 = vmul.f32 1.442695, %v6432_v24 }
 0x57d   : > { %v3252_v26 = vsel %vm2978_vm2, %v3847_v14, 0.0 }
 0x57e   : > { %3848 = vpow2.f32 %v3163_v29  ;;  %3253 = vadd.xlane.f32.xlu2 %v3252_v26 }
 0x581   : > { %v3068_v32 = vpop.xlane.xlu2 %3067 }
 0x582   : > { %v6437_v27 = vsub.f32 %v6297_v16, %v3068_v32 }
 0x584   : > { %v3849_v54 = vpop.eup %3848  ;;  %v3165_v51 = vmul.f32 1.442695, %v6437_v27 }
 0x585   : > { %v3255_v41 = vsel %vm2978_vm2, %v3849_v54, 0.0 }
 0x586   : > { %3850 = vpow2.f32 %v3165_v51  ;;  %3256 = vadd.xlane.f32.xlu0 %v3255_v41 }
 0x589   : > { %v3209_v5 = vpop.xlane.xlu2 %3208  ;;  %v3071_v22 = vpop.xlane.xlu0 %3070 }
 0x58a   : > { %3852 = vlog2.f32 %v3209_v5  ;;  %v6442_v12 = vsub.f32 %v6309_v42, %v3071_v22 }
 0x58c   : > { %v3851_v62 = vpop.eup %3850  ;;  %v3167_v19 = vmul.f32 1.442695, %v6442_v12 }
 0x58d   : > { %v3258_v16 = vsel %vm2978_vm2, %v3851_v62, 0.0 }
 0x58e   : > { %3854 = vpow2.f32 %v3167_v19  ;;  %3259 = vadd.xlane.f32.xlu1 %v3258_v16 }
 0x590   : > { %v3853_v10 = vpop.eup %3852 }
 0x591   : > { %v3292_v45 = vmul.f32 0.6931472, %v3853_v10  ;;  %v3074_v7 = vpop.xlane.xlu1 %3073  ;;  %v3212_v57 = vpop.xlane.xlu0 %3211 }
 0x592   : > { %v6447_v25 = vsub.f32 %v6323_v20, %v3074_v7  ;;  %v3218_v21 = vpop.xlane.xlu2 %3217  ;;  %3856 = vlog2.f32 %v3212_v57 }
 0x593   : > { %v3343_v42 = vsub.f32 %v6291_v3, %v3292_v45  ;;  %3858 = vlog2.f32 %v3218_v21 }
 0x594   : > { %v3855_v47 = vpop.eup %3854  ;;  %v3169_v46 = vmul.f32 1.442695, %v6447_v25 }
 0x595   : > { %3375 = vst.msk [vmem:[%s6339_s14 + $0x60] sm:$0xff] %vm2978_vm2, %v3343_v42  ;;  %v3261_v49 = vsel %vm2978_vm2, %v3855_v47, 0.0 }
 0x596   : > { %3860 = vpow2.f32 %v3169_v46  ;;  %3262 = vadd.xlane.f32.xlu2 %v3261_v49 }
 0x598   : > { %v3857_v6 = vpop.eup %3856 }
 0x599   : > { %v3859_v0 = vpop.eup %3858  ;;  %v3294_v20 = vmul.f32 0.6931472, %v3857_v6  ;;  %v3206_v52 = vpop.xlane.xlu1 %3205 }
 0x59a   : > { %v3221_v44 = vpop.xlane.xlu0 %3220  ;;  %v3298_v15 = vmul.f32 0.6931472, %v3859_v0  ;;  %3862 = vlog2.f32 %v3206_v52 }
 0x59b   : > { %v3344_v3 = vsub.f32 %v6300_v30, %v3294_v20  ;;  %3864 = vlog2.f32 %v3221_v44 }
 0x59c   : > { %v3861_v63 = vpop.eup %3860  ;;  %v3346_v11 = vsub.f32 %v6306_v58, %v3298_v15 }
 0x59d   : > { %3376 = vst.msk [vmem:[%s6339_s14 + $0x68] sm:$0xff] %vm2978_vm2, %v3344_v3  ;;  %v3264_v61 = vsel %vm2978_vm2, %v3861_v63, 0.0 }
 0x59e   : > { %3378 = vst.msk [vmem:[%s6339_s14 + $0x78] sm:$0xff] %vm2978_vm2, %v3346_v11  ;;  %3265 = vadd.xlane.f32.xlu0 %v3264_v61 }
 0x5a0   : > { %v3863_v50 = vpop.eup %3862 }
 0x5a1   : > { %v3865_v60 = vpop.eup %3864  ;;  %v3290_v18 = vmul.f32 0.6931472, %v3863_v50  ;;  %v3215_v48 = vpop.xlane.xlu1 %3214 }
 0x5a2   : > { %v3300_v8 = vmul.f32 0.6931472, %v3865_v60  ;;  %3866 = vlog2.f32 %v3215_v48 }
 0x5a3   : > { %v3342_v30 = vsub.f32 %v6312_v40, %v3290_v18 }
 0x5a4   : > { %v3347_v56 = vsub.f32 %v6320_v23, %v3300_v8 }
 0x5a5   : > { %3374 = vst.msk [vmem:[%s6339_s14 + $0x58] sm:$0xff] %vm2978_vm2, %v3342_v30 }
 0x5a6   : > { %3379 = vst.msk [vmem:[%s6339_s14 + $0x80] sm:$0xff] %vm2978_vm2, %v3347_v56 }
 0x5a8   : > { %v3867_v58 = vpop.eup %3866 }
 0x5a9   : > { %v3296_v55 = vmul.f32 0.6931472, %v3867_v58  ;;  %v3224_v9 = vpop.xlane.xlu1 %3223  ;;  %v3227_v43 = vpop.xlane.xlu2 %3226 }
 0x5aa   : > { %3868 = vlog2.f32 %v3224_v9 }
 0x5ab   : > { %v3345_v38 = vsub.f32 %v6326_v39, %v3296_v55  ;;  %3870 = vlog2.f32 %v3227_v43 }
 0x5ad   : > { %3377 = vst.msk [vmem:[%s6339_s14 + $0x70] sm:$0xff] %vm2978_vm2, %v3345_v38 }
 0x5b0   : > { %v3869_v40 = vpop.eup %3868 }
 0x5b1   : > { %v3871_v28 = vpop.eup %3870  ;;  %v3302_v23 = vmul.f32 0.6931472, %v3869_v40  ;;  %v3230_v1 = vpop.xlane.xlu0 %3229 }
 0x5b2   : > { %v3304_v2 = vmul.f32 0.6931472, %v3871_v28  ;;  %3872 = vlog2.f32 %v3230_v1 }
 0x5b3   : > { %v3348_v14 = vsub.f32 %v6343_v17, %v3302_v23 }
 0x5b4   : > { %v3349_v29 = vsub.f32 %v6351_v31, %v3304_v2 }
 0x5b5   : > { %3380 = vst.msk [vmem:[%s6339_s14 + $0x88] sm:$0xff] %vm2978_vm2, %v3348_v14 }
 0x5b6   : > { %3381 = vst.msk [vmem:[%s6339_s14 + $0x90] sm:$0xff] %vm2978_vm2, %v3349_v29 }
 0x5b8   : > { %v3873_v39 = vpop.eup %3872 }
 0x5b9   : > { %v3306_v26 = vmul.f32 0.6931472, %v3873_v39  ;;  %v3233_v32 = vpop.xlane.xlu1 %3232 }
 0x5ba   : > { %3874 = vlog2.f32 %v3233_v32 }
 0x5bb   : > { %v3350_v54 = vsub.f32 %v6359_v37, %v3306_v26 }
 0x5bd   : > { %3382 = vst.msk [vmem:[%s6339_s14 + $0x98] sm:$0xff] %vm2978_vm2, %v3350_v54 }
 0x5c0   : > { %v3875_v51 = vpop.eup %3874 }
 0x5c1   : > { %v3308_v41 = vmul.f32 0.6931472, %v3875_v51  ;;  %v3236_v5 = vpop.xlane.xlu2 %3235 }
 0x5c2   : > { %3876 = vlog2.f32 %v3236_v5 }
 0x5c3   : > { %v3351_v17 = vsub.f32 %v6368_v35, %v3308_v41 }
 0x5c5   : > { %3383 = vst.msk [vmem:[%s6339_s14 + $0xa0] sm:$0xff] %vm2978_vm2, %v3351_v17 }
 0x5c8   : > { %v3877_v31 = vpop.eup %3876 }
 0x5c9   : > { %v3310_v22 = vmul.f32 0.6931472, %v3877_v31  ;;  %v3239_v62 = vpop.xlane.xlu0 %3238 }
 0x5ca   : > { %3878 = vlog2.f32 %v3239_v62 }
 0x5cb   : > { %v3352_v19 = vsub.f32 %v6376_v59, %v3310_v22 }
 0x5cd   : > { %3384 = vst.msk [vmem:[%s6339_s14 + $0xa8] sm:$0xff] %vm2978_vm2, %v3352_v19 }
 0x5d0   : > { %v3879_v37 = vpop.eup %3878 }
 0x5d1   : > { %v3312_v16 = vmul.f32 0.6931472, %v3879_v37  ;;  %v3242_v10 = vpop.xlane.xlu1 %3241 }
 0x5d2   : > { %3880 = vlog2.f32 %v3242_v10 }
 0x5d3   : > { %v3353_v45 = vsub.f32 %v6384_v53, %v3312_v16 }
 0x5d5   : > { %3385 = vst.msk [vmem:[%s6339_s14 + $0xb0] sm:$0xff] %vm2978_vm2, %v3353_v45 }
 0x5d8   : > { %v3881_v35 = vpop.eup %3880 }
 0x5d9   : > { %v3314_v7 = vmul.f32 0.6931472, %v3881_v35  ;;  %v3245_v57 = vpop.xlane.xlu2 %3244 }
 0x5da   : > { %3882 = vlog2.f32 %v3245_v57 }
 0x5db   : > { %v3354_v21 = vsub.f32 %v6392_v34, %v3314_v7 }
 0x5dd   : > { %3386 = vst.msk [vmem:[%s6339_s14 + $0xb8] sm:$0xff] %vm2978_vm2, %v3354_v21 }
 0x5e0   : > { %v3883_v59 = vpop.eup %3882 }
 0x5e1   : > { %v3316_v42 = vmul.f32 0.6931472, %v3883_v59  ;;  %v3248_v47 = vpop.xlane.xlu0 %3247 }
 0x5e2   : > { %3884 = vlog2.f32 %v3248_v47 }
 0x5e3   : > { %v3355_v46 = vsub.f32 %v6400_v33, %v3316_v42 }
 0x5e5   : > { %3387 = vst.msk [vmem:[%s6339_s14 + $0xc0] sm:$0xff] %vm2978_vm2, %v3355_v46 }
 0x5e8   : > { %v3885_v53 = vpop.eup %3884 }
 0x5e9   : > { %v3318_v49 = vmul.f32 0.6931472, %v3885_v53  ;;  %v3251_v6 = vpop.xlane.xlu1 %3250 }
 0x5ea   : > { %3886 = vlog2.f32 %v3251_v6 }
 0x5eb   : > { %v3356_v0 = vsub.f32 %v6408_v13, %v3318_v49 }
 0x5ed   : > { %3388 = vst.msk [vmem:[%s6339_s14 + $0xc8] sm:$0xff] %vm2978_vm2, %v3356_v0 }
 0x5f0   : > { %v3887_v34 = vpop.eup %3886 }
 0x5f1   : > { %v3320_v20 = vmul.f32 0.6931472, %v3887_v34  ;;  %v3254_v52 = vpop.xlane.xlu2 %3253 }
 0x5f2   : > { %3888 = vlog2.f32 %v3254_v52 }
 0x5f3   : > { %v3357_v44 = vsub.f32 %v6416_v4, %v3320_v20 }
 0x5f5   : > { %3389 = vst.msk [vmem:[%s6339_s14 + $0xd0] sm:$0xff] %vm2978_vm2, %v3357_v44 }
 0x5f8   : > { %v3889_v33 = vpop.eup %3888 }
 0x5f9   : > { %v3322_v15 = vmul.f32 0.6931472, %v3889_v33  ;;  %v3257_v3 = vpop.xlane.xlu0 %3256 }
 0x5fa   : > { %3890 = vlog2.f32 %v3257_v3 }
 0x5fb   : > { %v3358_v63 = vsub.f32 %v6424_v36, %v3322_v15 }
 0x5fd   : > { %3390 = vst.msk [vmem:[%s6339_s14 + $0xd8] sm:$0xff] %vm2978_vm2, %v3358_v63 }
 0x600   : > { %v3891_v13 = vpop.eup %3890 }
 0x601   : > { %v3324_v11 = vmul.f32 0.6931472, %v3891_v13  ;;  %v3260_v61 = vpop.xlane.xlu1 %3259 }
 0x602   : > { %3892 = vlog2.f32 %v3260_v61 }
 0x603   : > { %v3359_v50 = vsub.f32 %v6432_v24, %v3324_v11 }
 0x605   : > { %3391 = vst.msk [vmem:[%s6339_s14 + $0xe0] sm:$0xff] %vm2978_vm2, %v3359_v50 }
 0x608   : > { %v3893_v4 = vpop.eup %3892 }
 0x609   : > { %v3326_v60 = vmul.f32 0.6931472, %v3893_v4  ;;  %v3263_v18 = vpop.xlane.xlu2 %3262 }
 0x60a   : > { %3894 = vlog2.f32 %v3263_v18 }
 0x60b   : > { %v3360_v48 = vsub.f32 %v6437_v27, %v3326_v60 }
 0x60d   : > { %3392 = vst.msk [vmem:[%s6339_s14 + $0xe8] sm:$0xff] %vm2978_vm2, %v3360_v48 }
 0x610   : > { %v3895_v36 = vpop.eup %3894 }
 0x611   : > { %v3328_v8 = vmul.f32 0.6931472, %v3895_v36  ;;  %v3266_v30 = vpop.xlane.xlu0 %3265 }
 0x612   : > { %3896 = vlog2.f32 %v3266_v30 }
 0x613   : > { %v3361_v56 = vsub.f32 %v6442_v12, %v3328_v8 }
 0x615   : > { %3393 = vst.msk [vmem:[%s6339_s14 + $0xf0] sm:$0xff] %vm2978_vm2, %v3361_v56 }
 0x618   : > { %v3897_v24 = vpop.eup %3896 }
 0x619   : > { %v3330_v58 = vmul.f32 0.6931472, %v3897_v24 }
 0x61b   : > { %v3362_v55 = vsub.f32 %v6447_v25, %v3330_v58 }
 0x61d   : > { %3394 = vst.msk [vmem:[%s6339_s14 + $0xf8] sm:$0xff] %vm2978_vm2, %v3362_v55 }
 0x61e PF: > { %s19_s30 = sadd.s32 1, %s3943_s30  }
 0x61f   : > { %p16_p4 = scmp.ge.s32.totalorder %s19_s30, 4  }
 0x621   :  { %18 = sbr.rel (!%p16_p4) target bundleno = 1 (0x1), region = 86 }

</bundles_post_ra>
